<compile_context>
chip_gen: v5e
topology: v5e:2x2
jax: 0.10.0
libtpu: 0.0.40
codegen_flags: <defaults>
</compile_context>

<pallas_src>
import functools
import math

import jax
import jax.numpy as jnp
from jax.experimental import pallas as pl
from jax.experimental.pallas import tpu as pltpu


def spectral_attention_kernel(x_ref, wqkv_ref, bqkv_ref, wfc_ref, vecs_ref,
                              o_ref, *, n_head, d_k):
    bt, D, M = x_ref.shape            # x block: (bt, D, M), float32
    rows = bt * D
    HDK = n_head * d_k
    cd = wqkv_ref.dtype               # matmul compute dtype (bf16)

    # Fuse the batch tile into the MXU row dimension: (bt*D, M).
    xf = x_ref[...].reshape(rows, M)  # f32, also the residual
    xm = xf.astype(cd)

    # One fused projection: (rows, M) @ (M, 3*HDK).  The Wq / bq slice is
    # pre-scaled by 1/sqrt(d_k) in the wrapper.
    qkv = jnp.dot(xm, wqkv_ref[...], preferred_element_type=jnp.float32)
    qkv = qkv + bqkv_ref[...]                         # (rows, 3*HDK), f32

    # Per-head attention via static 128-lane-aligned slices (n_head is tiny
    # and static, so this unrolls fully).
    head_outs = []
    for h in range(n_head):
        q = qkv[:, h * d_k:(h + 1) * d_k].reshape(bt, D, d_k).astype(cd)
        k = qkv[:, HDK + h * d_k: HDK + (h + 1) * d_k].reshape(bt, D, d_k).astype(cd)
        v = qkv[:, 2 * HDK + h * d_k: 2 * HDK + (h + 1) * d_k].reshape(bt, D, d_k).astype(cd)

        # Scores: contract d_k without an explicit transpose.
        s = jnp.einsum('bqd,bkd->bqk', q, k, preferred_element_type=jnp.float32)
        s = s - jnp.max(s, axis=-1, keepdims=True)
        p = jnp.exp(s)
        p = p * pl.reciprocal(jnp.sum(p, axis=-1, keepdims=True), approx=True)
        # TODO(synk): dropout1 / dropout2 omitted (identity in eval mode).

        o3 = jnp.einsum('bqk,bkd->bqd', p.astype(cd), v,
                        preferred_element_type=jnp.float32)   # (bt, D, d_k)
        head_outs.append(o3.reshape(rows, d_k).astype(cd))

    # Lane-aligned concat -> single fc contraction with K = HDK.
    of = jnp.concatenate(head_outs, axis=-1)                  # (rows, HDK) bf16
    out = jnp.dot(of, wfc_ref[...], preferred_element_type=jnp.float32)

    out = out + vecs_ref[0:1, :]                              # + bfc
    out = jnp.maximum(out, 0.0) + xf                          # ReLU + residual
    # LayerNorm over M (eps = 1e-5, biased variance, like torch.nn.LayerNorm).
    mean = jnp.mean(out, axis=-1, keepdims=True)
    ctr = out - mean
    var = jnp.mean(ctr * ctr, axis=-1, keepdims=True)
    out = ctr * jax.lax.rsqrt(var + 1e-5)
    out = out * vecs_ref[1:2, :] + vecs_ref[2:3, :]           # gamma, beta
    o_ref[...] = out.reshape(bt, D, M)


def _default_batch_tile(B, D, M):
    """Batch tile: whole batch on single-TC parts; even >=2 grid extent on v7x."""
    two_tc = False
    try:
        kind = jax.devices()[0].device_kind.lower()
        two_tc = "v7" in kind
    except Exception:
        pass
    # Bound the per-step x/out block (f32, double-buffered) to a few MiB.
    max_rows = max(8, min(1024, (4 * 1024 * 1024) // (4 * max(M, 1))))
    target = max(1, min(B, max_rows // max(D, 1)))
    if two_tc and B >= 2:
        target = min(target, B // 2)          # keep both TensorCores busy
    for bt in range(target, 0, -1):
        if B % bt != 0:
            continue
        if two_tc and B >= 2 and (B // bt) % 2 != 0:
            continue
        return bt
    return 1


def spectral_attention(x, params, *, n_head, d_k, batch_tile=None,
                       compute_dtype=jnp.bfloat16):
    """x: (B, N, T, D) float32. Returns (B, N, T, D) float32."""
    B, N, T, D = x.shape
    M = N * T
    HDK = n_head * d_k
    wq, bq, wk, bk, wv, bv, wfc, bfc, gamma, beta = params
    assert wq.shape == (M, HDK) and wfc.shape == (HDK, M)

    bt = batch_tile if batch_tile is not None else _default_batch_tile(B, D, M)
    assert B % bt == 0, "batch must be divisible by the batch tile"

    # (B, N, T, D) -> (B, D, M): keeps the kernel's lane dim = M (128-multiple).
    # TODO(synk): keep activations in (B, D, M) across the model to avoid this
    # extra HBM round trip outside the kernel.
    x2 = jnp.transpose(x, (0, 3, 1, 2)).reshape(B, D, M)

    # Fold 1/sqrt(d_k) into the query projection; fuse Wq|Wk|Wv and their
    # biases; cast matmul weights to bf16 (f32 accumulation on the MXU).
    scale = 1.0 / math.sqrt(d_k)
    wqkv = jnp.concatenate([wq * scale, wk, wv], axis=1).astype(compute_dtype)
    bqkv = jnp.concatenate([bq * scale, bk, bv], axis=1).astype(jnp.float32)
    wfc_c = wfc.astype(compute_dtype)
    vecs = jnp.concatenate([bfc, gamma, beta], axis=0).astype(jnp.float32)

    grid = (B // bt,)

    flops = (2 * B * D * M * 3 * HDK          # fused QKV projection
             + 4 * B * n_head * D * D * d_k   # QK^T and PV
             + 2 * B * D * HDK * M)           # fc
    transcendentals = B * n_head * D * D + 2 * B * D
    bytes_accessed = (2 * B * D * M * 4       # x in + out
                      + wqkv.size * 2 + wfc_c.size * 2
                      + bqkv.size * 4 + vecs.size * 4)

    kernel = functools.partial(spectral_attention_kernel, n_head=n_head, d_k=d_k)

    out = pl.pallas_call(
        kernel,
        out_shape=jax.ShapeDtypeStruct((B, D, M), jnp.float32),
        grid_spec=pltpu.PrefetchScalarGridSpec(
            num_scalar_prefetch=0,
            grid=grid,
            in_specs=[
                pl.BlockSpec((bt, D, M), lambda b: (b, 0, 0)),      # x (f32)
                pl.BlockSpec((M, 3 * HDK), lambda b: (0, 0)),       # Wq|Wk|Wv (bf16)
                pl.BlockSpec((1, 3 * HDK), lambda b: (0, 0)),       # bq|bk|bv (f32)
                pl.BlockSpec((HDK, M), lambda b: (0, 0)),           # Wfc (bf16)
                pl.BlockSpec((3, M), lambda b: (0, 0)),             # bfc/gamma/beta
            ],
            out_specs=pl.BlockSpec((bt, D, M), lambda b: (b, 0, 0)),
        ),
        compiler_params=pltpu.CompilerParams(
            dimension_semantics=("parallel",),
            vmem_limit_bytes=32 * 1024 * 1024,
        ),
        cost_estimate=pl.CostEstimate(flops=flops,
                                      transcendentals=transcendentals,
                                      bytes_accessed=bytes_accessed),
    )(x2, wqkv, bqkv, wfc_c, vecs)

    return jnp.transpose(out.reshape(B, D, N, T), (0, 2, 3, 1))


def spectral_attention_ref(x, params, *, n_head, d_k):
    """Pure-JAX (f32) reference mirroring the PyTorch forward (eval mode)."""
    B, N, T, D = x.shape
    M = N * T
    wq, bq, wk, bk, wv, bv, wfc, bfc, gamma, beta = params
    xr = jnp.transpose(x, (0, 3, 1, 2)).reshape(B, D, M)
    residual = xr
    q = (xr @ wq + bq[0]).reshape(B, D, n_head, d_k).transpose(0, 2, 1, 3)
    k = (xr @ wk + bk[0]).reshape(B, D, n_head, d_k).transpose(0, 2, 1, 3)
    v = (xr @ wv + bv[0]).reshape(B, D, n_head, d_k).transpose(0, 2, 1, 3)
    attn = jnp.einsum("bhid,bhjd->bhij", q, k) / math.sqrt(d_k)
    scores = jax.nn.softmax(attn, axis=-1)
    out = jnp.einsum("bhij,bhjd->bhid", scores, v)
    out = out.transpose(0, 2, 1, 3).reshape(B, D, n_head * d_k)
    out = out @ wfc + bfc[0]
    out = jax.nn.relu(out) + residual
    mean = jnp.mean(out, axis=-1, keepdims=True)
    var = jnp.mean((out - mean) ** 2, axis=-1, keepdims=True)
    out = (out - mean) / jnp.sqrt(var + 1e-5) * gamma[0] + beta[0]
    return jnp.transpose(out.reshape(B, D, N, T), (0, 2, 3, 1))


def init_params(key, num_nods, lag, n_head, d_k):
    M = num_nods * lag
    HDK = n_head * d_k
    ks = jax.random.split(key, 8)
    s_in = 1.0 / math.sqrt(M)
    s_fc = 1.0 / math.sqrt(HDK)
    wq = jax.random.uniform(ks[0], (M, HDK), jnp.float32, -s_in, s_in)
    bq = jax.random.uniform(ks[1], (1, HDK), jnp.float32, -s_in, s_in)
    wk = jax.random.uniform(ks[2], (M, HDK), jnp.float32, -s_in, s_in)
    bk = jax.random.uniform(ks[3], (1, HDK), jnp.float32, -s_in, s_in)
    wv = jax.random.uniform(ks[4], (M, HDK), jnp.float32, -s_in, s_in)
    bv = jax.random.uniform(ks[5], (1, HDK), jnp.float32, -s_in, s_in)
    wfc = jax.random.uniform(ks[6], (HDK, M), jnp.float32, -s_fc, s_fc)
    bfc = jax.random.uniform(ks[7], (1, M), jnp.float32, -s_fc, s_fc)
    gamma = jnp.ones((1, M), jnp.float32)
    beta = jnp.zeros((1, M), jnp.float32)
    return (wq, bq, wk, bk, wv, bv, wfc, bfc, gamma, beta)


if __name__ == "__main__":
    # M = N*T = 128 and d_k = 128 (lane-dense loads, stores and weight blocks);
    # D = 16 so a batch tile of 8 or 16 gives 128 / 256 fused MXU rows.
    B, N, T, D = 16, 8, 16, 16
    n_head, d_k = 2, 128

    key = jax.random.PRNGKey(0)
    kx, kp = jax.random.split(key)
    x = jax.random.normal(kx, (B, N, T, D), jnp.float32)
    params = init_params(kp, N, T, n_head, d_k)

    fwd = jax.jit(functools.partial(spectral_attention, n_head=n_head, d_k=d_k))
    out = fwd(x, params)
    out = jax.block_until_ready(out)

    ref = spectral_attention_ref(x, params, n_head=n_head, d_k=d_k)
    assert out.shape == (B, N, T, D)
    # bf16 MXU operands (f32 accumulation) + approx softmax reciprocal ->
    # relaxed tolerance vs the f32 reference (deliberate accuracy/speed trade).
    assert jnp.allclose(out, ref, atol=2e-2, rtol=2e-2), "mismatch vs reference"

    print("KERNEL_OK")
</pallas_src>

<mosaic_0001>
module attributes {stable_mosaic.version = 11 : i64} {
  func.func @spectral_attention_kernel(%arg0: i32, %arg1: memref<16x16x128xf32, #tpu.memory_space<vmem>>, %arg2: memref<128x768xbf16, #tpu.memory_space<vmem>>, %arg3: memref<1x768xf32, #tpu.memory_space<vmem>>, %arg4: memref<256x128xbf16, #tpu.memory_space<vmem>>, %arg5: memref<3x128xf32, #tpu.memory_space<vmem>>, %arg6: memref<16x16x128xf32, #tpu.memory_space<vmem>>) attributes {dimension_semantics = [#tpu.dimension_semantics<parallel>], iteration_bounds = array<i64: 1>, scalar_prefetch = 0 : i64, scratch_operands = 0 : i64, tpu.core_type = #tpu.core_type<tc>, window_params = [{transform_indices = @transform_0, window_bounds = array<i64: 16, 16, 128>}, {pipeline_mode = #tpu.pipeline_mode<synchronous>, transform_indices = @transform_1, window_bounds = array<i64: 128, 768>}, {pipeline_mode = #tpu.pipeline_mode<synchronous>, transform_indices = @transform_2, window_bounds = array<i64: 1, 768>}, {pipeline_mode = #tpu.pipeline_mode<synchronous>, transform_indices = @transform_3, window_bounds = array<i64: 256, 128>}, {pipeline_mode = #tpu.pipeline_mode<synchronous>, transform_indices = @transform_4, window_bounds = array<i64: 3, 128>}, {transform_indices = @transform_5, window_bounds = array<i64: 16, 16, 128>}]} {
    %c0 = arith.constant 0 : index
    %c0_0 = arith.constant 0 : index
    %c0_1 = arith.constant 0 : index
    %0 = vector.load %arg1[%c0, %c0_0, %c0_1] : memref<16x16x128xf32, #tpu.memory_space<vmem>>, vector<16x16x128xf32>
    %1 = vector.shape_cast %0 : vector<16x16x128xf32> to vector<256x128xf32>
    %2 = arith.truncf %1 : vector<256x128xf32> to vector<256x128xbf16>
    %c0_2 = arith.constant 0 : index
    %c0_3 = arith.constant 0 : index
    %3 = vector.load %arg2[%c0_2, %c0_3] : memref<128x768xbf16, #tpu.memory_space<vmem>>, vector<128x768xbf16>
    %cst = arith.constant dense<0.000000e+00> : vector<256x768xf32>
    %4 = tpu.matmul %2, %3, %cst {dimension_numbers = #tpu.dot_dimension_numbers<[1], [0], [0], [1], [0, 0, 1, 1], [], []>} : vector<256x128xbf16>, vector<128x768xbf16>, vector<256x768xf32> -> vector<256x768xf32>
    %c0_4 = arith.constant 0 : index
    %c0_5 = arith.constant 0 : index
    %5 = vector.load %arg3[%c0_4, %c0_5] : memref<1x768xf32, #tpu.memory_space<vmem>>, vector<1x768xf32>
    %6 = vector.broadcast %5 : vector<1x768xf32> to vector<256x768xf32>
    %7 = arith.addf %4, %6 : vector<256x768xf32>
    %8 = vector.extract_strided_slice %7 {offsets = [0, 0], sizes = [256, 128], strides = [1, 1]} : vector<256x768xf32> to vector<256x128xf32>
    %9 = vector.shape_cast %8 : vector<256x128xf32> to vector<16x16x128xf32>
    %10 = arith.truncf %9 : vector<16x16x128xf32> to vector<16x16x128xbf16>
    %11 = vector.extract_strided_slice %7 {offsets = [0, 256], sizes = [256, 128], strides = [1, 1]} : vector<256x768xf32> to vector<256x128xf32>
    %12 = vector.shape_cast %11 : vector<256x128xf32> to vector<16x16x128xf32>
    %13 = arith.truncf %12 : vector<16x16x128xf32> to vector<16x16x128xbf16>
    %14 = vector.extract_strided_slice %7 {offsets = [0, 512], sizes = [256, 128], strides = [1, 1]} : vector<256x768xf32> to vector<256x128xf32>
    %15 = vector.shape_cast %14 : vector<256x128xf32> to vector<16x16x128xf32>
    %16 = arith.truncf %15 : vector<16x16x128xf32> to vector<16x16x128xbf16>
    "tpu.trace_start"() <{level = 10 : i32, message = "bqd,bkd->bqk"}> : () -> ()
    %cst_6 = arith.constant dense<0.000000e+00> : vector<16x16x16xf32>
    %17 = tpu.matmul %10, %13, %cst_6 {dimension_numbers = #tpu.dot_dimension_numbers<[2], [2], [1], [1], [0, 0, 0, 1, 1, 1], [0], [0]>} : vector<16x16x128xbf16>, vector<16x16x128xbf16>, vector<16x16x16xf32> -> vector<16x16x16xf32>
    "tpu.trace_stop"() : () -> ()
    %cst_7 = arith.constant dense<0xFF800000> : vector<16x16xf32>
    %18 = vector.multi_reduction <maximumf>, %17, %cst_7 [2] : vector<16x16x16xf32> to vector<16x16xf32>
    %19 = vector.shape_cast %18 : vector<16x16xf32> to vector<16x16x1xf32>
    %20 = vector.broadcast %19 : vector<16x16x1xf32> to vector<16x16x16xf32>
    %21 = arith.subf %17, %20 : vector<16x16x16xf32>
    %22 = math.exp %21 : vector<16x16x16xf32>
    %cst_8 = arith.constant dense<0.000000e+00> : vector<16x16xf32>
    %23 = vector.multi_reduction <add>, %22, %cst_8 [2] : vector<16x16x16xf32> to vector<16x16xf32>
    %24 = vector.shape_cast %23 : vector<16x16xf32> to vector<16x16x1xf32>
    %25 = tpu.reciprocal %24 {approx = true} : vector<16x16x1xf32> -> vector<16x16x1xf32>
    %26 = vector.broadcast %25 : vector<16x16x1xf32> to vector<16x16x16xf32>
    %27 = arith.mulf %22, %26 : vector<16x16x16xf32>
    %28 = arith.truncf %27 : vector<16x16x16xf32> to vector<16x16x16xbf16>
    "tpu.trace_start"() <{level = 10 : i32, message = "bqk,bkd->bqd"}> : () -> ()
    %cst_9 = arith.constant dense<0.000000e+00> : vector<16x16x128xf32>
    %29 = tpu.matmul %28, %16, %cst_9 {dimension_numbers = #tpu.dot_dimension_numbers<[2], [1], [1], [2], [0, 0, 0, 1, 1, 2], [0], [0]>} : vector<16x16x16xbf16>, vector<16x16x128xbf16>, vector<16x16x128xf32> -> vector<16x16x128xf32>
    "tpu.trace_stop"() : () -> ()
    %30 = vector.shape_cast %29 : vector<16x16x128xf32> to vector<256x128xf32>
    %31 = arith.truncf %30 : vector<256x128xf32> to vector<256x128xbf16>
    %32 = vector.extract_strided_slice %7 {offsets = [0, 128], sizes = [256, 128], strides = [1, 1]} : vector<256x768xf32> to vector<256x128xf32>
    %33 = vector.shape_cast %32 : vector<256x128xf32> to vector<16x16x128xf32>
    %34 = arith.truncf %33 : vector<16x16x128xf32> to vector<16x16x128xbf16>
    %35 = vector.extract_strided_slice %7 {offsets = [0, 384], sizes = [256, 128], strides = [1, 1]} : vector<256x768xf32> to vector<256x128xf32>
    %36 = vector.shape_cast %35 : vector<256x128xf32> to vector<16x16x128xf32>
    %37 = arith.truncf %36 : vector<16x16x128xf32> to vector<16x16x128xbf16>
    %38 = vector.extract_strided_slice %7 {offsets = [0, 640], sizes = [256, 128], strides = [1, 1]} : vector<256x768xf32> to vector<256x128xf32>
    %39 = vector.shape_cast %38 : vector<256x128xf32> to vector<16x16x128xf32>
    %40 = arith.truncf %39 : vector<16x16x128xf32> to vector<16x16x128xbf16>
    "tpu.trace_start"() <{level = 10 : i32, message = "bqd,bkd->bqk"}> : () -> ()
    %cst_10 = arith.constant dense<0.000000e+00> : vector<16x16x16xf32>
    %41 = tpu.matmul %34, %37, %cst_10 {dimension_numbers = #tpu.dot_dimension_numbers<[2], [2], [1], [1], [0, 0, 0, 1, 1, 1], [0], [0]>} : vector<16x16x128xbf16>, vector<16x16x128xbf16>, vector<16x16x16xf32> -> vector<16x16x16xf32>
    "tpu.trace_stop"() : () -> ()
    %cst_11 = arith.constant dense<0xFF800000> : vector<16x16xf32>
    %42 = vector.multi_reduction <maximumf>, %41, %cst_11 [2] : vector<16x16x16xf32> to vector<16x16xf32>
    %43 = vector.shape_cast %42 : vector<16x16xf32> to vector<16x16x1xf32>
    %44 = vector.broadcast %43 : vector<16x16x1xf32> to vector<16x16x16xf32>
    %45 = arith.subf %41, %44 : vector<16x16x16xf32>
    %46 = math.exp %45 : vector<16x16x16xf32>
    %cst_12 = arith.constant dense<0.000000e+00> : vector<16x16xf32>
    %47 = vector.multi_reduction <add>, %46, %cst_12 [2] : vector<16x16x16xf32> to vector<16x16xf32>
    %48 = vector.shape_cast %47 : vector<16x16xf32> to vector<16x16x1xf32>
    %49 = tpu.reciprocal %48 {approx = true} : vector<16x16x1xf32> -> vector<16x16x1xf32>
    %50 = vector.broadcast %49 : vector<16x16x1xf32> to vector<16x16x16xf32>
    %51 = arith.mulf %46, %50 : vector<16x16x16xf32>
    %52 = arith.truncf %51 : vector<16x16x16xf32> to vector<16x16x16xbf16>
    "tpu.trace_start"() <{level = 10 : i32, message = "bqk,bkd->bqd"}> : () -> ()
    %cst_13 = arith.constant dense<0.000000e+00> : vector<16x16x128xf32>
    %53 = tpu.matmul %52, %40, %cst_13 {dimension_numbers = #tpu.dot_dimension_numbers<[2], [1], [1], [2], [0, 0, 0, 1, 1, 2], [0], [0]>} : vector<16x16x16xbf16>, vector<16x16x128xbf16>, vector<16x16x128xf32> -> vector<16x16x128xf32>
    "tpu.trace_stop"() : () -> ()
    %54 = vector.shape_cast %53 : vector<16x16x128xf32> to vector<256x128xf32>
    %55 = arith.truncf %54 : vector<256x128xf32> to vector<256x128xbf16>
    %56 = tpu.concatenate %31, %55 in 1 : vector<256x128xbf16>, vector<256x128xbf16> -> vector<256x256xbf16>
    %c0_14 = arith.constant 0 : index
    %c0_15 = arith.constant 0 : index
    %57 = vector.load %arg4[%c0_14, %c0_15] : memref<256x128xbf16, #tpu.memory_space<vmem>>, vector<256x128xbf16>
    %cst_16 = arith.constant dense<0.000000e+00> : vector<256x128xf32>
    %58 = tpu.matmul %56, %57, %cst_16 {dimension_numbers = #tpu.dot_dimension_numbers<[1], [0], [0], [1], [0, 0, 1, 1], [], []>} : vector<256x256xbf16>, vector<256x128xbf16>, vector<256x128xf32> -> vector<256x128xf32>
    %c0_17 = arith.constant 0 : index
    %c0_18 = arith.constant 0 : index
    %59 = vector.load %arg5[%c0_17, %c0_18] : memref<3x128xf32, #tpu.memory_space<vmem>>, vector<1x128xf32>
    %60 = vector.broadcast %59 : vector<1x128xf32> to vector<256x128xf32>
    %61 = arith.addf %58, %60 : vector<256x128xf32>
    %cst_19 = arith.constant 0.000000e+00 : f32
    %62 = vector.broadcast %cst_19 : f32 to vector<256x128xf32>
    %63 = arith.maximumf %61, %62 : vector<256x128xf32>
    %64 = arith.addf %63, %1 : vector<256x128xf32>
    %cst_20 = arith.constant dense<0.000000e+00> : vector<256xf32>
    %65 = vector.multi_reduction <add>, %64, %cst_20 [1] : vector<256x128xf32> to vector<256xf32>
    %66 = vector.shape_cast %65 : vector<256xf32> to vector<256x1xf32>
    %cst_21 = arith.constant 1.280000e+02 : f32
    %67 = vector.broadcast %cst_21 : f32 to vector<256x1xf32>
    %68 = arith.divf %66, %67 : vector<256x1xf32>
    %69 = vector.broadcast %68 : vector<256x1xf32> to vector<256x128xf32>
    %70 = arith.subf %64, %69 : vector<256x128xf32>
    %71 = arith.mulf %70, %70 : vector<256x128xf32>
    %cst_22 = arith.constant dense<0.000000e+00> : vector<256xf32>
    %72 = vector.multi_reduction <add>, %71, %cst_22 [1] : vector<256x128xf32> to vector<256xf32>
    %73 = vector.shape_cast %72 : vector<256xf32> to vector<256x1xf32>
    %cst_23 = arith.constant 1.280000e+02 : f32
    %74 = vector.broadcast %cst_23 : f32 to vector<256x1xf32>
    %75 = arith.divf %73, %74 : vector<256x1xf32>
    %cst_24 = arith.constant 9.99999974E-6 : f32
    %76 = vector.broadcast %cst_24 : f32 to vector<256x1xf32>
    %77 = arith.addf %75, %76 : vector<256x1xf32>
    %78 = math.rsqrt %77 : vector<256x1xf32>
    %79 = vector.broadcast %78 : vector<256x1xf32> to vector<256x128xf32>
    %80 = arith.mulf %70, %79 : vector<256x128xf32>
    %c1 = arith.constant 1 : index
    %c0_25 = arith.constant 0 : index
    %81 = vector.load %arg5[%c1, %c0_25] : memref<3x128xf32, #tpu.memory_space<vmem>>, vector<1x128xf32>
    %82 = vector.broadcast %81 : vector<1x128xf32> to vector<256x128xf32>
    %83 = arith.mulf %80, %82 : vector<256x128xf32>
    %c2 = arith.constant 2 : index
    %c0_26 = arith.constant 0 : index
    %84 = vector.load %arg5[%c2, %c0_26] : memref<3x128xf32, #tpu.memory_space<vmem>>, vector<1x128xf32>
    %85 = vector.broadcast %84 : vector<1x128xf32> to vector<256x128xf32>
    %86 = arith.addf %83, %85 : vector<256x128xf32>
    %87 = vector.shape_cast %86 : vector<256x128xf32> to vector<16x16x128xf32>
    %c0_27 = arith.constant 0 : index
    %c0_28 = arith.constant 0 : index
    %c0_29 = arith.constant 0 : index
    %88 = vector.load %arg6[%c0_27, %c0_28, %c0_29] : memref<16x16x128xf32, #tpu.memory_space<vmem>>, vector<16x16x128xf32>
    tpu.vector_store %arg6[%c0_27, %c0_28, %c0_29], %87 {strides = array<i32>} : memref<16x16x128xf32, #tpu.memory_space<vmem>>, vector<16x16x128xf32>,
    return
  }
  func.func @transform_0(%arg0: i32) -> (i32, i32, i32) {
    %c0_i32 = arith.constant 0 : i32
    %c0_i32_0 = arith.constant 0 : i32
    %c0_i32_1 = arith.constant 0 : i32
    return %arg0, %c0_i32, %c0_i32_0 : i32, i32, i32
  }
  func.func @transform_1(%arg0: i32) -> (i32, i32) {
    %c0_i32 = arith.constant 0 : i32
    %c0_i32_0 = arith.constant 0 : i32
    %c0_i32_1 = arith.constant 0 : i32
    return %c0_i32, %c0_i32_0 : i32, i32
  }
  func.func @transform_2(%arg0: i32) -> (i32, i32) {
    %c0_i32 = arith.constant 0 : i32
    %c0_i32_0 = arith.constant 0 : i32
    %c0_i32_1 = arith.constant 0 : i32
    return %c0_i32, %c0_i32_0 : i32, i32
  }
  func.func @transform_3(%arg0: i32) -> (i32, i32) {
    %c0_i32 = arith.constant 0 : i32
    %c0_i32_0 = arith.constant 0 : i32
    %c0_i32_1 = arith.constant 0 : i32
    return %c0_i32, %c0_i32_0 : i32, i32
  }
  func.func @transform_4(%arg0: i32) -> (i32, i32) {
    %c0_i32 = arith.constant 0 : i32
    %c0_i32_0 = arith.constant 0 : i32
    %c0_i32_1 = arith.constant 0 : i32
    return %c0_i32, %c0_i32_0 : i32, i32
  }
  func.func @transform_5(%arg0: i32) -> (i32, i32, i32) {
    %c0_i32 = arith.constant 0 : i32
    %c0_i32_0 = arith.constant 0 : i32
    %c0_i32_1 = arith.constant 0 : i32
    return %arg0, %c0_i32, %c0_i32_0 : i32, i32, i32
  }
}

</mosaic_0001>

<bundles_post_ra>
// kernel: spectral_attention.1
= control target key start
LH: loop header
LB: loop body
LE: loop exit
PB: predicated region body
PF: predicated region fallthrough
CT: control target
= control target key end

     0   :  { %vm1417_vm0 = vcmask 130048   ;;  %s8750_s1 = inlined_call_operand.vmem [shape: bf16[128,768], index: 1, kind: input, shape index: {}]   ;;  %s8751_s0 = inlined_call_operand.vmem [shape: f32[16,16,128], index: 0, kind: input, shape index: {}]   ;;  %s8752_s2 = inlined_call_operand.vmem [shape: f32[1,768], index: 2, kind: input, shape index: {}]   ;;  %s8753_s3 = inlined_call_operand.vmem [shape: bf16[256,128], index: 3, kind: input, shape index: {}]   ;;  %s8754_s4 = inlined_call_operand.vmem [shape: f32[3,128], index: 4, kind: input, shape index: {}]   ;;  %s8755_s5 = inlined_call_operand.vmem [shape: f32[16,16,128], index: 5, kind: output, shape index: {}]  }
   0x1   :  { %v5143_v0 = vld [vmem:[%s8750_s1 + $0x150] sm:$0xf]  ;;  %v5306_v1 = vld [vmem:[%s8750_s1 + $0x164] sm:$0xf0]  ;;  %v5303_v2 = vld [vmem:[%s8750_s1 + $0x154] sm:$0xf] }
   0x2   :  { %v5144_v3 = vor.u32 %v5306_v1, %v5143_v0  ;;  %v5145_v4 = vld [vmem:[%s8750_s1 + $0x168] sm:$0xf0]  ;;  %v5119_v5 = vld [vmem:[%s8750_s1 + $0x120] sm:$0xf]  ;;  %v5300_v6 = vld [vmem:[%s8750_s1 + $0x134] sm:$0xf0] }
   0x3   :  { %v5148_v7 = vor.u32 %v5303_v2, %v5145_v4  ;;  %v5297_v8 = vld [vmem:[%s8750_s1 + $0x124] sm:$0xf]  ;;  %v5121_v9 = vld [vmem:[%s8750_s1 + $0x138] sm:$0xf0]  ;;  %v5120_v10 = vor.u32 %v5300_v6, %v5119_v5  ;;  %v5095_v12 = vld [vmem:[%s8750_s1 + $0xf0] sm:$0xf] }
   0x4   :  { %371 = vmatpush.bf16.msra.mxu0 %v5144_v3  ;;  %5325 = vmatpush.bf16.msra.mxu2 %v5144_v3  ;;  %v5124_v11 = vor.u32 %v5297_v8, %v5121_v9  ;;  %v5294_v13 = vld [vmem:[%s8750_s1 + $0x104] sm:$0xf0]  ;;  %v5291_v14 = vld [vmem:[%s8750_s1 + $0xf4] sm:$0xf]  ;;  %v5097_v15 = vld [vmem:[%s8750_s1 + $0x108] sm:$0xf0] }
   0x5   :  { %5333 = vmatpush.bf16.msra.mxu3 %v5148_v7  ;;  %460 = vmatpush.bf16.msra.mxu1 %v5148_v7  ;;  %v5096_v16 = vor.u32 %v5294_v13, %v5095_v12  ;;  %v5100_v17 = vor.u32 %v5291_v14, %v5097_v15  ;;  %v5071_v18 = vld [vmem:[%s8750_s1 + $0xc0] sm:$0xf]  ;;  %v5288_v19 = vld [vmem:[%s8750_s1 + $0xd4] sm:$0xf0]  ;;  %v5285_v20 = vld [vmem:[%s8750_s1 + $0xc4] sm:$0xf] }
   0x6   :  { %v5073_v21 = vld [vmem:[%s8750_s1 + $0xd8] sm:$0xf0]  ;;  %v5072_v22 = vor.u32 %v5288_v19, %v5071_v18  ;;  %v5047_v24 = vld [vmem:[%s8750_s1 + $0x90] sm:$0xf]  ;;  %v5282_v25 = vld [vmem:[%s8750_s1 + $0xa4] sm:$0xf0] }
   0x7   :  { %v5076_v23 = vor.u32 %v5285_v20, %v5073_v21  ;;  %v5279_v26 = vld [vmem:[%s8750_s1 + $0x94] sm:$0xf]  ;;  %v5049_v27 = vld [vmem:[%s8750_s1 + $0xa8] sm:$0xf0]  ;;  %v5048_v28 = vor.u32 %v5282_v25, %v5047_v24  ;;  %v5023_v30 = vld [vmem:[%s8750_s1 + $0x60] sm:$0xf] }
   0x8   :  { %372 = vmatpush.bf16.msra.mxu0 %v5120_v10  ;;  %5326 = vmatpush.bf16.msra.mxu2 %v5120_v10  ;;  %v5052_v29 = vor.u32 %v5279_v26, %v5049_v27  ;;  %v5276_v31 = vld [vmem:[%s8750_s1 + $0x74] sm:$0xf0]  ;;  %v5273_v32 = vld [vmem:[%s8750_s1 + $0x64] sm:$0xf]  ;;  %v5025_v33 = vld [vmem:[%s8750_s1 + $0x78] sm:$0xf0] }
   0x9   :  { %5334 = vmatpush.bf16.msra.mxu3 %v5124_v11  ;;  %461 = vmatpush.bf16.msra.mxu1 %v5124_v11  ;;  %v5024_v34 = vor.u32 %v5276_v31, %v5023_v30  ;;  %v5028_v35 = vor.u32 %v5273_v32, %v5025_v33  ;;  %v4999_v36 = vld [vmem:[%s8750_s1 + $0x30] sm:$0xf]  ;;  %v5270_v37 = vld [vmem:[%s8750_s1 + $0x44] sm:$0xf0]  ;;  %v5267_v38 = vld [vmem:[%s8750_s1 + $0x34] sm:$0xf] }
   0xa   :  { %v5001_v39 = vld [vmem:[%s8750_s1 + $0x48] sm:$0xf0]  ;;  %v5000_v40 = vor.u32 %v5270_v37, %v4999_v36  ;;  %v4975_v42 = vld [vmem:[%s8750_s1] sm:$0xf]  ;;  %v5264_v43 = vld [vmem:[%s8750_s1 + $0x14] sm:$0xf0] }
   0xb   :  { %v5004_v41 = vor.u32 %v5267_v38, %v5001_v39  ;;  %v5261_v44 = vld [vmem:[%s8750_s1 + $0x4] sm:$0xf]  ;;  %v4977_v45 = vld [vmem:[%s8750_s1 + $0x18] sm:$0xf0]  ;;  %v4976_v47 = vor.u32 %v5264_v43, %v4975_v42  ;;  %v22_v48 = vld [vmem:[%s8751_s0 + $0x8] sm:$0xff] }
   0xc   :  { %373 = vmatpush.bf16.msra.mxu0 %v5096_v16  ;;  %5327 = vmatpush.bf16.msra.mxu2 %v5096_v16  ;;  %v21_v46 = vld [vmem:[%s8751_s0] sm:$0xff]  ;;  %v38_v50 = vld [vmem:[%s8751_s0 + $0x88] sm:$0xff]  ;;  %v4980_v51 = vor.u32 %v5261_v44, %v4977_v45  ;;  %v23_v54 = vld [vmem:[%s8751_s0 + $0x10] sm:$0xff] }
   0xd   :  { %5335 = vmatpush.bf16.msra.mxu3 %v5100_v17  ;;  %462 = vmatpush.bf16.msra.mxu1 %v5100_v17  ;;  %v37_v49 = vld [vmem:[%s8751_s0 + $0x80] sm:$0xff]  ;;  %v5840_v52 = vpack.c.bf16 %v22_v48, %v21_v46  ;;  %v24_v55 = vld [vmem:[%s8751_s0 + $0x18] sm:$0xff]  ;;  %v39_v56 = vld [vmem:[%s8751_s0 + $0x90] sm:$0xff] }
   0xe   :  { %v5842_v53 = vpack.c.bf16 %v38_v50, %v37_v49  ;;  %v40_v57 = vld [vmem:[%s8751_s0 + $0x98] sm:$0xff]  ;;  %v5860_v58 = vpack.c.bf16 %v24_v55, %v23_v54  ;;  %v25_v60 = vld [vmem:[%s8751_s0 + $0x20] sm:$0xff]  ;;  %v26_v61 = vld [vmem:[%s8751_s0 + $0x28] sm:$0xff] }
   0xf   :  { %v5862_v59 = vpack.c.bf16 %v40_v57, %v39_v56  ;;  %v41_v62 = vld [vmem:[%s8751_s0 + $0xa0] sm:$0xff]  ;;  %v42_v63 = vld [vmem:[%s8751_s0 + $0xa8] sm:$0xff]  ;;  %v5880_v0 = vpack.c.bf16 %v26_v61, %v25_v60  ;;  %v27_v2 = vld [vmem:[%s8751_s0 + $0x30] sm:$0xff] }
  0x10   :  { %374 = vmatpush.bf16.msra.mxu0 %v5072_v22  ;;  %5328 = vmatpush.bf16.msra.mxu2 %v5072_v22  ;;  %v5882_v1 = vpack.c.bf16 %v42_v63, %v41_v62  ;;  %v28_v3 = vld [vmem:[%s8751_s0 + $0x38] sm:$0xff]  ;;  %v43_v4 = vld [vmem:[%s8751_s0 + $0xb0] sm:$0xff]  ;;  %v29_v8 = vld [vmem:[%s8751_s0 + $0x40] sm:$0xff] }
  0x11   :  { %5336 = vmatpush.bf16.msra.mxu3 %v5076_v23  ;;  %463 = vmatpush.bf16.msra.mxu1 %v5076_v23  ;;  %v44_v5 = vld [vmem:[%s8751_s0 + $0xb8] sm:$0xff]  ;;  %v5900_v6 = vpack.c.bf16 %v28_v3, %v27_v2  ;;  %v30_v9 = vld [vmem:[%s8751_s0 + $0x48] sm:$0xff]  ;;  %v45_v10 = vld [vmem:[%s8751_s0 + $0xc0] sm:$0xff] }
  0x12   :  { %v5902_v7 = vpack.c.bf16 %v44_v5, %v43_v4  ;;  %v46_v11 = vld [vmem:[%s8751_s0 + $0xc8] sm:$0xff]  ;;  %v5920_v12 = vpack.c.bf16 %v30_v9, %v29_v8  ;;  %v5151_v14 = vld [vmem:[%s8750_s1 + $0x158] sm:$0xf]  ;;  %v5307_v15 = vld [vmem:[%s8750_s1 + $0x16c] sm:$0xf0] }
  0x13   :  { %v5922_v13 = vpack.c.bf16 %v46_v11, %v45_v10  ;;  %v5304_v16 = vld [vmem:[%s8750_s1 + $0x15c] sm:$0xf]  ;;  %v5152_v17 = vor.u32 %v5307_v15, %v5151_v14  ;;  %v5153_v18 = vld [vmem:[%s8750_s1 + $0x170] sm:$0xf0]  ;;  %v5159_v19 = vld [vmem:[%s8750_s1 + $0x160] sm:$0xf] }
  0x14   :  { %375 = vmatpush.bf16.msra.mxu0 %v5048_v28  ;;  %5329 = vmatpush.bf16.msra.mxu2 %v5048_v28  ;;  %v5308_v20 = vld [vmem:[%s8750_s1 + $0x174] sm:$0xf0]  ;;  %v5156_v21 = vor.u32 %v5304_v16, %v5153_v18  ;;  %v5127_v23 = vld [vmem:[%s8750_s1 + $0x128] sm:$0xf]  ;;  %v5301_v24 = vld [vmem:[%s8750_s1 + $0x13c] sm:$0xf0] }
  0x15   :  { %5337 = vmatpush.bf16.msra.mxu3 %v5052_v29  ;;  %464 = vmatpush.bf16.msra.mxu1 %v5052_v29  ;;  %v5160_v22 = vor.u32 %v5308_v20, %v5159_v19  ;;  %v5298_v25 = vld [vmem:[%s8750_s1 + $0x12c] sm:$0xf]  ;;  %v5128_v26 = vor.u32 %v5301_v24, %v5127_v23  ;;  %v5129_v27 = vld [vmem:[%s8750_s1 + $0x140] sm:$0xf0]  ;;  %v5135_v28 = vld [vmem:[%s8750_s1 + $0x130] sm:$0xf] }
  0x16   :  { %v5302_v29 = vld [vmem:[%s8750_s1 + $0x144] sm:$0xf0]  ;;  %v5132_v30 = vor.u32 %v5298_v25, %v5129_v27  ;;  %v5103_v32 = vld [vmem:[%s8750_s1 + $0xf8] sm:$0xf]  ;;  %v5295_v33 = vld [vmem:[%s8750_s1 + $0x10c] sm:$0xf0] }
  0x17   :  { %v5136_v31 = vor.u32 %v5302_v29, %v5135_v28  ;;  %v5111_v36 = vld [vmem:[%s8750_s1 + $0x100] sm:$0xf]  ;;  %v5296_v37 = vld [vmem:[%s8750_s1 + $0x114] sm:$0xf0]  ;;  %v5305_v38 = vld [vmem:[%s8750_s1 + $0x164] sm:$0xf] }
  0x18   :  { %376 = vmatpush.bf16.msra.mxu0 %v5024_v34  ;;  %5330 = vmatpush.bf16.msra.mxu2 %v5024_v34  ;;  %v5292_v34 = vld [vmem:[%s8750_s1 + $0xfc] sm:$0xf]  ;;  %v31_v42 = vld [vmem:[%s8751_s0 + $0x50] sm:$0xff]  ;;  %v5112_v44 = vor.u32 %v5296_v37, %v5111_v36  ;;  %v5079_v45 = vld [vmem:[%s8750_s1 + $0xc8] sm:$0xf] }
  0x19   :  { %5338 = vmatpush.bf16.msra.mxu3 %v5028_v35  ;;  %465 = vmatpush.bf16.msra.mxu1 %v5028_v35  ;;  %v5105_v35 = vld [vmem:[%s8750_s1 + $0x110] sm:$0xf0]  ;;  %v5161_v39 = vld [vmem:[%s8750_s1 + $0x178] sm:$0xf0]  ;;  %v5289_v46 = vld [vmem:[%s8750_s1 + $0xdc] sm:$0xf0] }
  0x1a   :  { %v5108_v43 = vor.u32 %v5292_v34, %v5105_v35  ;;  %v5081_v48 = vld [vmem:[%s8750_s1 + $0xe0] sm:$0xf0]  ;;  %v5087_v49 = vld [vmem:[%s8750_s1 + $0xd0] sm:$0xf]  ;;  %v5290_v50 = vld [vmem:[%s8750_s1 + $0xe4] sm:$0xf0]  ;;  %v5080_v56 = vor.u32 %v5289_v46, %v5079_v45 }
  0x1b   :  { %v47_v54 = vld [vmem:[%s8751_s0 + $0xd0] sm:$0xff]  ;;  %v48_v55 = vld [vmem:[%s8751_s0 + $0xd8] sm:$0xff]  ;;  %v5088_v60 = vor.u32 %v5290_v50, %v5087_v49  ;;  %v5137_v2 = vld [vmem:[%s8750_s1 + $0x148] sm:$0xf0] }
  0x1c   :  { %377 = vmatpush.bf16.msra.mxu0 %v5000_v40  ;;  %5331 = vmatpush.bf16.msra.mxu2 %v5000_v40  ;;  %v5104_v40 = vor.u32 %v5295_v33, %v5103_v32  ;;  %v6020_v62 = vpack.c.bf16 %v48_v55, %v47_v54  ;;  %v5299_v63 = vld [vmem:[%s8750_s1 + $0x134] sm:$0xf]  ;;  %v5055_v3 = vld [vmem:[%s8750_s1 + $0x98] sm:$0xf]  ;;  %v5283_v4 = vld [vmem:[%s8750_s1 + $0xac] sm:$0xf0] }
  0x1d   :  { %5339 = vmatpush.bf16.msra.mxu3 %v5004_v41  ;;  %466 = vmatpush.bf16.msra.mxu1 %v5004_v41  ;;  %v5164_v41 = vor.u32 %v5305_v38, %v5161_v39  ;;  %v5140_v5 = vor.u32 %v5299_v63, %v5137_v2  ;;  %v5056_v8 = vor.u32 %v5283_v4, %v5055_v3  ;;  %v5280_v9 = vld [vmem:[%s8750_s1 + $0x9c] sm:$0xf]  ;;  %v5057_v10 = vld [vmem:[%s8750_s1 + $0xb0] sm:$0xf0]  ;;  %v5063_v11 = vld [vmem:[%s8750_s1 + $0xa0] sm:$0xf] }
  0x1e   :  { %v5060_v14 = vor.u32 %v5280_v9, %v5057_v10  ;;  %v5284_v15 = vld [vmem:[%s8750_s1 + $0xb4] sm:$0xf0]  ;;  %v5293_v16 = vld [vmem:[%s8750_s1 + $0x104] sm:$0xf]  ;;  %v5031_v20 = vld [vmem:[%s8750_s1 + $0x68] sm:$0xf] }
  0x1f   :  { %v5064_v18 = vor.u32 %v5284_v15, %v5063_v11  ;;  %v5033_v24 = vld [vmem:[%s8750_s1 + $0x80] sm:$0xf0]  ;;  %v5039_v25 = vld [vmem:[%s8750_s1 + $0x70] sm:$0xf]  ;;  %v5287_v29 = vld [vmem:[%s8750_s1 + $0xd4] sm:$0xf] }
  0x20   :  { %378 = vmatpush.bf16.msra.mxu0 %v4976_v47  ;;  %5332 = vmatpush.bf16.msra.mxu2 %v4976_v47  ;;  %v5286_v47 = vld [vmem:[%s8750_s1 + $0xcc] sm:$0xf]  ;;  %v5271_v32 = vld [vmem:[%s8750_s1 + $0x4c] sm:$0xf0]  ;;  %v5268_v33 = vld [vmem:[%s8750_s1 + $0x3c] sm:$0xf] }
  0x21   :  { %5340 = vmatpush.bf16.msra.mxu3 %v4980_v51  ;;  %467 = vmatpush.bf16.msra.mxu1 %v4980_v51  ;;  %v32_v51 = vld [vmem:[%s8751_s0 + $0x58] sm:$0xff]  ;;  %v5084_v57 = vor.u32 %v5286_v47, %v5081_v48  ;;  %v5009_v34 = vld [vmem:[%s8750_s1 + $0x50] sm:$0xf0]  ;;  %v5015_v37 = vld [vmem:[%s8750_s1 + $0x40] sm:$0xf] }
  0x22   :  { %v6018_v61 = vpack.c.bf16 %v32_v51, %v31_v42  ;;  %v5272_v38 = vld [vmem:[%s8750_s1 + $0x54] sm:$0xf0]  ;;  %v5012_v39 = vor.u32 %v5268_v33, %v5009_v34  ;;  %v33_v42 = vld [vmem:[%s8751_s0 + $0x60] sm:$0xff]  ;;  %v50_v46 = vld [vmem:[%s8751_s0 + $0xe8] sm:$0xff] }
  0x23   :  { %379 = vmatmul.bf16.vlgmr.msra.gmra.mxu0 %v5840_v52  ;;  %419 = vmatmul.bf16.vlgmr.msra.gmra.mxu2 %v5842_v53  ;;  %v49_v45 = vld [vmem:[%s8751_s0 + $0xe0] sm:$0xff]  ;;  %v4983_v48 = vld [vmem:[%s8750_s1 + $0x8] sm:$0xf]  ;;  %v5262_v50 = vld [vmem:[%s8750_s1 + $0xc] sm:$0xf] }
  0x24   :  { %508 = vmatmul.bf16.vlgmr.msra.gmra.mxu3 %v5842_v53  ;;  %468 = vmatmul.bf16.vlgmr.msra.gmra.mxu1 %v5840_v52  ;;  %v5265_v49 = vld [vmem:[%s8750_s1 + $0x1c] sm:$0xf0]  ;;  %v6127_v54 = vpack.c.bf16 %v50_v46, %v49_v45  ;;  %v5275_v3 = vld [vmem:[%s8750_s1 + $0x74] sm:$0xf]  ;;  %v5041_v4 = vld [vmem:[%s8750_s1 + $0x88] sm:$0xf0] }
  0x25   :  { %549 = vmatpush.bf16.msrb.mxu2 %v5152_v17  ;;  %638 = vmatpush.bf16.msrb.mxu3 %v5156_v21  ;;  %v5113_v17 = vld [vmem:[%s8750_s1 + $0x118] sm:$0xf0]  ;;  %v5277_v21 = vld [vmem:[%s8750_s1 + $0x7c] sm:$0xf0]  ;;  %v4984_v55 = vor.u32 %v5265_v49, %v4983_v48  ;;  %v5263_v11 = vld [vmem:[%s8750_s1 + $0x14] sm:$0xf] }
  0x26   :  { %727 = vmatpush.bf16.msrb.mxu0 %v5160_v22  ;;  %816 = vmatpush.bf16.msrb.mxu1 %v5164_v41  ;;  %v5116_v19 = vor.u32 %v5293_v16, %v5113_v17  ;;  %v5274_v22 = vld [vmem:[%s8750_s1 + $0x6c] sm:$0xf]  ;;  %v5032_v23 = vor.u32 %v5277_v21, %v5031_v20  ;;  %v5065_v41 = vld [vmem:[%s8750_s1 + $0xb8] sm:$0xf0]  ;;  %v35_v16 = vld [vmem:[%s8751_s0 + $0x70] sm:$0xff] }
  0x27   :  { %v5036_v27 = vor.u32 %v5274_v22, %v5033_v24  ;;  %v5017_v9 = vld [vmem:[%s8750_s1 + $0x58] sm:$0xf0]  ;;  %v6183_v22 = vld [vmem:[%s8752_s2] sm:$0x3f] }
  0x28   :  { %v36_v17 = vld [vmem:[%s8751_s0 + $0x78] sm:$0xff]  ;;  %v6186_v24 = vperm.slane %v6183_v22, 0 }
  0x29   :  { %550 = vmatpush.bf16.msrb.mxu2 %v5128_v26  ;;  %639 = vmatpush.bf16.msrb.mxu3 %v5132_v30  ;;  %v5278_v26 = vld [vmem:[%s8750_s1 + $0x84] sm:$0xf0]  ;;  %v5089_v30 = vld [vmem:[%s8750_s1 + $0xe8] sm:$0xf0]  ;;  %v6172_v20 = vpack.c.bf16 %v36_v17, %v35_v16 }
  0x2a   :  { %728 = vmatpush.bf16.msrb.mxu0 %v5136_v31  ;;  %817 = vmatpush.bf16.msrb.mxu1 %v5140_v5  ;;  %v5040_v28 = vor.u32 %v5278_v26, %v5039_v25  ;;  %v5007_v31 = vld [vmem:[%s8750_s1 + $0x38] sm:$0xf]  ;;  %v5092_v35 = vor.u32 %v5287_v29, %v5089_v30  ;;  %v5044_v5 = vor.u32 %v5275_v3, %v5041_v4  ;;  %v6189_v26 = vperm.slane %v6183_v22, 1 }
  0x2b   :  { %v5008_v36 = vor.u32 %v5271_v32, %v5007_v31 }
  0x2d   :  { %551 = vmatpush.bf16.msrb.mxu2 %v5104_v40  ;;  %640 = vmatpush.bf16.msrb.mxu3 %v5108_v43  ;;  %v5281_v40 = vld [vmem:[%s8750_s1 + $0xa4] sm:$0xf]  ;;  %v5016_v43 = vor.u32 %v5272_v38, %v5015_v37 }
  0x2e   :  { %729 = vmatpush.bf16.msrb.mxu0 %v5112_v44  ;;  %818 = vmatpush.bf16.msrb.mxu1 %v5116_v19  ;;  %v34_v44 = vld [vmem:[%s8751_s0 + $0x68] sm:$0xff]  ;;  %v5068_v47 = vor.u32 %v5281_v40, %v5065_v41  ;;  %v52_v19 = vld [vmem:[%s8751_s0 + $0xf8] sm:$0xff] }
  0x2f   :  { %v6125_v51 = vpack.c.bf16 %v34_v44, %v33_v42 }
  0x31   :  { %552 = vmatpush.bf16.msrb.mxu2 %v5080_v56  ;;  %641 = vmatpush.bf16.msrb.mxu3 %v5084_v57  ;;  %v4985_v56 = vld [vmem:[%s8750_s1 + $0x20] sm:$0xf0]  ;;  %v4991_v57 = vld [vmem:[%s8750_s1 + $0x10] sm:$0xf] }
  0x32   :  { %730 = vmatpush.bf16.msrb.mxu0 %v5088_v60  ;;  %819 = vmatpush.bf16.msrb.mxu1 %v5092_v35  ;;  %v5266_v60 = vld [vmem:[%s8750_s1 + $0x24] sm:$0xf0]  ;;  %v4988_v63 = vor.u32 %v5262_v50, %v4985_v56 }
  0x33   :  { %384 = vmatmul.bf16.gmra.mxu0 %v5860_v58  ;;  %424 = vmatmul.bf16.gmra.mxu2 %v5862_v59  ;;  %v4992_v2 = vor.u32 %v5266_v60, %v4991_v57 }
  0x34   :  { %513 = vmatmul.bf16.gmra.mxu3 %v5862_v59  ;;  %473 = vmatmul.bf16.gmra.mxu1 %v5860_v58 }
  0x35   :  { %553 = vmatpush.bf16.msrb.mxu2 %v5056_v8  ;;  %642 = vmatpush.bf16.msrb.mxu3 %v5060_v14  ;;  %v5269_v8 = vld [vmem:[%s8750_s1 + $0x44] sm:$0xf]  ;;  %v4993_v14 = vld [vmem:[%s8750_s1 + $0x28] sm:$0xf0] }
  0x36   :  { %731 = vmatpush.bf16.msrb.mxu0 %v5064_v18  ;;  %820 = vmatpush.bf16.msrb.mxu1 %v5068_v47  ;;  %v5020_v10 = vor.u32 %v5269_v8, %v5017_v9  ;;  %v4996_v15 = vor.u32 %v5263_v11, %v4993_v14  ;;  %v51_v18 = vld [vmem:[%s8751_s0 + $0xf0] sm:$0xff] }
  0x37   :  { %v6174_v21 = vpack.c.bf16 %v52_v19, %v51_v18 }
  0x39   :  { %554 = vmatpush.bf16.msrb.mxu2 %v5032_v23  ;;  %643 = vmatpush.bf16.msrb.mxu3 %v5036_v27 }
  0x3a   :  { %732 = vmatpush.bf16.msrb.mxu0 %v5040_v28  ;;  %821 = vmatpush.bf16.msrb.mxu1 %v5044_v5 }
  0x3d   :  { %555 = vmatpush.bf16.msrb.mxu2 %v5008_v36  ;;  %644 = vmatpush.bf16.msrb.mxu3 %v5012_v39 }
  0x3e   :  { %733 = vmatpush.bf16.msrb.mxu0 %v5016_v43  ;;  %822 = vmatpush.bf16.msrb.mxu1 %v5020_v10 }
  0x41   :  { %556 = vmatpush.bf16.msrb.mxu2 %v4984_v55  ;;  %645 = vmatpush.bf16.msrb.mxu3 %v4988_v63 }
  0x42   :  { %734 = vmatpush.bf16.msrb.mxu0 %v4992_v2  ;;  %823 = vmatpush.bf16.msrb.mxu1 %v4996_v15 }
  0x43   :  { %389 = vmatmul.bf16.gmra.mxu0 %v5880_v0  ;;  %429 = vmatmul.bf16.gmra.mxu2 %v5882_v1 }
  0x44   :  { %518 = vmatmul.bf16.gmra.mxu3 %v5882_v1  ;;  %478 = vmatmul.bf16.gmra.mxu1 %v5880_v0 }
  0x53   :  { %394 = vmatmul.bf16.gmra.mxu0 %v5900_v6  ;;  %434 = vmatmul.bf16.gmra.mxu2 %v5902_v7 }
  0x54   :  { %523 = vmatmul.bf16.gmra.mxu3 %v5902_v7  ;;  %483 = vmatmul.bf16.gmra.mxu1 %v5900_v6 }
  0x63   :  { %399 = vmatmul.bf16.gmra.mxu0 %v5920_v12  ;;  %439 = vmatmul.bf16.gmra.mxu2 %v5922_v13 }
  0x64   :  { %528 = vmatmul.bf16.gmra.mxu3 %v5922_v13  ;;  %488 = vmatmul.bf16.gmra.mxu1 %v5920_v12 }
  0x73   :  { %404 = vmatmul.bf16.gmra.mxu0 %v6018_v61  ;;  %444 = vmatmul.bf16.gmra.mxu2 %v6020_v62 }
  0x74   :  { %533 = vmatmul.bf16.gmra.mxu3 %v6020_v62  ;;  %493 = vmatmul.bf16.gmra.mxu1 %v6018_v61 }
  0x83   :  { %409 = vmatmul.bf16.gmra.mxu0 %v6125_v51  ;;  %449 = vmatmul.bf16.gmra.mxu2 %v6127_v54 }
  0x84   :  { %538 = vmatmul.bf16.gmra.mxu3 %v6127_v54  ;;  %498 = vmatmul.bf16.gmra.mxu1 %v6125_v51 }
  0x93   :  { %414 = vmatmul.bf16.gmra.mxu0 %v6172_v20  ;;  %454 = vmatmul.bf16.gmra.mxu2 %v6174_v21 }
  0x94   :  { %543 = vmatmul.bf16.gmra.mxu3 %v6174_v21  ;;  %503 = vmatmul.bf16.gmra.mxu1 %v6172_v20 }
  0xa0   :  { %v380_v23 = vpop.f32.mrf.mxu0 }
  0xa1   :  { %v469_v25 = vpop.f32.mrf.mxu1  ;;  %v381_v27 = vadd.f32 %v380_v23, %v6186_v24 }
  0xa2   :  { %v470_v28 = vadd.f32 %v469_v25, %v6189_v26 }
  0xa3   :  { %557 = vmatmul.bf16.vlgmr.msrb.gmra.mxu2 %v5840_v52  ;;  %735 = vmatmul.bf16.vlgmr.msrb.gmra.mxu0 %v5840_v52  ;;  %v905_v30 = vpack.c.bf16 %v381_v27, %v381_v27 }
  0xa4   :  { %646 = vmatmul.bf16.vlgmr.msrb.gmra.mxu3 %v5840_v52  ;;  %824 = vmatmul.bf16.vlgmr.msrb.gmra.mxu1 %v5840_v52  ;;  %v2282_v33 = vpack.c.bf16 %v470_v28, %v470_v28 }
  0xa5   :  { %v6199_v37 = vunpack.c.l.b16 %v905_v30 }
  0xa6   :  { %v420_v29 = vpop.f32.mrf.mxu2  ;;  %v6203_v41 = vunpack.c.l.b16 %v2282_v33 }
  0xa7   :  { %v509_v31 = vpop.f32.mrf.mxu3  ;;  %v421_v38 = vadd.f32 %v420_v29, %v6186_v24 }
  0xa8   :  { %v382_v32 = vpop.f32.mrf.mxu0  ;;  %v510_v40 = vadd.f32 %v509_v31, %v6189_v26 }
  0xa9   :  { %v383_v34 = vadd.f32 %v382_v32, %v6186_v24  ;;  %v471_v35 = vpop.f32.mrf.mxu1  ;;  %v921_v45 = vpack.c.bf16 %v421_v38, %v421_v38 }
  0xaa   :  { %v472_v36 = vadd.f32 %v471_v35, %v6189_v26  ;;  %v2298_v49 = vpack.c.bf16 %v510_v40, %v510_v40 }
  0xab   :  { %v906_v39 = vpack.c.bf16 %v383_v34, %v383_v34  ;;  %v6215_v2 = vunpack.c.l.b16 %v921_v45 }
  0xac   :  { %v2283_v52 = vpack.c.bf16 %v472_v36, %v472_v36  ;;  %v6222_v5 = vunpack.c.l.b16 %v2298_v49 }
  0xad   :  { %v6205_v42 = vunpack.c.l.b16 %v906_v39 }
  0xae   :  { %v422_v43 = vpop.f32.mrf.mxu2  ;;  %v6207_v44 = vunpack.c.l.b16 %v2283_v52 }
  0xaf   :  { %v423_v47 = vadd.f32 %v422_v43, %v6186_v24  ;;  %v511_v48 = vpop.f32.mrf.mxu3 }
  0xb0   :  { %v512_v50 = vadd.f32 %v511_v48, %v6189_v26  ;;  %v385_v55 = vpop.f32.mrf.mxu0 }
  0xb1   :  { %v922_v57 = vpack.c.bf16 %v423_v47, %v423_v47  ;;  %v474_v60 = vpop.f32.mrf.mxu1  ;;  %v386_v4 = vadd.f32 %v385_v55, %v6186_v24 }
  0xb2   :  { %v2299_v63 = vpack.c.bf16 %v512_v50, %v512_v50  ;;  %v475_v9 = vadd.f32 %v474_v60, %v6189_v26 }
  0xb3   :  { %v6217_v3 = vunpack.c.l.b16 %v922_v57  ;;  %562 = vmatmul.bf16.gmra.mxu2 %v5860_v58  ;;  %740 = vmatmul.bf16.gmra.mxu0 %v5860_v58  ;;  %v907_v15 = vpack.c.bf16 %v386_v4, %v386_v4 }
  0xb4   :  { %v6224_v8 = vunpack.c.l.b16 %v2299_v63  ;;  %651 = vmatmul.bf16.gmra.mxu3 %v5860_v58  ;;  %829 = vmatmul.bf16.gmra.mxu1 %v5860_v58  ;;  %v2284_v18 = vpack.c.bf16 %v475_v9, %v475_v9 }
  0xb5   :  { %v6235_v27 = vunpack.c.l.b16 %v907_v15 }
  0xb6   :  { %v425_v14 = vpop.f32.mrf.mxu2  ;;  %v6239_v30 = vunpack.c.l.b16 %v2284_v18 }
  0xb7   :  { %v514_v16 = vpop.f32.mrf.mxu3  ;;  %v426_v58 = vadd.f32 %v425_v14, %v6186_v24 }
  0xb8   :  { %v387_v17 = vpop.f32.mrf.mxu0  ;;  %v515_v29 = vadd.f32 %v514_v16, %v6189_v26 }
  0xb9   :  { %v388_v19 = vadd.f32 %v387_v17, %v6186_v24  ;;  %v476_v23 = vpop.f32.mrf.mxu1  ;;  %v923_v35 = vpack.c.bf16 %v426_v58, %v426_v58 }
  0xba   :  { %v477_v25 = vadd.f32 %v476_v23, %v6189_v26  ;;  %v2300_v40 = vpack.c.bf16 %v515_v29, %v515_v29 }
  0xbb   :  { %v908_v28 = vpack.c.bf16 %v388_v19, %v388_v19  ;;  %v6251_v50 = vunpack.c.l.b16 %v923_v35 }
  0xbc   :  { %v2285_v31 = vpack.c.bf16 %v477_v25, %v477_v25  ;;  %v6258_v60 = vunpack.c.l.b16 %v2300_v40 }
  0xbd   :  { %v6241_v32 = vunpack.c.l.b16 %v908_v28 }
  0xbe   :  { %v427_v33 = vpop.f32.mrf.mxu2  ;;  %v6243_v34 = vunpack.c.l.b16 %v2285_v31 }
  0xbf   :  { %v428_v38 = vadd.f32 %v427_v33, %v6186_v24  ;;  %v516_v39 = vpop.f32.mrf.mxu3 }
  0xc0   :  { %v517_v52 = vadd.f32 %v516_v39, %v6189_v26  ;;  %v390_v43 = vpop.f32.mrf.mxu0 }
  0xc1   :  { %v924_v47 = vpack.c.bf16 %v428_v38, %v428_v38  ;;  %v479_v48 = vpop.f32.mrf.mxu1  ;;  %v391_v57 = vadd.f32 %v390_v43, %v6186_v24 }
  0xc2   :  { %v2301_v49 = vpack.c.bf16 %v517_v52, %v517_v52  ;;  %v480_v4 = vadd.f32 %v479_v48, %v6189_v26 }
  0xc3   :  { %v6253_v55 = vunpack.c.l.b16 %v924_v47  ;;  %567 = vmatmul.bf16.gmra.mxu2 %v5880_v0  ;;  %745 = vmatmul.bf16.gmra.mxu0 %v5880_v0  ;;  %v909_v16 = vpack.c.bf16 %v391_v57, %v391_v57 }
  0xc4   :  { %v6260_v63 = vunpack.c.l.b16 %v2301_v49  ;;  %656 = vmatmul.bf16.gmra.mxu3 %v5880_v0  ;;  %834 = vmatmul.bf16.gmra.mxu1 %v5880_v0  ;;  %v2286_v19 = vpack.c.bf16 %v480_v4, %v480_v4 }
  0xc5   :  { %v6271_v28 = vunpack.c.l.b16 %v909_v16 }
  0xc6   :  { %v430_v15 = vpop.f32.mrf.mxu2  ;;  %v6275_v33 = vunpack.c.l.b16 %v2286_v19 }
  0xc7   :  { %v519_v17 = vpop.f32.mrf.mxu3  ;;  %v431_v0 = vadd.f32 %v430_v15, %v6186_v24 }
  0xc8   :  { %v392_v18 = vpop.f32.mrf.mxu0  ;;  %v520_v31 = vadd.f32 %v519_v17, %v6189_v26  ;;  %8834 = vst [vmem:[#allocation2_spill] sm:$0xff] %v6275_v33 }
  0xc9   :  { %v393_v23 = vadd.f32 %v392_v18, %v6186_v24  ;;  %v481_v25 = vpop.f32.mrf.mxu1  ;;  %v925_v52 = vpack.c.bf16 %v431_v0, %v431_v0 }
  0xca   :  { %v482_v58 = vadd.f32 %v481_v25, %v6189_v26  ;;  %v2302_v49 = vpack.c.bf16 %v520_v31, %v520_v31 }
  0xcb   :  { %v910_v29 = vpack.c.bf16 %v393_v23, %v393_v23  ;;  %v6287_v19 = vunpack.c.l.b16 %v925_v52 }
  0xcc   :  { %v2287_v35 = vpack.c.bf16 %v482_v58, %v482_v58  ;;  %v6294_v58 = vunpack.c.l.b16 %v2302_v49 }
  0xcd   :  { %v6277_v38 = vunpack.c.l.b16 %v910_v29  ;;  %8836 = vst [vmem:[#allocation4_spill] sm:$0xff] %v6287_v19 }
  0xce   :  { %v432_v39 = vpop.f32.mrf.mxu2  ;;  %v6279_v40 = vunpack.c.l.b16 %v2287_v35  ;;  %8837 = vst [vmem:[#allocation5_spill] sm:$0xff] %v6294_v58 }
  0xcf   :  { %v433_v47 = vadd.f32 %v432_v39, %v6186_v24  ;;  %v521_v48 = vpop.f32.mrf.mxu3 }
  0xd0   :  { %8835 = vst [vmem:[#allocation3_spill] sm:$0xff] %v6279_v40  ;;  %v522_v57 = vadd.f32 %v521_v48, %v6189_v26  ;;  %v395_v4 = vpop.f32.mrf.mxu0 }
  0xd1   :  { %v926_v16 = vpack.c.bf16 %v433_v47, %v433_v47  ;;  %v484_v17 = vpop.f32.mrf.mxu1  ;;  %v396_v25 = vadd.f32 %v395_v4, %v6186_v24 }
  0xd2   :  { %v2303_v18 = vpack.c.bf16 %v522_v57, %v522_v57  ;;  %v485_v29 = vadd.f32 %v484_v17, %v6189_v26 }
  0xd3   :  { %v6289_v23 = vunpack.c.l.b16 %v926_v16  ;;  %572 = vmatmul.bf16.gmra.mxu2 %v5900_v6  ;;  %750 = vmatmul.bf16.gmra.mxu0 %v5900_v6  ;;  %v911_v52 = vpack.c.bf16 %v396_v25, %v396_v25 }
  0xd4   :  { %v6296_v0 = vunpack.c.l.b16 %v2303_v18  ;;  %661 = vmatmul.bf16.gmra.mxu3 %v5900_v6  ;;  %839 = vmatmul.bf16.gmra.mxu1 %v5900_v6  ;;  %v2288_v49 = vpack.c.bf16 %v485_v29, %v485_v29 }
  0xd5   :  { %v6307_v18 = vunpack.c.l.b16 %v911_v52 }
  0xd6   :  { %8838 = vst [vmem:[#allocation6_spill] sm:$0xff] %v6296_v0  ;;  %v435_v39 = vpop.f32.mrf.mxu2  ;;  %v6311_v31 = vunpack.c.l.b16 %v2288_v49 }
  0xd7   :  { %v524_v47 = vpop.f32.mrf.mxu3  ;;  %v436_v6 = vadd.f32 %v435_v39, %v6186_v24 }
  0xd8   :  { %v397_v48 = vpop.f32.mrf.mxu0  ;;  %v525_v15 = vadd.f32 %v524_v47, %v6189_v26  ;;  %8839 = vst [vmem:[#allocation7_spill] sm:$0xff] %v6311_v31 }
  0xd9   :  { %v398_v57 = vadd.f32 %v397_v48, %v6186_v24  ;;  %v486_v4 = vpop.f32.mrf.mxu1  ;;  %v927_v29 = vpack.c.bf16 %v436_v6, %v436_v6 }
  0xda   :  { %v487_v16 = vadd.f32 %v486_v4, %v6189_v26  ;;  %v2304_v14 = vpack.c.bf16 %v525_v15, %v525_v15 }
  0xdb   :  { %v912_v17 = vpack.c.bf16 %v398_v57, %v398_v57  ;;  %v6323_v11 = vunpack.c.l.b16 %v927_v29 }
  0xdc   :  { %v2289_v35 = vpack.c.bf16 %v487_v16, %v487_v16  ;;  %v6330_v15 = vunpack.c.l.b16 %v2304_v14 }
  0xdd   :  { %v6313_v9 = vunpack.c.l.b16 %v912_v17  ;;  %8841 = vst [vmem:[#allocation9_spill] sm:$0xff] %v6323_v11 }
  0xde   :  { %v437_v25 = vpop.f32.mrf.mxu2  ;;  %v6315_v10 = vunpack.c.l.b16 %v2289_v35  ;;  %8843 = vst [vmem:[#allocation11_spill] sm:$0xff] %v6330_v15 }
  0xdf   :  { %v438_v52 = vadd.f32 %v437_v25, %v6186_v24  ;;  %v526_v4 = vpop.f32.mrf.mxu3 }
  0xe0   :  { %8840 = vst [vmem:[#allocation8_spill] sm:$0xff] %v6315_v10  ;;  %v527_v39 = vadd.f32 %v526_v4, %v6189_v26  ;;  %v400_v57 = vpop.f32.mrf.mxu0 }
  0xe1   :  { %v928_v49 = vpack.c.bf16 %v438_v52, %v438_v52  ;;  %v489_v16 = vpop.f32.mrf.mxu1  ;;  %v401_v6 = vadd.f32 %v400_v57, %v6186_v24 }
  0xe2   :  { %v2305_v17 = vpack.c.bf16 %v527_v39, %v527_v39  ;;  %v490_v52 = vadd.f32 %v489_v16, %v6189_v26 }
  0xe3   :  { %v6325_v35 = vunpack.c.l.b16 %v928_v49  ;;  %577 = vmatmul.bf16.gmra.mxu2 %v5920_v12  ;;  %755 = vmatmul.bf16.gmra.mxu0 %v5920_v12  ;;  %v913_v57 = vpack.c.bf16 %v401_v6, %v401_v6 }
  0xe4   :  { %v6332_v25 = vunpack.c.l.b16 %v2305_v17  ;;  %666 = vmatmul.bf16.gmra.mxu3 %v5920_v12  ;;  %844 = vmatmul.bf16.gmra.mxu1 %v5920_v12  ;;  %v2290_v14 = vpack.c.bf16 %v490_v52, %v490_v52 }
  0xe5   :  { %8842 = vst [vmem:[#allocation10_spill] sm:$0xff] %v6325_v35  ;;  %v6343_v45 = vunpack.c.l.b16 %v913_v57 }
  0xe6   :  { %8844 = vst [vmem:[#allocation12_spill] sm:$0xff] %v6332_v25  ;;  %v440_v39 = vpop.f32.mrf.mxu2  ;;  %v6347_v36 = vunpack.c.l.b16 %v2290_v14 }
  0xe7   :  { %v529_v49 = vpop.f32.mrf.mxu3  ;;  %v441_v12 = vadd.f32 %v440_v39, %v6186_v24 }
  0xe8   :  { %v402_v47 = vpop.f32.mrf.mxu0  ;;  %v530_v29 = vadd.f32 %v529_v49, %v6189_v26 }
  0xe9   :  { %v403_v17 = vadd.f32 %v402_v47, %v6186_v24  ;;  %v491_v48 = vpop.f32.mrf.mxu1  ;;  %v929_v52 = vpack.c.bf16 %v441_v12, %v441_v12 }
  0xea   :  { %v492_v43 = vadd.f32 %v491_v48, %v6189_v26  ;;  %v2306_v15 = vpack.c.bf16 %v530_v29, %v530_v29 }
  0xeb   :  { %v914_v16 = vpack.c.bf16 %v403_v17, %v403_v17  ;;  %v6359_v25 = vunpack.c.l.b16 %v929_v52 }
  0xec   :  { %v2291_v4 = vpack.c.bf16 %v492_v43, %v492_v43  ;;  %v6366_v29 = vunpack.c.l.b16 %v2306_v15 }
  0xed   :  { %v6349_v56 = vunpack.c.l.b16 %v914_v16  ;;  %8845 = vst [vmem:[#allocation13_spill] sm:$0xff] %v6359_v25 }
  0xee   :  { %v442_v6 = vpop.f32.mrf.mxu2  ;;  %v6351_v46 = vunpack.c.l.b16 %v2291_v4  ;;  %8847 = vst [vmem:[#allocation15_spill] sm:$0xff] %v6366_v29 }
  0xef   :  { %v443_v48 = vadd.f32 %v442_v6, %v6186_v24  ;;  %v531_v57 = vpop.f32.mrf.mxu3 }
  0xf0   :  { %v532_v39 = vadd.f32 %v531_v57, %v6189_v26  ;;  %v405_v17 = vpop.f32.mrf.mxu0 }
  0xf1   :  { %v930_v43 = vpack.c.bf16 %v443_v48, %v443_v48  ;;  %v494_v14 = vpop.f32.mrf.mxu1  ;;  %v406_v12 = vadd.f32 %v405_v17, %v6186_v24 }
  0xf2   :  { %v2307_v16 = vpack.c.bf16 %v532_v39, %v532_v39  ;;  %v495_v48 = vadd.f32 %v494_v14, %v6189_v26 }
  0xf3   :  { %v6361_v4 = vunpack.c.l.b16 %v930_v43  ;;  %582 = vmatmul.bf16.gmra.mxu2 %v6018_v61  ;;  %760 = vmatmul.bf16.gmra.mxu0 %v6018_v61  ;;  %v915_v17 = vpack.c.bf16 %v406_v12, %v406_v12 }
  0xf4   :  { %v6368_v6 = vunpack.c.l.b16 %v2307_v16  ;;  %671 = vmatmul.bf16.gmra.mxu3 %v6018_v61  ;;  %849 = vmatmul.bf16.gmra.mxu1 %v6018_v61  ;;  %v2292_v15 = vpack.c.bf16 %v495_v48, %v495_v48 }
  0xf5   :  { %8846 = vst [vmem:[#allocation14_spill] sm:$0xff] %v6361_v4  ;;  %v6379_v0 = vunpack.c.l.b16 %v915_v17 }
  0xf6   :  { %8848 = vst [vmem:[#allocation16_spill] sm:$0xff] %v6368_v6  ;;  %v445_v39 = vpop.f32.mrf.mxu2  ;;  %v6383_v31 = vunpack.c.l.b16 %v2292_v15 }
  0xf7   :  { %v534_v43 = vpop.f32.mrf.mxu3  ;;  %v446_v61 = vadd.f32 %v445_v39, %v6186_v24 }
  0xf8   :  { %v407_v47 = vpop.f32.mrf.mxu0  ;;  %v535_v52 = vadd.f32 %v534_v43, %v6189_v26 }
  0xf9   :  { %v408_v16 = vadd.f32 %v407_v47, %v6186_v24  ;;  %v496_v49 = vpop.f32.mrf.mxu1  ;;  %v931_v48 = vpack.c.bf16 %v446_v61, %v446_v61 }
  0xfa   :  { %v497_v58 = vadd.f32 %v496_v49, %v6189_v26  ;;  %v2308_v40 = vpack.c.bf16 %v535_v52, %v535_v52 }
  0xfb   :  { %v916_v14 = vpack.c.bf16 %v408_v16, %v408_v16  ;;  %v6395_v25 = vunpack.c.l.b16 %v931_v48 }
  0xfc   :  { %v2293_v57 = vpack.c.bf16 %v497_v58, %v497_v58  ;;  %v6402_v52 = vunpack.c.l.b16 %v2308_v40 }
  0xfd   :  { %v6385_v10 = vunpack.c.l.b16 %v916_v14  ;;  %8849 = vst [vmem:[#allocation17_spill] sm:$0xff] %v6395_v25 }
  0xfe   :  { %v447_v12 = vpop.f32.mrf.mxu2  ;;  %v6387_v33 = vunpack.c.l.b16 %v2293_v57  ;;  %8851 = vst [vmem:[#allocation19_spill] sm:$0xff] %v6402_v52 }
  0xff   :  { %v448_v49 = vadd.f32 %v447_v12, %v6186_v24  ;;  %v536_v17 = vpop.f32.mrf.mxu3 }
 0x100   :  { %v537_v39 = vadd.f32 %v536_v17, %v6189_v26  ;;  %v410_v16 = vpop.f32.mrf.mxu0 }
 0x101   :  { %v932_v58 = vpack.c.bf16 %v448_v49, %v448_v49  ;;  %v499_v15 = vpop.f32.mrf.mxu1  ;;  %v411_v61 = vadd.f32 %v410_v16, %v6186_v24 }
 0x102   :  { %v2309_v14 = vpack.c.bf16 %v537_v39, %v537_v39  ;;  %v500_v49 = vadd.f32 %v499_v15, %v6189_v26 }
 0x103   :  { %v6397_v57 = vunpack.c.l.b16 %v932_v58  ;;  %587 = vmatmul.bf16.gmra.mxu2 %v6125_v51  ;;  %765 = vmatmul.bf16.gmra.mxu0 %v6125_v51  ;;  %v917_v16 = vpack.c.bf16 %v411_v61, %v411_v61 }
 0x104   :  { %v6404_v12 = vunpack.c.l.b16 %v2309_v14  ;;  %676 = vmatmul.bf16.gmra.mxu3 %v6125_v51  ;;  %854 = vmatmul.bf16.gmra.mxu1 %v6125_v51  ;;  %v2294_v40 = vpack.c.bf16 %v500_v49, %v500_v49 }
 0x105   :  { %8850 = vst [vmem:[#allocation18_spill] sm:$0xff] %v6397_v57  ;;  %v6415_v29 = vunpack.c.l.b16 %v917_v16 }
 0x106   :  { %8852 = vst [vmem:[#allocation20_spill] sm:$0xff] %v6404_v12  ;;  %v450_v39 = vpop.f32.mrf.mxu2  ;;  %v6419_v25 = vunpack.c.l.b16 %v2294_v40 }
 0x107   :  { %v539_v58 = vpop.f32.mrf.mxu3  ;;  %v451_v51 = vadd.f32 %v450_v39, %v6186_v24 }
 0x108   :  { %v412_v47 = vpop.f32.mrf.mxu0  ;;  %v540_v48 = vadd.f32 %v539_v58, %v6189_v26  ;;  %8853 = vst [vmem:[#allocation21_spill] sm:$0xff] %v6419_v25 }
 0x109   :  { %v413_v14 = vadd.f32 %v412_v47, %v6186_v24  ;;  %v501_v43 = vpop.f32.mrf.mxu1  ;;  %v933_v49 = vpack.c.bf16 %v451_v51, %v451_v51 }
 0x10a   :  { %v502_v4 = vadd.f32 %v501_v43, %v6189_v26  ;;  %v2310_v57 = vpack.c.bf16 %v540_v48, %v540_v48 }
 0x10b   :  { %v918_v15 = vpack.c.bf16 %v413_v14, %v413_v14  ;;  %v6431_v6 = vunpack.c.l.b16 %v933_v49 }
 0x10c   :  { %v2295_v17 = vpack.c.bf16 %v502_v4, %v502_v4  ;;  %v6438_v48 = vunpack.c.l.b16 %v2310_v57 }
 0x10d   :  { %v6421_v52 = vunpack.c.l.b16 %v918_v15  ;;  %8855 = vst [vmem:[#allocation23_spill] sm:$0xff] %v6431_v6 }
 0x10e   :  { %v452_v61 = vpop.f32.mrf.mxu2  ;;  %v6423_v12 = vunpack.c.l.b16 %v2295_v17  ;;  %8857 = vst [vmem:[#allocation25_spill] sm:$0xff] %v6438_v48 }
 0x10f   :  { %v453_v43 = vadd.f32 %v452_v61, %v6186_v24  ;;  %v541_v16 = vpop.f32.mrf.mxu3 }
 0x110   :  { %8854 = vst [vmem:[#allocation22_spill] sm:$0xff] %v6423_v12  ;;  %v542_v39 = vadd.f32 %v541_v16, %v6189_v26  ;;  %v415_v14 = vpop.f32.mrf.mxu0 }
 0x111   :  { %v934_v4 = vpack.c.bf16 %v453_v43, %v453_v43  ;;  %v504_v40 = vpop.f32.mrf.mxu1  ;;  %v416_v51 = vadd.f32 %v415_v14, %v6186_v24 }
 0x112   :  { %v2311_v15 = vpack.c.bf16 %v542_v39, %v542_v39  ;;  %v505_v43 = vadd.f32 %v504_v40, %v6189_v26 }
 0x113   :  { %v6433_v17 = vunpack.c.l.b16 %v934_v4  ;;  %592 = vmatmul.bf16.gmra.mxu2 %v6172_v20  ;;  %770 = vmatmul.bf16.gmra.mxu0 %v6172_v20  ;;  %v919_v14 = vpack.c.bf16 %v416_v51, %v416_v51 }
 0x114   :  { %v6440_v61 = vunpack.c.l.b16 %v2311_v15  ;;  %681 = vmatmul.bf16.gmra.mxu3 %v6172_v20  ;;  %859 = vmatmul.bf16.gmra.mxu1 %v6172_v20  ;;  %v2296_v57 = vpack.c.bf16 %v505_v43, %v505_v43 }
 0x115   :  { %8856 = vst [vmem:[#allocation24_spill] sm:$0xff] %v6433_v17  ;;  %v6451_v12 = vunpack.c.l.b16 %v919_v14 }
 0x116   :  { %8858 = vst [vmem:[#allocation26_spill] sm:$0xff] %v6440_v61  ;;  %v455_v39 = vpop.f32.mrf.mxu2  ;;  %v6455_v6 = vunpack.c.l.b16 %v2296_v57 }
 0x117   :  { %v544_v4 = vpop.f32.mrf.mxu3  ;;  %v456_v20 = vadd.f32 %v455_v39, %v6186_v24  ;;  %v6465_v39 = vperm.slane %v6183_v22, 4 }
 0x118   :  { %v417_v58 = vpop.f32.mrf.mxu0  ;;  %v545_v49 = vadd.f32 %v544_v4, %v6189_v26  ;;  %8859 = vst [vmem:[#allocation27_spill] sm:$0xff] %v6455_v6 }
 0x119   :  { %v418_v15 = vadd.f32 %v417_v58, %v6186_v24  ;;  %v506_v47 = vpop.f32.mrf.mxu1  ;;  %v935_v43 = vpack.c.bf16 %v456_v20, %v456_v20  ;;  %8861 = vst [vmem:[#allocation29_spill] sm:$0xff] %v6465_v39 }
 0x11a   :  { %v507_v25 = vadd.f32 %v506_v47, %v6189_v26 }
 0x11b   :  { %v920_v40 = vpack.c.bf16 %v418_v15, %v418_v15  ;;  %v2312_v15 = vpack.c.bf16 %v545_v49, %v545_v49  ;;  %v6473_v58 = vunpack.c.l.b16 %v935_v43 }
 0x11c   :  { %v2297_v16 = vpack.c.bf16 %v507_v25, %v507_v25 }
 0x11d   :  { %v6457_v48 = vunpack.c.l.b16 %v920_v40  ;;  %8863 = vst [vmem:[#allocation31_spill] sm:$0xff] %v6473_v58 }
 0x11e   :  { %v457_v51 = vpop.f32.mrf.mxu2  ;;  %v6459_v61 = vunpack.c.l.b16 %v2297_v16  ;;  %v6471_v16 = vperm.slane %v6183_v22, 5 }
 0x11f   :  { %v458_v47 = vadd.f32 %v457_v51, %v6186_v24  ;;  %v546_v14 = vpop.f32.mrf.mxu3 }
 0x120   :  { %8860 = vst [vmem:[#allocation28_spill] sm:$0xff] %v6459_v61  ;;  %v547_v4 = vadd.f32 %v546_v14, %v6189_v26  ;;  %v736_v57 = vpop.f32.mrf.mxu0  ;;  %v6480_v26 = vunpack.c.l.b16 %v2312_v15 }
 0x121   :  { %8862 = vst [vmem:[#allocation30_spill] sm:$0xff] %v6471_v16  ;;  %v936_v20 = vpack.c.bf16 %v458_v47, %v458_v47  ;;  %v825_v40 = vpop.f32.mrf.mxu1  ;;  %v737_v51 = vadd.f32 %v736_v57, %v6465_v39 }
 0x122   :  { %v2313_v17 = vpack.c.bf16 %v547_v4, %v547_v4  ;;  %8865 = vst [vmem:[#allocation33_spill] sm:$0xff] %v6480_v26  ;;  %v826_v47 = vadd.f32 %v825_v40, %v6471_v16 }
 0x123   :  { %v6475_v24 = vunpack.c.l.b16 %v936_v20  ;;  %597 = vmatmul.bf16.gmra.mxu2 %v5842_v53  ;;  %775 = vmatmul.bf16.gmra.mxu0 %v5842_v53  ;;  %v969_v57 = vpack.c.bf16 %v737_v51, %v737_v51  ;;  %v6492_v20 = vperm.slane %v6183_v22, 2 }
 0x124   :  { %v6482_v49 = vunpack.c.l.b16 %v2313_v17  ;;  %686 = vmatmul.bf16.gmra.mxu3 %v5842_v53  ;;  %864 = vmatmul.bf16.gmra.mxu1 %v5842_v53  ;;  %v6495_v17 = vperm.slane %v6183_v22, 3  ;;  %v2346_v6 = vpack.c.bf16 %v826_v47, %v826_v47 }
 0x125   :  { %8864 = vst [vmem:[#allocation32_spill] sm:$0xff] %v6475_v24  ;;  %v6499_v43 = vunpack.c.l.b16 %v969_v57 }
 0x126   :  { %8866 = vst [vmem:[#allocation34_spill] sm:$0xff] %v6482_v49  ;;  %v558_v4 = vpop.f32.mrf.mxu2  ;;  %v6503_v49 = vunpack.c.l.b16 %v2346_v6 }
 0x127   :  { %v647_v15 = vpop.f32.mrf.mxu3  ;;  %8867 = vst [vmem:[#allocation35_spill] sm:$0xff] %v6495_v17  ;;  %v559_v14 = vadd.f32 %v558_v4, %v6492_v20 }
 0x128   :  { %v738_v25 = vpop.f32.mrf.mxu0  ;;  %8868 = vst [vmem:[#allocation36_spill] sm:$0xff] %v6499_v43  ;;  %v648_v51 = vadd.f32 %v647_v15, %v6495_v17 }
 0x129   :  { %v739_v40 = vadd.f32 %v738_v25, %v6465_v39  ;;  %v827_v53 = vpop.f32.mrf.mxu1  ;;  %8869 = vst [vmem:[#allocation37_spill] sm:$0xff] %v6503_v49  ;;  %v937_v47 = vpack.c.bf16 %v559_v14, %v559_v14 }
 0x12a   :  { %v828_v61 = vadd.f32 %v827_v53, %v6471_v16  ;;  %v2314_v35 = vpack.c.bf16 %v648_v51, %v648_v51 }
 0x12b   :  { %v970_v26 = vpack.c.bf16 %v739_v40, %v739_v40  ;;  %v1009_v19 = vunpack.c.l.b16 %v937_v47 }
 0x12c   :  { %v2347_v58 = vpack.c.bf16 %v828_v61, %v828_v61 }
 0x12d   :  { %v6505_v24 = vunpack.c.l.b16 %v970_v26 }
 0x12e   :  { %v560_v22 = vpop.f32.mrf.mxu2  ;;  %v6507_v11 = vunpack.c.l.b16 %v2347_v58 }
 0x12f   :  { %8870 = vst [vmem:[#allocation38_spill] sm:$0xff] %v6505_v24  ;;  %v561_v57 = vadd.f32 %v560_v22, %v6492_v20  ;;  %v649_v53 = vpop.f32.mrf.mxu3  ;;  %v2386_v22 = vunpack.c.l.b16 %v2314_v35 }
 0x130   :  { %v650_v4 = vadd.f32 %v649_v53, %v6495_v17  ;;  %v741_v40 = vpop.f32.mrf.mxu0 }
 0x131   :  { %v938_v61 = vpack.c.bf16 %v561_v57, %v561_v57  ;;  %v830_v26 = vpop.f32.mrf.mxu1  ;;  %v742_v14 = vadd.f32 %v741_v40, %v6465_v39 }
 0x132   :  { %v2315_v15 = vpack.c.bf16 %v650_v4, %v650_v4  ;;  %v831_v51 = vadd.f32 %v830_v26, %v6471_v16 }
 0x133   :  { %v1010_v58 = vunpack.c.l.b16 %v938_v61  ;;  %602 = vmatmul.bf16.gmra.mxu2 %v5862_v59  ;;  %780 = vmatmul.bf16.gmra.mxu0 %v5862_v59  ;;  %v971_v4 = vpack.c.bf16 %v742_v14, %v742_v14 }
 0x134   :  { %v2387_v25 = vunpack.c.l.b16 %v2315_v15  ;;  %691 = vmatmul.bf16.gmra.mxu3 %v5862_v59  ;;  %869 = vmatmul.bf16.gmra.mxu1 %v5862_v59  ;;  %v2348_v40 = vpack.c.bf16 %v831_v51, %v831_v51 }
 0x135   :  { %v1011_v53 = vpack.c.b16 %v1010_v58, %v1009_v19  ;;  %v6523_v15 = vunpack.c.l.b16 %v971_v4 }
 0x136   :  { %v2388_v57 = vpack.c.b16 %v2387_v25, %v2386_v22  ;;  %v563_v6 = vpop.f32.mrf.mxu2  ;;  %v6527_v19 = vunpack.c.l.b16 %v2348_v40 }
 0x137   :  { %v652_v47 = vpop.f32.mrf.mxu3  ;;  %1020 = vmatpush.bf16.xpose.msra.mxu2 %v1011_v53  ;;  %8871 = vst [vmem:[#allocation39_spill] sm:$0xff] %v6523_v15  ;;  %v564_v26 = vadd.f32 %v563_v6, %v6492_v20 }
 0x138   :  { %v743_v61 = vpop.f32.mrf.mxu0  ;;  %2397 = vmatpush.bf16.xpose.msra.mxu0 %v2388_v57  ;;  %v653_v59 = vadd.f32 %v652_v47, %v6495_v17  ;;  %8872 = vst [vmem:[#allocation40_spill] sm:$0xff] %v6527_v19 }
 0x139   :  { %v744_v43 = vadd.f32 %v743_v61, %v6465_v39  ;;  %v832_v24 = vpop.f32.mrf.mxu1  ;;  %v939_v51 = vpack.c.bf16 %v564_v26, %v564_v26 }
 0x13a   :  { %v833_v35 = vadd.f32 %v832_v24, %v6471_v16  ;;  %v2316_v4 = vpack.c.bf16 %v653_v59, %v653_v59 }
 0x13b   :  { %v972_v49 = vpack.c.bf16 %v744_v43, %v744_v43 }
 0x13c   :  { %v2349_v25 = vpack.c.bf16 %v833_v35, %v833_v35  ;;  %v1035_v35 = vunpack.c.l.b16 %v939_v51 }
 0x13d   :  { %v6529_v58 = vunpack.c.l.b16 %v972_v49 }
 0x13e   :  { %v565_v14 = vpop.f32.mrf.mxu2  ;;  %v6531_v22 = vunpack.c.l.b16 %v2349_v25 }
 0x13f   :  { %8873 = vst [vmem:[#allocation41_spill] sm:$0xff] %v6529_v58  ;;  %v566_v24 = vadd.f32 %v565_v14, %v6492_v20  ;;  %v654_v57 = vpop.f32.mrf.mxu3  ;;  %v2412_v14 = vunpack.c.l.b16 %v2316_v4 }
 0x140   :  { %v655_v43 = vadd.f32 %v654_v57, %v6495_v17  ;;  %v746_v6 = vpop.f32.mrf.mxu0 }
 0x141   :  { %v940_v61 = vpack.c.bf16 %v566_v24, %v566_v24  ;;  %v835_v49 = vpop.f32.mrf.mxu1  ;;  %v747_v26 = vadd.f32 %v746_v6, %v6465_v39 }
 0x142   :  { %v2317_v40 = vpack.c.bf16 %v655_v43, %v655_v43  ;;  %v836_v59 = vadd.f32 %v835_v49, %v6471_v16 }
 0x143   :  { %v1036_v25 = vunpack.c.l.b16 %v940_v61  ;;  %607 = vmatmul.bf16.gmra.mxu2 %v5882_v1  ;;  %785 = vmatmul.bf16.gmra.mxu0 %v5882_v1  ;;  %v973_v43 = vpack.c.bf16 %v747_v26, %v747_v26 }
 0x144   :  { %v2413_v53 = vunpack.c.l.b16 %v2317_v40  ;;  %696 = vmatmul.bf16.gmra.mxu3 %v5882_v1  ;;  %874 = vmatmul.bf16.gmra.mxu1 %v5882_v1  ;;  %v2350_v6 = vpack.c.bf16 %v836_v59, %v836_v59 }
 0x145   :  { %v1037_v57 = vpack.c.b16 %v1036_v25, %v1035_v35  ;;  %v6547_v40 = vunpack.c.l.b16 %v973_v43 }
 0x146   :  { %v2414_v24 = vpack.c.b16 %v2413_v53, %v2412_v14  ;;  %v568_v47 = vpop.f32.mrf.mxu2  ;;  %v6551_v53 = vunpack.c.l.b16 %v2350_v6 }
 0x147   :  { %v657_v51 = vpop.f32.mrf.mxu3  ;;  %1046 = vmatpush.bf16.xpose.msra.mxu3 %v1037_v57  ;;  %8874 = vst [vmem:[#allocation42_spill] sm:$0xff] %v6547_v40  ;;  %v569_v49 = vadd.f32 %v568_v47, %v6492_v20 }
 0x148   :  { %v748_v61 = vpop.f32.mrf.mxu0  ;;  %2423 = vmatpush.bf16.xpose.msra.mxu1 %v2414_v24  ;;  %v658_v1 = vadd.f32 %v657_v51, %v6495_v17  ;;  %8875 = vst [vmem:[#allocation43_spill] sm:$0xff] %v6551_v53 }
 0x149   :  { %v749_v15 = vadd.f32 %v748_v61, %v6465_v39  ;;  %v837_v58 = vpop.f32.mrf.mxu1  ;;  %v941_v59 = vpack.c.bf16 %v569_v49, %v569_v49 }
 0x14a   :  { %v838_v4 = vadd.f32 %v837_v58, %v6471_v16  ;;  %v2318_v43 = vpack.c.bf16 %v658_v1, %v658_v1 }
 0x14b   :  { %v974_v19 = vpack.c.bf16 %v749_v15, %v749_v15 }
 0x14c   :  { %v2351_v35 = vpack.c.bf16 %v838_v4, %v838_v4  ;;  %v1061_v4 = vunpack.c.l.b16 %v941_v59 }
 0x14d   :  { %v6553_v25 = vunpack.c.l.b16 %v974_v19 }
 0x14e   :  { %v570_v26 = vpop.f32.mrf.mxu2  ;;  %v6555_v14 = vunpack.c.l.b16 %v2351_v35 }
 0x14f   :  { %8876 = vst [vmem:[#allocation44_spill] sm:$0xff] %v6553_v25  ;;  %v571_v58 = vadd.f32 %v570_v26, %v6492_v20  ;;  %v659_v24 = vpop.f32.mrf.mxu3  ;;  %v6566_v26 = vunpack.c.l.b16 %v2318_v43 }
 0x150   :  { %8877 = vst [vmem:[#allocation45_spill] sm:$0xff] %v6555_v14  ;;  %v660_v15 = vadd.f32 %v659_v24, %v6495_v17  ;;  %v751_v47 = vpop.f32.mrf.mxu0 }
 0x151   :  { %v942_v61 = vpack.c.bf16 %v571_v58, %v571_v58  ;;  %v840_v19 = vpop.f32.mrf.mxu1  ;;  %v752_v49 = vadd.f32 %v751_v47, %v6465_v39  ;;  %8878 = vst [vmem:[#allocation46_spill] sm:$0xff] %v6566_v26 }
 0x152   :  { %v2319_v6 = vpack.c.bf16 %v660_v15, %v660_v15  ;;  %v841_v24 = vadd.f32 %v840_v19, %v6471_v16 }
 0x153   :  { %v1062_v35 = vunpack.c.l.b16 %v942_v61  ;;  %612 = vmatmul.bf16.gmra.mxu2 %v5902_v7  ;;  %790 = vmatmul.bf16.gmra.mxu0 %v5902_v7  ;;  %v975_v47 = vpack.c.bf16 %v752_v49, %v752_v49 }
 0x154   :  { %v6568_v1 = vunpack.c.l.b16 %v2319_v6  ;;  %701 = vmatmul.bf16.gmra.mxu3 %v5902_v7  ;;  %879 = vmatmul.bf16.gmra.mxu1 %v5902_v7  ;;  %v2352_v57 = vpack.c.bf16 %v841_v24, %v841_v24 }
 0x155   :  { %v1063_v58 = vpack.c.b16 %v1062_v35, %v1061_v4  ;;  %v6577_v14 = vunpack.c.l.b16 %v975_v47 }
 0x156   :  { %8879 = vst [vmem:[#allocation47_spill] sm:$0xff] %v6568_v1  ;;  %v573_v15 = vpop.f32.mrf.mxu2  ;;  %v6581_v35 = vunpack.c.l.b16 %v2352_v57 }
 0x157   :  { %v662_v61 = vpop.f32.mrf.mxu3  ;;  %1072 = vmatpush.bf16.xpose.msrb.mxu2 %v1063_v58  ;;  %8880 = vst [vmem:[#allocation48_spill] sm:$0xff] %v6577_v14  ;;  %v574_v19 = vadd.f32 %v573_v15, %v6492_v20 }
 0x158   :  { %v753_v51 = vpop.f32.mrf.mxu0  ;;  %v663_v4 = vadd.f32 %v662_v61, %v6495_v17  ;;  %8881 = vst [vmem:[#allocation49_spill] sm:$0xff] %v6581_v35 }
 0x159   :  { %v754_v43 = vadd.f32 %v753_v51, %v6465_v39  ;;  %v842_v6 = vpop.f32.mrf.mxu1  ;;  %v943_v24 = vpack.c.bf16 %v574_v19, %v574_v19 }
 0x15a   :  { %v843_v53 = vadd.f32 %v842_v6, %v6471_v16  ;;  %v2320_v1 = vpack.c.bf16 %v663_v4, %v663_v4 }
 0x15b   :  { %v976_v7 = vpack.c.bf16 %v754_v43, %v754_v43  ;;  %v1087_v40 = vunpack.c.l.b16 %v943_v24 }
 0x15c   :  { %v2353_v59 = vpack.c.bf16 %v843_v53, %v843_v53 }
 0x15d   :  { %v6583_v49 = vunpack.c.l.b16 %v976_v7 }
 0x15e   :  { %v575_v58 = vpop.f32.mrf.mxu2  ;;  %v6585_v26 = vunpack.c.l.b16 %v2353_v59 }
 0x15f   :  { %8882 = vst [vmem:[#allocation50_spill] sm:$0xff] %v6583_v49  ;;  %v576_v47 = vadd.f32 %v575_v58, %v6492_v20  ;;  %v664_v6 = vpop.f32.mrf.mxu3  ;;  %v6596_v58 = vunpack.c.l.b16 %v2320_v1 }
 0x160   :  { %8883 = vst [vmem:[#allocation51_spill] sm:$0xff] %v6585_v26  ;;  %v665_v15 = vadd.f32 %v664_v6, %v6495_v17  ;;  %v756_v43 = vpop.f32.mrf.mxu0 }
 0x161   :  { %v944_v53 = vpack.c.bf16 %v576_v47, %v576_v47  ;;  %v845_v61 = vpop.f32.mrf.mxu1  ;;  %v757_v19 = vadd.f32 %v756_v43, %v6465_v39  ;;  %8884 = vst [vmem:[#allocation52_spill] sm:$0xff] %v6596_v58 }
 0x162   :  { %v2321_v7 = vpack.c.bf16 %v665_v15, %v665_v15  ;;  %v846_v6 = vadd.f32 %v845_v61, %v6471_v16 }
 0x163   :  { %v1088_v59 = vunpack.c.l.b16 %v944_v53  ;;  %617 = vmatmul.bf16.gmra.mxu2 %v5922_v13  ;;  %795 = vmatmul.bf16.gmra.mxu0 %v5922_v13  ;;  %v977_v43 = vpack.c.bf16 %v757_v19, %v757_v19 }
 0x164   :  { %v6598_v4 = vunpack.c.l.b16 %v2321_v7  ;;  %706 = vmatmul.bf16.gmra.mxu3 %v5922_v13  ;;  %884 = vmatmul.bf16.gmra.mxu1 %v5922_v13  ;;  %v2354_v1 = vpack.c.bf16 %v846_v6, %v846_v6 }
 0x165   :  { %v1089_v47 = vpack.c.b16 %v1088_v59, %v1087_v40  ;;  %v6609_v26 = vunpack.c.l.b16 %v977_v43 }
 0x166   :  { %8885 = vst [vmem:[#allocation53_spill] sm:$0xff] %v6598_v4  ;;  %v6605_v15 = vpop.f32.mrf.mxu2  ;;  %v6612_v40 = vunpack.c.l.b16 %v2354_v1 }
 0x167   :  { %v667_v53 = vpop.f32.mrf.mxu3  ;;  %1098 = vmatpush.bf16.xpose.msrb.mxu3 %v1089_v47  ;;  %8886 = vst [vmem:[#allocation54_spill] sm:$0xff] %v6609_v26 }
 0x168   :  { %v758_v57 = vpop.f32.mrf.mxu0  ;;  %v668_v13 = vadd.f32 %v667_v53, %v6495_v17 }
 0x169   :  { %v759_v7 = vadd.f32 %v758_v57, %v6465_v39  ;;  %v847_v51 = vpop.f32.mrf.mxu1 }
 0x16a   :  { %v848_v35 = vadd.f32 %v847_v51, %v6471_v16  ;;  %v2322_v58 = vpack.c.bf16 %v668_v13, %v668_v13 }
 0x16b   :  { %v978_v61 = vpack.c.bf16 %v759_v7, %v759_v7 }
 0x16c   :  { %v2355_v59 = vpack.c.bf16 %v848_v35, %v848_v35 }
 0x16d   :  { %v6614_v24 = vunpack.c.l.b16 %v978_v61  ;;  %v2490_v61 = vunpack.c.l.b16 %v2322_v58 }
 0x16e   :  { %v6616_v19 = vpop.f32.mrf.mxu2  ;;  %v6618_v47 = vunpack.c.l.b16 %v2355_v59 }
 0x16f   :  { %8887 = vst [vmem:[#allocation55_spill] sm:$0xff] %v6614_v24  ;;  %v669_v6 = vpop.f32.mrf.mxu3 }
 0x170   :  { %v670_v51 = vadd.f32 %v669_v6, %v6495_v17  ;;  %v761_v43 = vpop.f32.mrf.mxu0 }
 0x171   :  { %v850_v1 = vpop.f32.mrf.mxu1  ;;  %v762_v35 = vadd.f32 %v761_v43, %v6465_v39 }
 0x172   :  { %v2323_v7 = vpack.c.bf16 %v670_v51, %v670_v51  ;;  %v851_v13 = vadd.f32 %v850_v1, %v6471_v16 }
 0x173   :  { %622 = vmatmul.bf16.gmra.mxu2 %v6020_v62  ;;  %800 = vmatmul.bf16.gmra.mxu0 %v6020_v62  ;;  %v979_v4 = vpack.c.bf16 %v762_v35, %v762_v35 }
 0x174   :  { %v2491_v59 = vunpack.c.l.b16 %v2323_v7  ;;  %711 = vmatmul.bf16.gmra.mxu3 %v6020_v62  ;;  %889 = vmatmul.bf16.gmra.mxu1 %v6020_v62  ;;  %v2356_v51 = vpack.c.bf16 %v851_v13, %v851_v13 }
 0x175   :  { %v6633_v58 = vunpack.c.l.b16 %v979_v4 }
 0x176   :  { %v2492_v6 = vpack.c.b16 %v2491_v59, %v2490_v61  ;;  %v583_v57 = vpop.f32.mrf.mxu2  ;;  %v6636_v1 = vunpack.c.l.b16 %v2356_v51 }
 0x177   :  { %v672_v53 = vpop.f32.mrf.mxu3  ;;  %8888 = vst [vmem:[#allocation56_spill] sm:$0xff] %v6633_v58 }
 0x178   :  { %v763_v26 = vpop.f32.mrf.mxu0  ;;  %2501 = vmatpush.bf16.xpose.msrb.mxu0 %v2492_v6  ;;  %v673_v49 = vadd.f32 %v672_v53, %v6495_v17  ;;  %8889 = vst [vmem:[#allocation57_spill] sm:$0xff] %v6636_v1 }
 0x179   :  { %v764_v43 = vadd.f32 %v763_v26, %v6465_v39  ;;  %v852_v24 = vpop.f32.mrf.mxu1 }
 0x17a   :  { %v853_v14 = vadd.f32 %v852_v24, %v6471_v16  ;;  %v2324_v6 = vpack.c.bf16 %v673_v49, %v673_v49 }
 0x17b   :  { %v980_v7 = vpack.c.bf16 %v764_v43, %v764_v43 }
 0x17c   :  { %v2357_v62 = vpack.c.bf16 %v853_v14, %v853_v14  ;;  %v2516_v14 = vunpack.c.l.b16 %v2324_v6 }
 0x17d   :  { %v6638_v61 = vunpack.c.l.b16 %v980_v7 }
 0x17e   :  { %v585_v35 = vpop.f32.mrf.mxu2  ;;  %v6640_v59 = vunpack.c.l.b16 %v2357_v62 }
 0x17f   :  { %8890 = vst [vmem:[#allocation58_spill] sm:$0xff] %v6638_v61  ;;  %v674_v26 = vpop.f32.mrf.mxu3 }
 0x180   :  { %8891 = vst [vmem:[#allocation59_spill] sm:$0xff] %v6640_v59  ;;  %v675_v24 = vadd.f32 %v674_v26, %v6495_v17  ;;  %v766_v4 = vpop.f32.mrf.mxu0 }
 0x181   :  { %v767_v51 = vadd.f32 %v766_v4, %v6465_v39 }
 0x182   :  { %v2325_v53 = vpack.c.bf16 %v675_v24, %v675_v24 }
 0x183   :  { %627 = vmatmul.bf16.gmra.mxu2 %v6127_v54  ;;  %805 = vmatmul.bf16.gmra.mxu0 %v6127_v54  ;;  %v981_v26 = vpack.c.bf16 %v767_v51, %v767_v51 }
 0x184   :  { %v2517_v7 = vunpack.c.l.b16 %v2325_v53  ;;  %716 = vmatmul.bf16.gmra.mxu3 %v6127_v54  ;;  %894 = vmatmul.bf16.gmra.mxu1 %v6127_v54 }
 0x185   :  { %v6653_v43 = vunpack.c.l.b16 %v981_v26 }
 0x186   :  { %v2518_v49 = vpack.c.b16 %v2517_v7, %v2516_v14  ;;  %v588_v62 = vpop.f32.mrf.mxu2 }
 0x187   :  { %v677_v13 = vpop.f32.mrf.mxu3  ;;  %8892 = vst [vmem:[#allocation60_spill] sm:$0xff] %v6653_v43 }
 0x188   :  { %v768_v16 = vpop.f32.mrf.mxu0  ;;  %2527 = vmatpush.bf16.xpose.msrb.mxu1 %v2518_v49  ;;  %v678_v58 = vadd.f32 %v677_v13, %v6495_v17 }
 0x189   :  { %v769_v24 = vadd.f32 %v768_v16, %v6465_v39 }
 0x18a   :  { %v2326_v14 = vpack.c.bf16 %v678_v58, %v678_v58  ;;  %v581_v58 = vadd.f32 %v6616_v19, %v6492_v20 }
 0x18b   :  { %v982_v4 = vpack.c.bf16 %v769_v24, %v769_v24  ;;  %v586_v24 = vadd.f32 %v585_v35, %v6492_v20 }
 0x18c   :  { %v6663_v16 = vunpack.c.l.b16 %v2326_v14  ;;  %v584_v14 = vadd.f32 %v583_v57, %v6492_v20  ;;  %v8896_v57 = vpack.c.b16 %v6205_v42, %v6199_v37 }
 0x18d   :  { %v6656_v61 = vunpack.c.l.b16 %v982_v4 }
 0x18e   :  { %v590_v6 = vpop.f32.mrf.mxu2  ;;  %8894 = vst [vmem:[#allocation62_spill] sm:$0xff] %v6663_v16  ;;  %v947_v43 = vpack.c.bf16 %v584_v14, %v584_v14 }
 0x18f   :  { %8893 = vst [vmem:[#allocation61_spill] sm:$0xff] %v6656_v61  ;;  %v679_v54 = vpop.f32.mrf.mxu3 }
 0x190   :  { %v680_v51 = vadd.f32 %v679_v54, %v6495_v17  ;;  %v579_v54 = vadd.f32 %v6605_v15, %v6492_v20  ;;  %v1139_v25 = vunpack.c.l.b16 %v947_v43  ;;  %v8899_v43 = vpack.c.b16 %v6243_v34, %v6239_v30 }
 0x192   :  { %v2327_v7 = vpack.c.bf16 %v680_v51, %v680_v51  ;;  %v946_v51 = vpack.c.bf16 %v581_v58, %v581_v58  ;;  %v8897_v58 = vpack.c.b16 %v6207_v44, %v6203_v41  ;;  %v591_v41 = vadd.f32 %v590_v6, %v6492_v20 }
 0x193   :  { %632 = vmatmul.bf16.gmra.mxu2 %v6174_v21  ;;  %810 = vmatmul.bf16.gmra.mxu0 %v6174_v21 }
 0x194   :  { %v6665_v49 = vunpack.c.l.b16 %v2327_v7  ;;  %721 = vmatmul.bf16.gmra.mxu3 %v6174_v21  ;;  %899 = vmatmul.bf16.gmra.mxu1 %v6174_v21  ;;  %v948_v7 = vpack.c.bf16 %v586_v24, %v586_v24  ;;  %v945_v21 = vpack.c.bf16 %v579_v54, %v579_v54  ;;  %v1114_v13 = vunpack.c.l.b16 %v946_v51 }
 0x196   :  { %8895 = vst [vmem:[#allocation63_spill] sm:$0xff] %v6665_v49  ;;  %v593_v26 = vpop.f32.mrf.mxu2  ;;  %v1140_v16 = vunpack.c.l.b16 %v948_v7  ;;  %v1113_v35 = vunpack.c.l.b16 %v945_v21 }
 0x197   :  { %v682_v4 = vpop.f32.mrf.mxu3 }
 0x198   :  { %v683_v53 = vadd.f32 %v682_v4, %v6495_v17  ;;  %v1115_v59 = vpack.c.b16 %v1114_v13, %v1113_v35  ;;  %v1141_v15 = vpack.c.b16 %v1140_v16, %v1139_v25  ;;  %v589_v25 = vadd.f32 %v588_v62, %v6492_v20 }
 0x19a   :  { %v2328_v39 = vpack.c.bf16 %v683_v53, %v683_v53  ;;  %v8898_v53 = vpack.c.b16 %v6241_v32, %v6235_v27  ;;  %v594_v27 = vadd.f32 %v593_v26, %v6492_v20  ;;  %v950_v32 = vpack.c.bf16 %v591_v41, %v591_v41 }
 0x19b   :  { %v949_v34 = vpack.c.bf16 %v589_v25, %v589_v25  ;;  %v8900_v26 = vpack.c.b16 %v6277_v38, %v6271_v28 }
 0x19c   :  { %v6685_v24 = vunpack.c.l.b16 %v2328_v39 }
 0x19d   :  { %v1165_v51 = vunpack.c.l.b16 %v949_v34 }
 0x19e   :  { %v595_v61 = vpop.f32.mrf.mxu2 }
 0x19f   :  { %v684_v49 = vpop.f32.mrf.mxu3  ;;  %v596_v44 = vadd.f32 %v595_v61, %v6492_v20 }
 0x1a0   :  { %v685_v19 = vadd.f32 %v684_v49, %v6495_v17  ;;  %v1166_v49 = vunpack.c.l.b16 %v950_v32 }
 0x1a2   :  { %v2329_v1 = vpack.c.bf16 %v685_v19, %v685_v19  ;;  %v1167_v21 = vpack.c.b16 %v1166_v49, %v1165_v51  ;;  %v8901_v19 = vpack.c.b16 %v6351_v46, %v6347_v36  ;;  %v8904_v49 = vpack.c.b16 %v6349_v56, %v6343_v45  ;;  %v6730_v51 = vpop.f32.mrf.mxu1 }
 0x1a3   :  { %1021 = vmatmul.bf16.vlgmr.msra.gmra.mxu2 %v8896_v57  ;;  %2398 = vmatmul.bf16.vlgmr.msra.gmra.mxu0 %v8897_v58  ;;  %v8902_v57 = vpack.c.b16 %v6313_v9, %v6307_v18  ;;  %v8903_v58 = vpack.c.b16 %v6387_v33, %v6383_v31  ;;  %8907 = vst [vmem:[#allocation64_spill] sm:$0xff] %v6730_v51 }
 0x1a4   :  { %v6687_v4 = vunpack.c.l.b16 %v2329_v1  ;;  %1047 = vmatmul.bf16.vlgmr.msra.gmra.mxu3 %v8898_v53  ;;  %2424 = vmatmul.bf16.vlgmr.msra.gmra.mxu1 %v8899_v43  ;;  %v952_v1 = vpack.c.bf16 %v596_v44, %v596_v44 }
 0x1a5   :  { %1124 = vmatpush.bf16.xpose.msra.mxu2 %v1115_v59  ;;  %1150 = vmatpush.bf16.xpose.msra.mxu3 %v1141_v15  ;;  %v951_v59 = vpack.c.bf16 %v594_v27, %v594_v27 }
 0x1a6   :  { %v598_v42 = vpop.f32.mrf.mxu2  ;;  %v1192_v13 = vunpack.c.l.b16 %v952_v1 }
 0x1a7   :  { %v687_v39 = vpop.f32.mrf.mxu3  ;;  %v1191_v61 = vunpack.c.l.b16 %v951_v59  ;;  %v599_v46 = vadd.f32 %v598_v42, %v6492_v20 }
 0x1a8   :  { %v688_v30 = vadd.f32 %v687_v39, %v6495_v17 }
 0x1a9   :  { %v1193_v62 = vpack.c.b16 %v1192_v13, %v1191_v61  ;;  %v953_v44 = vpack.c.bf16 %v599_v46, %v599_v46  ;;  %v8905_v13 = vpack.c.b16 %v6224_v8, %v6222_v5 }
 0x1aa   :  { %v2330_v14 = vpack.c.bf16 %v688_v30, %v688_v30  ;;  %v6734_v45 = vpop.f32.mrf.mxu1 }
 0x1ab   :  { %v1217_v27 = vunpack.c.l.b16 %v953_v44  ;;  %8908 = vst [vmem:[#allocation65_spill] sm:$0xff] %v6734_v45 }
 0x1ac   :  { %v2594_v35 = vunpack.c.l.b16 %v2330_v14 }
 0x1ae   :  { %v600_v16 = vpop.f32.mrf.mxu2 }
 0x1af   :  { %v689_v54 = vpop.f32.mrf.mxu3  ;;  %v601_v53 = vadd.f32 %v600_v16, %v6492_v20 }
 0x1b0   :  { %v690_v6 = vadd.f32 %v689_v54, %v6495_v17 }
 0x1b1   :  { %v954_v36 = vpack.c.bf16 %v601_v53, %v601_v53 }
 0x1b2   :  { %v2331_v7 = vpack.c.bf16 %v690_v6, %v690_v6  ;;  %v8906_v6 = vpack.c.b16 %v6385_v10, %v6379_v0 }
 0x1b3   :  { %1073 = vmatmul.bf16.vlgmr.msrb.gmra.mxu2 %v8900_v26  ;;  %2502 = vmatmul.bf16.vlgmr.msrb.gmra.mxu0 %v8901_v19  ;;  %v1218_v18 = vunpack.c.l.b16 %v954_v36  ;;  %v8909_v19 = vpack.c.b16 %v6260_v63, %v6258_v60  ;;  %v8912_v36 = vpack.c.b16 %v6457_v48, %v6451_v12  ;;  %v8915_v48 = vpack.c.b16 %v6217_v3, %v6215_v2 }
 0x1b4   :  { %v2595_v15 = vunpack.c.l.b16 %v2331_v7  ;;  %1099 = vmatmul.bf16.vlgmr.msrb.gmra.mxu3 %v8902_v57  ;;  %2528 = vmatmul.bf16.vlgmr.msrb.gmra.mxu1 %v8903_v58 }
 0x1b5   :  { %1176 = vmatpush.bf16.xpose.msrb.mxu2 %v1167_v21  ;;  %1202 = vmatpush.bf16.xpose.msrb.mxu3 %v1193_v62  ;;  %v1219_v34 = vpack.c.b16 %v1218_v18, %v1217_v27 }
 0x1b6   :  { %v2596_v28 = vpack.c.b16 %v2595_v15, %v2594_v35  ;;  %v603_v38 = vpop.f32.mrf.mxu2 }
 0x1b7   :  { %v692_v43 = vpop.f32.mrf.mxu3  ;;  %v604_v41 = vadd.f32 %v603_v38, %v6492_v20  ;;  %v8910_v38 = vpack.c.b16 %v6421_v52, %v6415_v29 }
 0x1b8   :  { %2605 = vmatpush.bf16.xpose.msra.mxu0 %v2596_v28  ;;  %v693_v9 = vadd.f32 %v692_v43, %v6495_v17 }
 0x1b9   :  { %v955_v33 = vpack.c.bf16 %v604_v41, %v604_v41 }
 0x1ba   :  { %v2332_v32 = vpack.c.bf16 %v693_v9, %v693_v9 }
 0x1bb   :  { %v1243_v59 = vunpack.c.l.b16 %v955_v33 }
 0x1bc   :  { %v2620_v54 = vunpack.c.l.b16 %v2332_v32 }
 0x1be   :  { %v605_v39 = vpop.f32.mrf.mxu2 }
 0x1bf   :  { %v606_v31 = vadd.f32 %v605_v39, %v6492_v20  ;;  %v694_v25 = vpop.f32.mrf.mxu3 }
 0x1c0   :  { %v695_v1 = vadd.f32 %v694_v25, %v6495_v17  ;;  %v8916_v25 = vpack.c.b16 %v6253_v55, %v6251_v50 }
 0x1c1   :  { %v956_v30 = vpack.c.bf16 %v606_v31, %v606_v31 }
 0x1c2   :  { %v2333_v42 = vpack.c.bf16 %v695_v1, %v695_v1 }
 0x1c3   :  { %v1244_v16 = vunpack.c.l.b16 %v956_v30  ;;  %1125 = vmatmul.bf16.vlgmr.msra.gmra.mxu2 %v8904_v49  ;;  %2606 = vmatmul.bf16.vlgmr.msra.gmra.mxu0 %v8905_v13 }
 0x1c4   :  { %v2621_v14 = vunpack.c.l.b16 %v2333_v42  ;;  %1151 = vmatmul.bf16.vlgmr.msra.gmra.mxu3 %v8906_v6  ;;  %1228 = vmatpush.bf16.xpose.msra.mxu2 %v1219_v34 }
 0x1c5   :  { %v1245_v61 = vpack.c.b16 %v1244_v16, %v1243_v59 }
 0x1c6   :  { %v2622_v7 = vpack.c.b16 %v2621_v14, %v2620_v54  ;;  %v608_v21 = vpop.f32.mrf.mxu2  ;;  %v8917_v14 = vld [vmem:[#allocation4_spill] sm:$0xff] }
 0x1c7   :  { %v697_v62 = vpop.f32.mrf.mxu3  ;;  %1254 = vmatpush.bf16.xpose.msra.mxu3 %v1245_v61  ;;  %v609_v56 = vadd.f32 %v608_v21, %v6492_v20  ;;  %v8918_v6 = vpack.c.b16 %v6289_v23, %v8917_v14  ;;  %v8919_v21 = vld [vmem:[#allocation10_spill] sm:$0xff] }
 0x1c8   :  { %2631 = vmatpush.bf16.xpose.msra.mxu1 %v2622_v7  ;;  %v698_v5 = vadd.f32 %v697_v62, %v6495_v17  ;;  %v8920_v62 = vld [vmem:[#allocation9_spill] sm:$0xff] }
 0x1c9   :  { %v957_v26 = vpack.c.bf16 %v609_v56, %v609_v56  ;;  %v8921_v56 = vpack.c.b16 %v8919_v21, %v8920_v62  ;;  %v8944_v21 = vld [vmem:[#allocation57_spill] sm:$0xff] }
 0x1ca   :  { %v2334_v35 = vpack.c.bf16 %v698_v5, %v698_v5  ;;  %v6775_v5 = vpop.f32.mrf.mxu0 }
 0x1cb   :  { %v1269_v53 = vunpack.c.l.b16 %v957_v26 }
 0x1cc   :  { %v6744_v43 = vunpack.c.l.b16 %v2334_v35 }
 0x1ce   :  { %v610_v8 = vpop.f32.mrf.mxu2  ;;  %8911 = vst [vmem:[#allocation66_spill] sm:$0xff] %v6744_v43 }
 0x1cf   :  { %v611_v10 = vadd.f32 %v610_v8, %v6492_v20  ;;  %v699_v0 = vpop.f32.mrf.mxu3  ;;  %2632 = vmatmul.bf16.vlgmr.msra.gmra.mxu1 %v8909_v19  ;;  %v8922_v19 = vld [vmem:[#allocation37_spill] sm:$0xff] }
 0x1d0   :  { %v700_v15 = vadd.f32 %v699_v0, %v6495_v17  ;;  %v8923_v35 = vpack.c.b16 %v6507_v11, %v8922_v19  ;;  %v8927_v11 = vpack.c.b16 %v6618_v47, %v6612_v40  ;;  %v8933_v40 = vld [vmem:[#allocation40_spill] sm:$0xff] }
 0x1d1   :  { %v958_v57 = vpack.c.bf16 %v611_v10, %v611_v10  ;;  %v8934_v47 = vpack.c.b16 %v6531_v22, %v8933_v40  ;;  %v8943_v22 = vld [vmem:[#allocation59_spill] sm:$0xff]  ;;  %v8960_v40 = vld [vmem:[#allocation32_spill] sm:$0xff] }
 0x1d2   :  { %v2335_v58 = vpack.c.bf16 %v700_v15, %v700_v15  ;;  %v8945_v62 = vpack.c.b16 %v8943_v22, %v8944_v21 }
 0x1d3   :  { %v1270_v28 = vunpack.c.l.b16 %v958_v57  ;;  %1177 = vmatmul.bf16.vlgmr.msrb.gmra.mxu2 %v8910_v38 }
 0x1d4   :  { %v6746_v46 = vunpack.c.l.b16 %v2335_v58  ;;  %1203 = vmatmul.bf16.vlgmr.msrb.gmra.mxu3 %v8912_v36  ;;  %v6782_v58 = vpop.f32.mrf.mxu0  ;;  %v8924_v36 = vld [vmem:[#allocation16_spill] sm:$0xff] }
 0x1d5   :  { %v1271_v60 = vpack.c.b16 %v1270_v28, %v1269_v53 }
 0x1d6   :  { %v613_v41 = vpop.f32.mrf.mxu2 }
 0x1d7   :  { %v6753_v44 = vpop.f32.mrf.mxu3  ;;  %1280 = vmatpush.bf16.xpose.msrb.mxu2 %v1271_v60  ;;  %v614_v9 = vadd.f32 %v613_v41, %v6492_v20  ;;  %v8925_v60 = vld [vmem:[#allocation15_spill] sm:$0xff] }
 0x1d8   :  { %8913 = vst [vmem:[#allocation67_spill] sm:$0xff] %v6753_v44  ;;  %v8926_v41 = vpack.c.b16 %v8924_v36, %v8925_v60 }
 0x1d9   :  { %v959_v52 = vpack.c.bf16 %v614_v9, %v614_v9 }
 0x1db   :  { %v1295_v31 = vunpack.c.l.b16 %v959_v52 }
 0x1de   :  { %v615_v29 = vpop.f32.mrf.mxu2 }
 0x1df   :  { %v616_v18 = vadd.f32 %v615_v29, %v6492_v20  ;;  %v6757_v39 = vpop.f32.mrf.mxu3 }
 0x1e0   :  { %8914 = vst [vmem:[#allocation68_spill] sm:$0xff] %v6757_v39 }
 0x1e1   :  { %v960_v33 = vpack.c.bf16 %v616_v18, %v616_v18 }
 0x1e3   :  { %v1296_v12 = vunpack.c.l.b16 %v960_v33  ;;  %1229 = vmatmul.bf16.vlgmr.msra.gmra.mxu2 %v8915_v48  ;;  %v8929_v48 = vld [vmem:[#allocation13_spill] sm:$0xff] }
 0x1e4   :  { %1255 = vmatmul.bf16.vlgmr.msra.gmra.mxu3 %v8916_v25 }
 0x1e5   :  { %v1297_v27 = vpack.c.b16 %v1296_v12, %v1295_v31  ;;  %v8928_v12 = vld [vmem:[#allocation14_spill] sm:$0xff] }
 0x1e6   :  { %v618_v32 = vpop.f32.mrf.mxu2  ;;  %v8930_v25 = vpack.c.b16 %v8928_v12, %v8929_v48 }
 0x1e7   :  { %v707_v1 = vpop.f32.mrf.mxu3  ;;  %1306 = vmatpush.bf16.xpose.msrb.mxu3 %v1297_v27  ;;  %v619_v30 = vadd.f32 %v618_v32, %v6492_v20 }
 0x1e8   :  { %v708_v34 = vadd.f32 %v707_v1, %v6495_v17  ;;  %v6795_v1 = vpop.f32.mrf.mxu1 }
 0x1e9   :  { %v961_v59 = vpack.c.bf16 %v619_v30, %v619_v30  ;;  %8931 = vst [vmem:[#allocation4_spill] sm:$0xff] %v6795_v1 }
 0x1ea   :  { %v2338_v13 = vpack.c.bf16 %v708_v34, %v708_v34 }
 0x1eb   :  { %v1321_v50 = vunpack.c.l.b16 %v961_v59 }
 0x1ec   :  { %v2698_v61 = vunpack.c.l.b16 %v2338_v13  ;;  %v8935_v13 = vld [vmem:[#allocation18_spill] sm:$0xff] }
 0x1ee   :  { %v620_v42 = vpop.f32.mrf.mxu2 }
 0x1ef   :  { %v621_v16 = vadd.f32 %v620_v42, %v6492_v20  ;;  %v709_v49 = vpop.f32.mrf.mxu3 }
 0x1f0   :  { %v710_v2 = vadd.f32 %v709_v49, %v6495_v17 }
 0x1f1   :  { %v962_v3 = vpack.c.bf16 %v621_v16, %v621_v16 }
 0x1f2   :  { %v2339_v54 = vpack.c.bf16 %v710_v2, %v710_v2  ;;  %v8936_v2 = vld [vmem:[#allocation17_spill] sm:$0xff] }
 0x1f3   :  { %v1322_v55 = vunpack.c.l.b16 %v962_v3  ;;  %1281 = vmatmul.bf16.vlgmr.msrb.gmra.mxu2 %v8918_v6  ;;  %v8937_v3 = vpack.c.b16 %v8935_v13, %v8936_v2  ;;  %v8940_v6 = vld [vmem:[#allocation20_spill] sm:$0xff]  ;;  %v8963_v2 = vld [vmem:[#allocation50_spill] sm:$0xff] }
 0x1f4   :  { %v2699_v7 = vunpack.c.l.b16 %v2339_v54  ;;  %1307 = vmatmul.bf16.vlgmr.msrb.gmra.mxu3 %v8921_v56  ;;  %v6806_v54 = vpop.f32.mrf.mxu1 }
 0x1f5   :  { %v1323_v8 = vpack.c.b16 %v1322_v55, %v1321_v50  ;;  %8938 = vst [vmem:[#allocation9_spill] sm:$0xff] %v6806_v54 }
 0x1f6   :  { %v2700_v26 = vpack.c.b16 %v2699_v7, %v2698_v61  ;;  %v623_v10 = vpop.f32.mrf.mxu2  ;;  %v8941_v61 = vld [vmem:[#allocation19_spill] sm:$0xff] }
 0x1f7   :  { %v712_v0 = vpop.f32.mrf.mxu3  ;;  %1332 = vmatpush.bf16.xpose.msra.mxu2 %v1323_v8  ;;  %v624_v23 = vadd.f32 %v623_v10, %v6492_v20  ;;  %v8942_v7 = vpack.c.b16 %v8940_v6, %v8941_v61 }
 0x1f8   :  { %2709 = vmatpush.bf16.xpose.msrb.mxu0 %v2700_v26  ;;  %v713_v15 = vadd.f32 %v712_v0, %v6495_v17 }
 0x1f9   :  { %v963_v53 = vpack.c.bf16 %v624_v23, %v624_v23  ;;  %v8948_v23 = vld [vmem:[#allocation36_spill] sm:$0xff] }
 0x1fa   :  { %v2340_v9 = vpack.c.bf16 %v713_v15, %v713_v15 }
 0x1fb   :  { %v1347_v33 = vunpack.c.l.b16 %v963_v53 }
 0x1fc   :  { %v2724_v27 = vunpack.c.l.b16 %v2340_v9 }
 0x1fe   :  { %v625_v57 = vpop.f32.mrf.mxu2 }
 0x1ff   :  { %v626_v28 = vadd.f32 %v625_v57, %v6492_v20  ;;  %v714_v38 = vpop.f32.mrf.mxu3  ;;  %2710 = vmatmul.bf16.vlgmr.msrb.gmra.mxu0 %v8926_v41 }
 0x200   :  { %3199 = vmatpush.bf16.msra.mxu0 %v8923_v35  ;;  %v715_v29 = vadd.f32 %v714_v38, %v6495_v17  ;;  %v8947_v35 = vld [vmem:[#allocation38_spill] sm:$0xff]  ;;  %v8951_v38 = vld [vmem:[#allocation23_spill] sm:$0xff] }
 0x201   :  { %v964_v52 = vpack.c.bf16 %v626_v28, %v626_v28  ;;  %v8949_v15 = vpack.c.b16 %v8947_v35, %v8948_v23  ;;  %v8950_v28 = vld [vmem:[#allocation24_spill] sm:$0xff] }
 0x202   :  { %v2341_v18 = vpack.c.bf16 %v715_v29, %v715_v29  ;;  %v8952_v36 = vpack.c.b16 %v8950_v28, %v8951_v38  ;;  %v8954_v29 = vld [vmem:[#allocation44_spill] sm:$0xff] }
 0x203   :  { %v1348_v31 = vunpack.c.l.b16 %v964_v52  ;;  %1333 = vmatmul.bf16.vlgmr.msra.gmra.mxu2 %v8930_v25 }
 0x204   :  { %3311 = vmatpush.bf16.msrb.mxu0 %v8927_v11  ;;  %v2725_v32 = vunpack.c.l.b16 %v2341_v18  ;;  %v8955_v11 = vld [vmem:[#allocation42_spill] sm:$0xff] }
 0x205   :  { %v1349_v30 = vpack.c.b16 %v1348_v31, %v1347_v33  ;;  %v8956_v52 = vpack.c.b16 %v8954_v29, %v8955_v11 }
 0x206   :  { %v2726_v34 = vpack.c.b16 %v2725_v32, %v2724_v27  ;;  %v628_v42 = vpop.f32.mrf.mxu2  ;;  %v8957_v32 = vld [vmem:[#allocation41_spill] sm:$0xff] }
 0x207   :  { %v6797_v59 = vpop.f32.mrf.mxu3  ;;  %1358 = vmatpush.bf16.xpose.msra.mxu3 %v1349_v30  ;;  %v629_v16 = vadd.f32 %v628_v42, %v6492_v20  ;;  %v8958_v30 = vld [vmem:[#allocation39_spill] sm:$0xff] }
 0x208   :  { %8932 = vst [vmem:[#allocation10_spill] sm:$0xff] %v6797_v59  ;;  %2735 = vmatpush.bf16.xpose.msrb.mxu1 %v2726_v34  ;;  %v8959_v34 = vpack.c.b16 %v8957_v32, %v8958_v30 }
 0x209   :  { %v965_v50 = vpack.c.bf16 %v629_v16, %v629_v16 }
 0x20b   :  { %v1373_v8 = vunpack.c.l.b16 %v965_v50 }
 0x20e   :  { %v630_v49 = vpop.f32.mrf.mxu2  ;;  %1359 = vmatmul.bf16.vlgmr.msra.gmra.mxu3 %v8937_v3  ;;  %v8964_v3 = vld [vmem:[#allocation48_spill] sm:$0xff] }
 0x20f   :  { %v631_v55 = vadd.f32 %v630_v49, %v6492_v20  ;;  %v6809_v14 = vpop.f32.mrf.mxu3  ;;  %2736 = vmatmul.bf16.vlgmr.msrb.gmra.mxu1 %v8942_v7  ;;  %v8965_v50 = vpack.c.b16 %v8963_v2, %v8964_v3 }
 0x210   :  { %3227 = vmatpush.bf16.msra.mxu1 %v8934_v47  ;;  %8939 = vst [vmem:[#allocation37_spill] sm:$0xff] %v6809_v14  ;;  %v8961_v47 = vld [vmem:[#allocation31_spill] sm:$0xff] }
 0x211   :  { %v966_v56 = vpack.c.bf16 %v631_v55, %v631_v55  ;;  %v8962_v16 = vpack.c.b16 %v8960_v40, %v8961_v47 }
 0x213   :  { %v1374_v26 = vunpack.c.l.b16 %v966_v56 }
 0x214   :  { %3339 = vmatpush.bf16.msrb.mxu1 %v8945_v62 }
 0x215   :  { %v1375_v10 = vpack.c.b16 %v1374_v26, %v1373_v8 }
 0x216   :  { %v633_v0 = vpop.f32.mrf.mxu2 }
 0x217   :  { %v6817_v19 = vpop.f32.mrf.mxu3  ;;  %1384 = vmatpush.bf16.xpose.msrb.mxu2 %v1375_v10  ;;  %v634_v57 = vadd.f32 %v633_v0, %v6492_v20 }
 0x218   :  { %8946 = vst [vmem:[#allocation16_spill] sm:$0xff] %v6817_v19 }
 0x219   :  { %v967_v60 = vpack.c.bf16 %v634_v57, %v634_v57 }
 0x21b   :  { %v1399_v33 = vunpack.c.l.b16 %v967_v60 }
 0x21e   :  { %v635_v53 = vpop.f32.mrf.mxu2  ;;  %1385 = vmatmul.bf16.vlgmr.msrb.gmra.mxu2 %v8952_v36 }
 0x21f   :  { %1823 = vmatpush.bf16.msra.mxu2 %v8949_v15  ;;  %v636_v41 = vadd.f32 %v635_v53, %v6492_v20  ;;  %v6827_v9 = vpop.f32.mrf.mxu3 }
 0x220   :  { %8953 = vst [vmem:[#allocation15_spill] sm:$0xff] %v6827_v9 }
 0x221   :  { %v968_v18 = vpack.c.bf16 %v636_v41, %v636_v41 }
 0x223   :  { %1879 = vmatpush.bf16.msrb.mxu2 %v8956_v52  ;;  %v1400_v31 = vunpack.c.l.b16 %v968_v18 }
 0x225   :  { %v1401_v12 = vpack.c.b16 %v1400_v31, %v1399_v33 }
 0x226   :  { %v6832_v48 = vpop.f32.mrf.mxu2 }
 0x227   :  { %v6834_v25 = vpop.f32.mrf.mxu3  ;;  %1410 = vmatpush.bf16.xpose.msrb.mxu3 %v1401_v12  ;;  %v1418_v27 = vsel %vm1417_vm0, %v6832_v48, -inf }
 0x228   :  { %v1424_v20 = vsel %vm1417_vm0, %v6834_v25, -inf  ;;  %1419 = vmax.xlane.f32.xlu0 %v1418_v27 }
 0x229   :  { %1425 = vmax.xlane.f32.xlu1 %v1424_v20 }
 0x22e   :  { %v6843_v42 = vpop.f32.mrf.mxu2  ;;  %1411 = vmatmul.bf16.vlgmr.msrb.gmra.mxu3 %v8962_v16 }
 0x22f   :  { %1851 = vmatpush.bf16.msra.mxu3 %v8959_v34  ;;  %v6848_v49 = vpop.f32.mrf.mxu3  ;;  %v1421_v13 = vsel %vm1417_vm0, %v6843_v42, -inf }
 0x230   :  { %v1427_v55 = vsel %vm1417_vm0, %v6848_v49, -inf  ;;  %1422 = vmax.xlane.f32.xlu0 %v1421_v13 }
 0x231   :  { %1428 = vmax.xlane.f32.xlu1 %v1427_v55 }
 0x233   :  { %1907 = vmatpush.bf16.msrb.mxu3 %v8965_v50 }
 0x236   :  { %v6857_v6 = vpop.f32.mrf.mxu2 }
 0x237   :  { %v6859_v61 = vpop.f32.mrf.mxu3  ;;  %v1430_v7 = vsel %vm1417_vm0, %v6857_v6, -inf }
 0x238   :  { %1431 = vmax.xlane.f32.xlu2 %v1430_v7  ;;  %v1436_v22 = vsel %vm1417_vm0, %v6859_v61, -inf }
 0x239   :  { %1437 = vmax.xlane.f32.xlu0 %v1436_v22 }
 0x23e   :  { %v6865_v21 = vpop.f32.mrf.mxu2 }
 0x23f   :  { %v6867_v62 = vpop.f32.mrf.mxu3  ;;  %v1433_v56 = vsel %vm1417_vm0, %v6865_v21, -inf }
 0x240   :  { %v1439_v8 = vsel %vm1417_vm0, %v6867_v62, -inf  ;;  %1434 = vmax.xlane.f32.xlu2 %v1433_v56 }
 0x241   :  { %1440 = vmax.xlane.f32.xlu1 %v1439_v8 }
 0x246   :  { %v6873_v26 = vpop.f32.mrf.mxu2 }
 0x247   :  { %v6875_v10 = vpop.f32.mrf.mxu3  ;;  %v1442_v0 = vsel %vm1417_vm0, %v6873_v26, -inf }
 0x248   :  { %1443 = vmax.xlane.f32.xlu2 %v1442_v0  ;;  %v1448_v35 = vsel %vm1417_vm0, %v6875_v10, -inf }
 0x249   :  { %1449 = vmax.xlane.f32.xlu1 %v1448_v35 }
 0x24e   :  { %v6881_v23 = vpop.f32.mrf.mxu2 }
 0x24f   :  { %v6883_v15 = vpop.f32.mrf.mxu3  ;;  %v1445_v57 = vsel %vm1417_vm0, %v6881_v23, -inf }
 0x250   :  { %1446 = vmax.xlane.f32.xlu0 %v1445_v57  ;;  %v1451_v53 = vsel %vm1417_vm0, %v6883_v15, -inf }
 0x251   :  { %1452 = vmax.xlane.f32.xlu2 %v1451_v53 }
 0x256   :  { %v6889_v28 = vpop.f32.mrf.mxu2 }
 0x257   :  { %v6891_v38 = vpop.f32.mrf.mxu3  ;;  %v1454_v36 = vsel %vm1417_vm0, %v6889_v28, -inf }
 0x258   :  { %v1460_v60 = vsel %vm1417_vm0, %v6891_v38, -inf  ;;  %1455 = vmax.xlane.f32.xlu0 %v1454_v36 }
 0x259   :  { %1461 = vmax.xlane.f32.xlu1 %v1460_v60 }
 0x25e   :  { %v6897_v41 = vpop.f32.mrf.mxu2 }
 0x25f   :  { %v6899_v29 = vpop.f32.mrf.mxu3  ;;  %v1457_v11 = vsel %vm1417_vm0, %v6897_v41, -inf }
 0x260   :  { %v1463_v52 = vsel %vm1417_vm0, %v6899_v29, -inf }
 0x261   :  { %1458 = vmax.xlane.f32.xlu1 %v1457_v11  ;;  %1464 = vmax.xlane.f32.xlu2 %v1463_v52 }
 0x266   :  { %v6905_v18 = vpop.f32.mrf.mxu2 }
 0x267   :  { %v1466_v33 = vsel %vm1417_vm0, %v6905_v18, -inf  ;;  %v6909_v31 = vpop.f32.mrf.mxu3 }
 0x268   :  { %1467 = vmax.xlane.f32.xlu0 %v1466_v33  ;;  %v1472_v27 = vsel %vm1417_vm0, %v6909_v31, -inf }
 0x26e   :  { %v6911_v12 = vpop.f32.mrf.mxu2 }
 0x26f   :  { %v1469_v20 = vsel %vm1417_vm0, %v6911_v12, -inf  ;;  %v6917_v32 = vpop.f32.mrf.mxu3 }
 0x270   :  { %1473 = vmax.xlane.f32.xlu0 %v1472_v27  ;;  %1470 = vmax.xlane.f32.xlu1 %v1469_v20  ;;  %v1475_v34 = vsel %vm1417_vm0, %v6917_v32, -inf }
 0x276   :  { %v6919_v30 = vpop.f32.mrf.mxu2 }
 0x277   :  { %v1478_v40 = vsel %vm1417_vm0, %v6919_v30, -inf }
 0x278   :  { %1476 = vmax.xlane.f32.xlu1 %v1475_v34  ;;  %1479 = vmax.xlane.f32.xlu2 %v1478_v40 }
 0x27e   :  { %v6925_v47 = vpop.f32.mrf.mxu2 }
 0x286   :  { %v6927_v16 = vpop.f32.mrf.mxu2 }
 0x287   :  { %v1490_v13 = vsel %vm1417_vm0, %v6927_v16, -inf }
 0x288   :  { %1491 = vmax.xlane.f32.xlu1 %v1490_v13  ;;  %v6949_v13 = vpop.f32.mrf.mxu3 }
 0x29b   :  { %v1420_v2 = vpop.xlane.xlu0 %1419 }
 0x29c   :  { %v1426_v3 = vpop.xlane.xlu1 %1425  ;;  %v1514_v50 = vsub.f32 %v6832_v48, %v1420_v2 }
 0x29d   :  { %v1516_v55 = vsub.f32 %v6834_v25, %v1426_v3 }
 0x29e   :  { %v1546_v7 = vmul.f32 1.442695, %v1514_v50  ;;  %v1484_v50 = vsel %vm1417_vm0, %v6949_v13, -inf }
 0x29f   :  { %v1550_v22 = vmul.f32 1.442695, %v1516_v55 }
 0x2a0   :  { %5345 = vpow2.f32 %v1546_v7 }
 0x2a1   :  { %5347 = vpow2.f32 %v1550_v22 }
 0x2a3   :  { %v1423_v56 = vpop.xlane.xlu0 %1422 }
 0x2a4   :  { %v1515_v8 = vsub.f32 %v6843_v42, %v1423_v56  ;;  %v1429_v53 = vpop.xlane.xlu1 %1428 }
 0x2a5   :  { %v1517_v42 = vsub.f32 %v6848_v49, %v1429_v53 }
 0x2a6   :  { %v6934_v0 = vpop.eup %5345  ;;  %v1548_v35 = vmul.f32 1.442695, %v1515_v8 }
 0x2a7   :  { %v1610_v57 = vsel %vm1417_vm0, %v6934_v0, 0.0  ;;  %v6938_v48 = vpop.eup %5347  ;;  %v1552_v34 = vmul.f32 1.442695, %v1517_v42 }
 0x2a8   :  { %5349 = vpow2.f32 %v1548_v35  ;;  %1611 = vadd.xlane.f32.xlu2 %v1610_v57  ;;  %v1616_v27 = vsel %vm1417_vm0, %v6938_v48, 0.0 }
 0x2ab   :  { %v1432_v36 = vpop.xlane.xlu2 %1431 }
 0x2ac   :  { %v1518_v25 = vsub.f32 %v6857_v6, %v1432_v36  ;;  %v1438_v60 = vpop.xlane.xlu0 %1437 }
 0x2ad   :  { %v1520_v20 = vsub.f32 %v6859_v61, %v1438_v60  ;;  %v1481_v61 = vsel %vm1417_vm0, %v6925_v47, -inf  ;;  %v6974_v60 = vpop.f32.mrf.mxu3 }
 0x2ae   :  { %v6941_v11 = vpop.eup %5349  ;;  %v1554_v52 = vmul.f32 1.442695, %v1518_v25 }
 0x2af   :  { %v1613_v33 = vsel %vm1417_vm0, %v6941_v11, 0.0  ;;  %v1558_v40 = vmul.f32 1.442695, %v1520_v20 }
 0x2b0   :  { %5351 = vpow2.f32 %v1554_v52  ;;  %1614 = vadd.xlane.f32.xlu0 %v1613_v33  ;;  %1617 = vadd.xlane.f32.xlu2 %v1616_v27  ;;  %v6976_v27 = vpop.f32.mrf.mxu2 }
 0x2b1   :  { %5353 = vpow2.f32 %v1552_v34 }
 0x2b2   :  { %5355 = vpow2.f32 %v1558_v40  ;;  %v1487_v40 = vsel %vm1417_vm0, %v6974_v60, -inf }
 0x2b3   :  { %v1435_v6 = vpop.xlane.xlu2 %1434 }
 0x2b4   :  { %v1519_v2 = vsub.f32 %v6865_v21, %v1435_v6  ;;  %v1441_v7 = vpop.xlane.xlu1 %1440  ;;  %v1493_v6 = vsel %vm1417_vm0, %v6976_v27, -inf }
 0x2b5   :  { %v1521_v57 = vsub.f32 %v6867_v62, %v1441_v7 }
 0x2b6   :  { %v6952_v49 = vpop.eup %5351  ;;  %v1556_v3 = vmul.f32 1.442695, %v1519_v2  ;;  %v6984_v2 = vpop.f32.mrf.mxu0 }
 0x2b7   :  { %v1622_v55 = vsel %vm1417_vm0, %v6952_v49, 0.0  ;;  %v6960_v22 = vpop.eup %5353  ;;  %v1560_v52 = vmul.f32 1.442695, %v1521_v57 }
 0x2b8   :  { %5357 = vpow2.f32 %v1556_v3  ;;  %1485 = vmax.xlane.f32.xlu2 %v1484_v50  ;;  %1482 = vmax.xlane.f32.xlu0 %v1481_v61  ;;  %v6962_v56 = vpop.eup %5355  ;;  %v1619_v36 = vsel %vm1417_vm0, %v6960_v22, 0.0  ;;  %v6986_v3 = vpop.f32.mrf.mxu1 }
 0x2b9   :  { %1623 = vadd.xlane.f32.xlu1 %v1622_v55  ;;  %v1628_v25 = vsel %vm1417_vm0, %v6962_v56, 0.0  ;;  %8966 = vst [vmem:[#allocation14_spill] sm:$0xff] %v6986_v3 }
 0x2bb   :  { %v1444_v21 = vpop.xlane.xlu2 %1443 }
 0x2bc   :  { %v1522_v35 = vsub.f32 %v6873_v26, %v1444_v21  ;;  %v1450_v33 = vpop.xlane.xlu1 %1449 }
 0x2bd   :  { %v1524_v20 = vsub.f32 %v6875_v10, %v1450_v33 }
 0x2be   :  { %v6964_v8 = vpop.eup %5357  ;;  %v1562_v42 = vmul.f32 1.442695, %v1522_v35 }
 0x2bf   :  { %v1625_v53 = vsel %vm1417_vm0, %v6964_v8, 0.0  ;;  %v1566_v50 = vmul.f32 1.442695, %v1524_v20 }
 0x2c0   :  { %1626 = vadd.xlane.f32.xlu2 %v1625_v53  ;;  %1620 = vadd.xlane.f32.xlu0 %v1619_v36  ;;  %5359 = vpow2.f32 %v1562_v42 }
 0x2c1   :  { %1629 = vadd.xlane.f32.xlu1 %v1628_v25  ;;  %5361 = vpow2.f32 %v1560_v52 }
 0x2c3   :  { %v1447_v26 = vpop.xlane.xlu0 %1446 }
 0x2c4   :  { %v1523_v62 = vsub.f32 %v6881_v23, %v1447_v26  ;;  %v6988_v23 = vpop.f32.mrf.mxu3  ;;  %v1453_v61 = vpop.xlane.xlu2 %1452 }
 0x2c5   :  { %v1525_v57 = vsub.f32 %v6883_v15, %v1453_v61 }
 0x2c6   :  { %v1564_v34 = vmul.f32 1.442695, %v1523_v62  ;;  %v6990_v10 = vpop.eup %5359  ;;  %v7006_v62 = vpop.f32.mrf.mxu1 }
 0x2c7   :  { %v6992_v21 = vpop.eup %5361  ;;  %v1634_v53 = vsel %vm1417_vm0, %v6990_v10, 0.0  ;;  %v1568_v52 = vmul.f32 1.442695, %v1525_v57  ;;  %8967 = vst [vmem:[#allocation13_spill] sm:$0xff] %v7006_v62 }
 0x2c8   :  { %5363 = vpow2.f32 %v1564_v34  ;;  %1488 = vmax.xlane.f32.xlu0 %v1487_v40  ;;  %1494 = vmax.xlane.f32.xlu2 %v1493_v6  ;;  %v1631_v42 = vsel %vm1417_vm0, %v6992_v21, 0.0  ;;  %v7011_v40 = vpop.f32.mrf.mxu0 }
 0x2c9   :  { %5365 = vpow2.f32 %v1566_v50 }
 0x2ca   :  { %5367 = vpow2.f32 %v1568_v52 }
 0x2cb   :  { %v1456_v7 = vpop.xlane.xlu0 %1455 }
 0x2cc   :  { %v1462_v55 = vpop.xlane.xlu1 %1461  ;;  %v1526_v25 = vsub.f32 %v6889_v28, %v1456_v7  ;;  %v7008_v20 = vpop.f32.mrf.mxu3  ;;  %v1496_v28 = vsel %vm1417_vm0, %v6988_v23, -inf }
 0x2cd   :  { %v1528_v6 = vsub.f32 %v6891_v38, %v1462_v55  ;;  %v1499_v7 = vsel %vm1417_vm0, %v7008_v20, -inf }
 0x2ce   :  { %v6994_v35 = vpop.eup %5363  ;;  %v1570_v33 = vmul.f32 1.442695, %v1526_v25  ;;  %v7026_v55 = vpop.f32.mrf.mxu1 }
 0x2cf   :  { %v1637_v36 = vsel %vm1417_vm0, %v6994_v35, 0.0  ;;  %v7004_v26 = vpop.eup %5365  ;;  %v1574_v57 = vmul.f32 1.442695, %v1528_v6  ;;  %8968 = vst [vmem:[#allocation40_spill] sm:$0xff] %v7026_v55 }
 0x2d0   :  { %1635 = vadd.xlane.f32.xlu0 %v1634_v53  ;;  %1638 = vadd.xlane.f32.xlu1 %v1637_v36  ;;  %5369 = vpow2.f32 %v1570_v33  ;;  %v1640_v61 = vsel %vm1417_vm0, %v7004_v26, 0.0  ;;  %v7022_v36 = vpop.eup %5367 }
 0x2d1   :  { %1632 = vadd.xlane.f32.xlu2 %v1631_v42  ;;  %v1643_v33 = vsel %vm1417_vm0, %v7022_v36, 0.0 }
 0x2d4   :  { %v1459_v15 = vpop.xlane.xlu1 %1458  ;;  %v1465_v25 = vpop.xlane.xlu2 %1464 }
 0x2d5   :  { %v1527_v34 = vsub.f32 %v6897_v41, %v1459_v15  ;;  %v7020_v41 = vpop.f32.mrf.mxu2  ;;  %v1529_v15 = vsub.f32 %v6899_v29, %v1465_v25 }
 0x2d6   :  { %v7024_v38 = vpop.eup %5369 }
 0x2d7   :  { %v1572_v50 = vmul.f32 1.442695, %v1527_v34  ;;  %v7034_v34 = vpop.f32.mrf.mxu0  ;;  %v1646_v6 = vsel %vm1417_vm0, %v7024_v38, 0.0 }
 0x2d8   :  { %1641 = vadd.xlane.f32.xlu0 %v1640_v61  ;;  %1497 = vmax.xlane.f32.xlu1 %v1496_v28 }
 0x2d9   :  { %5371 = vpow2.f32 %v1572_v50  ;;  %1500 = vmax.xlane.f32.xlu2 %v1499_v7  ;;  %v1576_v50 = vmul.f32 1.442695, %v1529_v15  ;;  %v1502_v15 = vsel %vm1417_vm0, %v7020_v41, -inf }
 0x2da   :  { %5373 = vpow2.f32 %v1574_v57 }
 0x2db   :  { %v1468_v53 = vpop.xlane.xlu0 %1467 }
 0x2dc   :  { %v1530_v42 = vsub.f32 %v6905_v18, %v1468_v53 }
 0x2dd   :  { %v7040_v7 = vpop.f32.mrf.mxu2 }
 0x2de   :  { %v1578_v18 = vmul.f32 1.442695, %v1530_v42  ;;  %v1505_v63 = vsel %vm1417_vm0, %v7040_v7, -inf }
 0x2df   :  { %v7029_v52 = vpop.eup %5371 }
 0x2e0   :  { %v1649_v28 = vsel %vm1417_vm0, %v7029_v52, 0.0  ;;  %1644 = vadd.xlane.f32.xlu1 %v1643_v33  ;;  %v7043_v29 = vpop.eup %5373  ;;  %5375 = vpow2.f32 %v1578_v18 }
 0x2e1   :  { %1650 = vadd.xlane.f32.xlu0 %v1649_v28  ;;  %1647 = vadd.xlane.f32.xlu2 %v1646_v6  ;;  %5377 = vpow2.f32 %v1576_v50  ;;  %v7048_v28 = vpop.f32.mrf.mxu1  ;;  %v1652_v42 = vsel %vm1417_vm0, %v7043_v29, 0.0  ;;  %v7056_v6 = vpop.f32.mrf.mxu3 }
 0x2e2   :  { %8969 = vst [vmem:[#allocation18_spill] sm:$0xff] %v7048_v28 }
 0x2e3   :  { %v1471_v61 = vpop.xlane.xlu1 %1470  ;;  %v1474_v57 = vpop.xlane.xlu0 %1473 }
 0x2e4   :  { %v1531_v53 = vsub.f32 %v6911_v12, %v1471_v61  ;;  %v1532_v33 = vsub.f32 %v6909_v31, %v1474_v57  ;;  %v7054_v12 = vpop.f32.mrf.mxu0 }
 0x2e6   :  { %v1580_v25 = vmul.f32 1.442695, %v1531_v53  ;;  %v1582_v31 = vmul.f32 1.442695, %v1532_v33  ;;  %v7058_v50 = vpop.eup %5375 }
 0x2e7   :  { %v7060_v57 = vpop.eup %5377 }
 0x2e8   :  { %1506 = vmax.xlane.f32.xlu1 %v1505_v63  ;;  %5379 = vpow2.f32 %v1580_v25  ;;  %v1658_v25 = vsel %vm1417_vm0, %v7058_v50, 0.0  ;;  %v1655_v33 = vsel %vm1417_vm0, %v7060_v57, 0.0 }
 0x2e9   :  { %1653 = vadd.xlane.f32.xlu2 %v1652_v42  ;;  %1503 = vmax.xlane.f32.xlu0 %v1502_v15  ;;  %5381 = vpow2.f32 %v1582_v31  ;;  %v7072_v15 = vpop.f32.mrf.mxu1  ;;  %v7076_v31 = vpop.f32.mrf.mxu3 }
 0x2ea   :  { %8970 = vst [vmem:[#allocation17_spill] sm:$0xff] %v7072_v15 }
 0x2eb   :  { %v1480_v18 = vpop.xlane.xlu2 %1479  ;;  %v1477_v61 = vpop.xlane.xlu1 %1476 }
 0x2ec   :  { %v1534_v53 = vsub.f32 %v6919_v30, %v1480_v18  ;;  %v1533_v63 = vsub.f32 %v6917_v32, %v1477_v61  ;;  %v7074_v28 = vpop.f32.mrf.mxu0  ;;  %v1511_v61 = vsel %vm1417_vm0, %v7076_v31, -inf }
 0x2ee   :  { %v7063_v37 = vpop.eup %5379  ;;  %v1586_v30 = vmul.f32 1.442695, %v1534_v53  ;;  %v1584_v18 = vmul.f32 1.442695, %v1533_v63 }
 0x2ef   :  { %v1661_v42 = vsel %vm1417_vm0, %v7063_v37, 0.0  ;;  %v7078_v32 = vpop.eup %5381 }
 0x2f0   :  { %1659 = vadd.xlane.f32.xlu1 %v1658_v25  ;;  %5383 = vpow2.f32 %v1586_v30  ;;  %v1664_v25 = vsel %vm1417_vm0, %v7078_v32, 0.0 }
 0x2f1   :  { %1662 = vadd.xlane.f32.xlu2 %v1661_v42  ;;  %1656 = vadd.xlane.f32.xlu0 %v1655_v33  ;;  %5385 = vpow2.f32 %v1584_v18  ;;  %v1508_v42 = vsel %vm1417_vm0, %v7056_v6, -inf  ;;  %v7088_v63 = vpop.f32.mrf.mxu1 }
 0x2f2   :  { %8971 = vst [vmem:[#allocation20_spill] sm:$0xff] %v7088_v63 }
 0x2f4   :  { %v7092_v30 = vpop.f32.mrf.mxu0 }
 0x2f6   :  { %v7086_v53 = vpop.eup %5383 }
 0x2f7   :  { %v7090_v33 = vpop.eup %5385  ;;  %v1670_v18 = vsel %vm1417_vm0, %v7086_v53, 0.0 }
 0x2f8   :  { %1512 = vmax.xlane.f32.xlu1 %v1511_v61  ;;  %v1667_v15 = vsel %vm1417_vm0, %v7090_v33, 0.0 }
 0x2f9   :  { %1665 = vadd.xlane.f32.xlu2 %v1664_v25  ;;  %1509 = vmax.xlane.f32.xlu0 %v1508_v42  ;;  %v7098_v55 = vpop.f32.mrf.mxu1 }
 0x2fa   :  { %8972 = vst [vmem:[#allocation19_spill] sm:$0xff] %v7098_v55 }
 0x2fc   :  { %v7100_v61 = vpop.f32.mrf.mxu0 }
 0x300   :  { %1671 = vadd.xlane.f32.xlu1 %v1670_v18 }
 0x301   :  { %1668 = vadd.xlane.f32.xlu0 %v1667_v15  ;;  %v7102_v25 = vpop.f32.mrf.mxu1  ;;  %v1492_v15 = vpop.xlane.xlu1 %1491 }
 0x302   :  { %8973 = vst [vmem:[#allocation59_spill] sm:$0xff] %v7102_v25  ;;  %v1538_v43 = vsub.f32 %v6927_v16, %v1492_v15 }
 0x304   :  { %v7104_v42 = vpop.f32.mrf.mxu0 }
 0x309   :  { %v7106_v63 = vpop.f32.mrf.mxu1 }
 0x30a   :  { %8974 = vst [vmem:[#allocation57_spill] sm:$0xff] %v7106_v63 }
 0x30c   :  { %v7108_v3 = vpop.f32.mrf.mxu0 }
 0x311   :  { %v7110_v51 = vpop.f32.mrf.mxu1 }
 0x312   :  { %8975 = vst [vmem:[#allocation38_spill] sm:$0xff] %v7110_v51 }
 0x314   :  { %v7112_v18 = vpop.f32.mrf.mxu0 }
 0x319   :  { %v7118_v17 = vpop.f32.mrf.mxu1 }
 0x31a   :  { %8976 = vst [vmem:[#allocation36_spill] sm:$0xff] %v7118_v17 }
 0x31b   :  { %v1612_v62 = vpop.xlane.xlu2 %1611 }
 0x31c   :  { %5387 = vrcp.f32 %v1612_v62 }
 0x322   :  { %v5388_v45 = vpop.eup %5387 }
 0x323   :  { %v1615_v54 = vpop.xlane.xlu0 %1614  ;;  %v1618_v1 = vpop.xlane.xlu2 %1617  ;;  %v1738_v55 = vmul.f32 %v5388_v45, %v6934_v0 }
 0x324   :  { %5389 = vrcp.f32 %v1615_v54 }
 0x325   :  { %v1770_v19 = vpack.c.bf16 %v1738_v55, %v1738_v55  ;;  %v7121_v55 = vpop.f32.mrf.mxu0 }
 0x327   :  { %v1804_v45 = vunpack.c.l.b16 %v1770_v19  ;;  %v7134_v19 = vpop.f32.mrf.mxu1 }
 0x328   :  { %8980 = vst [vmem:[#allocation24_spill] sm:$0xff] %v7134_v19 }
 0x32a   :  { %v5390_v25 = vpop.eup %5389 }
 0x32b   :  { %v1739_v9 = vmul.f32 %v5390_v25, %v6941_v11  ;;  %v1486_v63 = vpop.xlane.xlu2 %1485  ;;  %v1483_v59 = vpop.xlane.xlu0 %1482 }
 0x32c   :  { %v1536_v44 = vsub.f32 %v6949_v13, %v1486_v63  ;;  %v1535_v62 = vsub.f32 %v6925_v47, %v1483_v59  ;;  %v1624_v14 = vpop.xlane.xlu1 %1623  ;;  %v1594_v13 = vmul.f32 1.442695, %v1538_v43  ;;  %v8978_v63 = vld [vmem:[#allocation54_spill] sm:$0xff] }
 0x32d   :  { %v1771_v39 = vpack.c.bf16 %v1739_v9, %v1739_v9  ;;  %5391 = vrcp.f32 %v1624_v14 }
 0x32e   :  { %v1590_v51 = vmul.f32 1.442695, %v1536_v44  ;;  %v1588_v54 = vmul.f32 1.442695, %v1535_v62  ;;  %5393 = vrcp.f32 %v1618_v1  ;;  %v8977_v44 = vld [vmem:[#allocation55_spill] sm:$0xff] }
 0x32f   :  { %v1805_v0 = vunpack.c.l.b16 %v1771_v39  ;;  %v8979_v14 = vpack.c.b16 %v8977_v44, %v8978_v63 }
 0x330   :  { %5395 = vpow2.f32 %v1590_v51 }
 0x331   :  { %v1806_v11 = vpack.c.b16 %v1805_v0, %v1804_v45  ;;  %5397 = vpow2.f32 %v1588_v54  ;;  %v7139_v54 = vpop.f32.mrf.mxu0 }
 0x333   :  { %5165 = vmatmul.msk.bf16.vlgmr.msra.gmra.mxu2 %vm1417_vm0, %v1806_v11  ;;  %v1627_v59 = vpop.xlane.xlu2 %1626  ;;  %v1621_v9 = vpop.xlane.xlu0 %1620 }
 0x334   :  { %v5392_v47 = vpop.eup %5391  ;;  %5399 = vrcp.f32 %v1627_v59  ;;  %1935 = vmatpush.bf16.msra.mxu2 %v8979_v14  ;;  %v1630_v45 = vpop.xlane.xlu1 %1629 }
 0x335   :  { %v5394_v16 = vpop.eup %5393  ;;  %5401 = vrcp.f32 %v1621_v9  ;;  %v1742_v51 = vmul.f32 %v5392_v47, %v6952_v49 }
 0x336   :  { %v7127_v39 = vpop.eup %5395  ;;  %5403 = vpow2.f32 %v1594_v13  ;;  %v1740_v25 = vmul.f32 %v5394_v16, %v6938_v48 }
 0x337   :  { %v7129_v1 = vpop.eup %5397  ;;  %v1676_v43 = vsel %vm1417_vm0, %v7127_v39, 0.0  ;;  %v1774_v11 = vpack.c.bf16 %v1742_v51, %v1742_v51  ;;  %5405 = vrcp.f32 %v1630_v45 }
 0x338   :  { %v1673_v15 = vsel %vm1417_vm0, %v7129_v1, 0.0  ;;  %1677 = vadd.xlane.f32.xlu0 %v1676_v43  ;;  %v1772_v9 = vpack.c.bf16 %v1740_v25, %v1740_v25 }
 0x339   :  { %1674 = vadd.xlane.f32.xlu2 %v1673_v15  ;;  %v1860_v19 = vunpack.c.l.b16 %v1774_v11 }
 0x33a   :  { %v5400_v62 = vpop.eup %5399  ;;  %v1832_v51 = vunpack.c.l.b16 %v1772_v9 }
 0x33b   :  { %v5402_v0 = vpop.eup %5401  ;;  %v1743_v49 = vmul.f32 %v5400_v62, %v6964_v8  ;;  %v1489_v13 = vpop.xlane.xlu0 %1488  ;;  %v8982_v62 = vld [vmem:[#allocation29_spill] sm:$0xff] }
 0x33c   :  { %v1495_v59 = vpop.xlane.xlu2 %1494  ;;  %v1741_v47 = vmul.f32 %v5402_v0, %v6960_v22  ;;  %v1537_v48 = vsub.f32 %v6974_v60, %v1489_v13  ;;  %v7145_v63 = vpop.eup %5403  ;;  %v777_v0 = vadd.f32 %v6984_v2, %v8982_v62  ;;  %v779_v45 = vadd.f32 %v7011_v40, %v8982_v62  ;;  %v8986_v2 = vld [vmem:[#allocation58_spill] sm:$0xff] }
 0x33d   :  { %v1539_v44 = vsub.f32 %v6976_v27, %v1495_v59  ;;  %v1775_v14 = vpack.c.bf16 %v1743_v49, %v1743_v49  ;;  %v1682_v25 = vsel %vm1417_vm0, %v7145_v63, 0.0  ;;  %v7149_v60 = vpop.f32.mrf.mxu1  ;;  %v5406_v9 = vpop.eup %5405  ;;  %v772_v40 = vadd.f32 %v6775_v5, %v8982_v62 }
 0x33e   :  { %v1773_v16 = vpack.c.bf16 %v1741_v47, %v1741_v47  ;;  %v1592_v43 = vmul.f32 1.442695, %v1537_v48  ;;  %8981 = vst [vmem:[#allocation23_spill] sm:$0xff] %v7149_v60  ;;  %v7160_v47 = vpop.f32.mrf.mxu0  ;;  %v8987_v48 = vld [vmem:[#allocation56_spill] sm:$0xff] }
 0x33f   :  { %v1596_v15 = vmul.f32 1.442695, %v1539_v44  ;;  %v1861_v17 = vunpack.c.l.b16 %v1775_v14  ;;  %v8988_v44 = vpack.c.b16 %v8986_v2, %v8987_v48  ;;  %v983_v5 = vpack.c.bf16 %v772_v40, %v772_v40 }
 0x340   :  { %v1833_v8 = vunpack.c.l.b16 %v1773_v16  ;;  %5407 = vpow2.f32 %v1592_v43  ;;  %v774_v16 = vadd.f32 %v6782_v58, %v8982_v62 }
 0x341   :  { %v1862_v22 = vpack.c.b16 %v1861_v17, %v1860_v19  ;;  %5409 = vpow2.f32 %v1596_v15  ;;  %1683 = vadd.xlane.f32.xlu2 %v1682_v25  ;;  %v8983_v17 = vld [vmem:[#allocation61_spill] sm:$0xff]  ;;  %v8984_v19 = vld [vmem:[#allocation60_spill] sm:$0xff]  ;;  %v985_v15 = vpack.c.bf16 %v777_v0, %v777_v0  ;;  %v1744_v25 = vmul.f32 %v5406_v9, %v6962_v56 }
 0x342   :  { %v1834_v27 = vpack.c.b16 %v1833_v8, %v1832_v51  ;;  %v8985_v59 = vpack.c.b16 %v8983_v17, %v8984_v19  ;;  %v986_v8 = vpack.c.bf16 %v779_v45, %v779_v45 }
 0x343   :  { %v1636_v49 = vpop.xlane.xlu0 %1635  ;;  %5167 = vmatmul.msk.bf16.vlgmr.msrb.gmra.mxu2 %vm1417_vm0, %v1862_v22  ;;  %v1639_v11 = vpop.xlane.xlu1 %1638  ;;  %v2033_v58 = vunpack.c.l.b16 %v985_v15  ;;  %v1776_v45 = vpack.c.bf16 %v1744_v25, %v1744_v25  ;;  %v2005_v15 = vunpack.c.l.b16 %v983_v5  ;;  %v782_v5 = vadd.f32 %v7034_v34, %v8982_v62 }
 0x344   :  { %5166 = vmatmul.msk.bf16.vlgmr.msra.gmra.mxu3 %vm1417_vm0, %v1834_v27  ;;  %5411 = vrcp.f32 %v1636_v49  ;;  %v1633_v13 = vpop.xlane.xlu2 %1632  ;;  %1991 = vmatpush.bf16.msrb.mxu2 %v8985_v59  ;;  %v984_v49 = vpack.c.bf16 %v774_v16, %v774_v16  ;;  %v2034_v59 = vunpack.c.l.b16 %v986_v8  ;;  %v789_v34 = vadd.f32 %v7092_v30, %v8982_v62 }
 0x345   :  { %5413 = vrcp.f32 %v1639_v11  ;;  %1963 = vmatpush.bf16.msra.mxu3 %v8988_v44  ;;  %v7179_v2 = vpop.f32.mrf.mxu1 }
 0x346   :  { %v7165_v14 = vpop.eup %5407  ;;  %5415 = vrcp.f32 %v1633_v13  ;;  %8989 = vst [vmem:[#allocation44_spill] sm:$0xff] %v7179_v2 }
 0x347   :  { %v7171_v43 = vpop.eup %5409  ;;  %v1679_v51 = vsel %vm1417_vm0, %v7165_v14, 0.0 }
 0x348   :  { %v1685_v22 = vsel %vm1417_vm0, %v7171_v43, 0.0  ;;  %1680 = vadd.xlane.f32.xlu1 %v1679_v51 }
 0x349   :  { %1686 = vadd.xlane.f32.xlu0 %v1685_v22 }
 0x34a   :  { %v5412_v27 = vpop.eup %5411 }
 0x34b   :  { %v5414_v11 = vpop.eup %5413  ;;  %v1746_v13 = vmul.f32 %v5412_v27, %v6990_v10  ;;  %v1642_v17 = vpop.xlane.xlu0 %1641  ;;  %v2006_v10 = vunpack.c.l.b16 %v984_v49  ;;  %v784_v49 = vadd.f32 %v7054_v12, %v8982_v62 }
 0x34c   :  { %v1498_v0 = vpop.xlane.xlu1 %1497  ;;  %v5416_v19 = vpop.eup %5415  ;;  %v1747_v56 = vmul.f32 %v5414_v11, %v6994_v35  ;;  %5417 = vrcp.f32 %v1642_v17  ;;  %v2035_v35 = vpack.c.b16 %v2034_v59, %v2033_v58  ;;  %v787_v58 = vadd.f32 %v7074_v28, %v8982_v62 }
 0x34d   :  { %v1540_v9 = vsub.f32 %v6988_v23, %v1498_v0  ;;  %v1501_v48 = vpop.xlane.xlu2 %1500  ;;  %v1778_v44 = vpack.c.bf16 %v1746_v13, %v1746_v13  ;;  %v1745_v40 = vmul.f32 %v5416_v19, %v6992_v21  ;;  %v7185_v27 = vpop.f32.mrf.mxu0  ;;  %v1888_v23 = vunpack.c.l.b16 %v1776_v45 }
 0x34e   :  { %v1541_v16 = vsub.f32 %v7008_v20, %v1501_v48  ;;  %v1779_v51 = vpack.c.bf16 %v1747_v56, %v1747_v56  ;;  %v2007_v13 = vpack.c.b16 %v2006_v10, %v2005_v15  ;;  %v7199_v59 = vpop.f32.mrf.mxu1  ;;  %v987_v45 = vpack.c.bf16 %v782_v5, %v782_v5 }
 0x34f   :  { %v1598_v22 = vmul.f32 1.442695, %v1540_v9  ;;  %v1916_v8 = vunpack.c.l.b16 %v1778_v44  ;;  %v1777_v2 = vpack.c.bf16 %v1745_v40, %v1745_v40  ;;  %v988_v9 = vpack.c.bf16 %v784_v49, %v784_v49 }
 0x350   :  { %v1600_v25 = vmul.f32 1.442695, %v1541_v16  ;;  %v1917_v60 = vunpack.c.l.b16 %v1779_v51  ;;  %v989_v44 = vpack.c.bf16 %v787_v58, %v787_v58  ;;  %v990_v16 = vpack.c.bf16 %v789_v34, %v789_v34 }
 0x351   :  { %5419 = vpow2.f32 %v1598_v22  ;;  %v1889_v11 = vunpack.c.l.b16 %v1777_v2 }
 0x352   :  { %5421 = vpow2.f32 %v1600_v25  ;;  %v1918_v21 = vpack.c.b16 %v1917_v60, %v1916_v8  ;;  %v5418_v17 = vpop.eup %5417  ;;  %v2061_v8 = vunpack.c.l.b16 %v987_v45  ;;  %v2062_v25 = vunpack.c.l.b16 %v988_v9 }
 0x353   :  { %v1890_v0 = vpack.c.b16 %v1889_v11, %v1888_v23  ;;  %v1748_v12 = vmul.f32 %v5418_v17, %v7004_v26  ;;  %v2090_v5 = vunpack.c.l.b16 %v990_v16  ;;  %v797_v16 = vadd.f32 %v7108_v3, %v8982_v62 }
 0x354   :  { %v1645_v20 = vpop.xlane.xlu1 %1644  ;;  %v1651_v19 = vpop.xlane.xlu0 %1650  ;;  %5169 = vmatmul.msk.bf16.vlgmr.msra.gmra.mxu2 %vm1417_vm0, %v1918_v21  ;;  %v2089_v21 = vunpack.c.l.b16 %v989_v44  ;;  %v2063_v45 = vpack.c.b16 %v2062_v25, %v2061_v8 }
 0x355   :  { %5423 = vrcp.f32 %v1645_v20  ;;  %v1648_v56 = vpop.xlane.xlu2 %1647  ;;  %5168 = vmatmul.msk.bf16.vlgmr.msrb.gmra.mxu3 %vm1417_vm0, %v1890_v0  ;;  %2047 = vmatpush.bf16.msra.mxu2 %v2035_v35  ;;  %v7208_v40 = vpop.f32.mrf.mxu0  ;;  %v1780_v26 = vpack.c.bf16 %v1748_v12, %v1748_v12  ;;  %v993_v25 = vpack.c.bf16 %v797_v16, %v797_v16 }
 0x356   :  { %5425 = vrcp.f32 %v1651_v19  ;;  %2019 = vmatpush.bf16.msrb.mxu3 %v2007_v13  ;;  %v7215_v12 = vpop.f32.mrf.mxu1  ;;  %v2091_v9 = vpack.c.b16 %v2090_v5, %v2089_v21 }
 0x357   :  { %v7195_v60 = vpop.eup %5419  ;;  %5427 = vrcp.f32 %v1648_v56  ;;  %v1944_v49 = vunpack.c.l.b16 %v1780_v26 }
 0x358   :  { %v7202_v2 = vpop.eup %5421  ;;  %v1688_v28 = vsel %vm1417_vm0, %v7195_v60, 0.0 }
 0x359   :  { %v1691_v48 = vsel %vm1417_vm0, %v7202_v2, 0.0  ;;  %1689 = vadd.xlane.f32.xlu1 %v1688_v28 }
 0x35a   :  { %1692 = vadd.xlane.f32.xlu2 %v1691_v48 }
 0x35b   :  { %v5424_v30 = vpop.eup %5423 }
 0x35c   :  { %v5426_v15 = vpop.eup %5425  ;;  %v1749_v10 = vmul.f32 %v5424_v30, %v7022_v36  ;;  %v1507_v51 = vpop.xlane.xlu1 %1506  ;;  %v794_v30 = vadd.f32 %v7104_v42, %v8982_v62 }
 0x35d   :  { %v5428_v22 = vpop.eup %5427  ;;  %v1751_v35 = vmul.f32 %v5426_v15, %v7029_v52  ;;  %v1654_v23 = vpop.xlane.xlu2 %1653  ;;  %v1543_v13 = vsub.f32 %v7040_v7, %v1507_v51  ;;  %v799_v51 = vadd.f32 %v7112_v18, %v8982_v62 }
 0x35e   :  { %v1504_v11 = vpop.xlane.xlu0 %1503  ;;  %v1781_v17 = vpack.c.bf16 %v1749_v10, %v1749_v10  ;;  %v1750_v0 = vmul.f32 %v5428_v22, %v7024_v38  ;;  %5429 = vrcp.f32 %v1654_v23  ;;  %v7219_v38 = vpop.f32.mrf.mxu0  ;;  %v992_v8 = vpack.c.bf16 %v794_v30, %v794_v30 }
 0x35f   :  { %v1542_v20 = vsub.f32 %v7020_v41, %v1504_v11  ;;  %v1783_v19 = vpack.c.bf16 %v1751_v35, %v1751_v35  ;;  %v1604_v36 = vmul.f32 1.442695, %v1543_v13  ;;  %v792_v41 = vadd.f32 %v7100_v61, %v8982_v62  ;;  %v7238_v13 = vpop.f32.mrf.mxu1 }
 0x360   :  { %v1945_v56 = vunpack.c.l.b16 %v1781_v17  ;;  %v1782_v58 = vpack.c.bf16 %v1750_v0, %v1750_v0  ;;  %v994_v18 = vpack.c.bf16 %v799_v51, %v799_v51 }
 0x361   :  { %v1602_v34 = vmul.f32 1.442695, %v1542_v20  ;;  %v1973_v52 = vunpack.c.l.b16 %v1783_v19  ;;  %5431 = vpow2.f32 %v1604_v36  ;;  %v991_v3 = vpack.c.bf16 %v792_v41, %v792_v41 }
 0x362   :  { %v1946_v28 = vpack.c.b16 %v1945_v56, %v1944_v49  ;;  %v1972_v7 = vunpack.c.l.b16 %v1782_v58  ;;  %v2118_v49 = vunpack.c.l.b16 %v992_v8  ;;  %v2145_v19 = vunpack.c.l.b16 %v993_v25 }
 0x363   :  { %5433 = vpow2.f32 %v1602_v34  ;;  %v2117_v17 = vunpack.c.l.b16 %v991_v3 }
 0x364   :  { %v1974_v48 = vpack.c.b16 %v1973_v52, %v1972_v7  ;;  %v1660_v44 = vpop.xlane.xlu1 %1659  ;;  %v5430_v10 = vpop.eup %5429 }
 0x365   :  { %v1663_v26 = vpop.xlane.xlu2 %1662  ;;  %5435 = vrcp.f32 %v1660_v44  ;;  %5170 = vmatmul.msk.bf16.vlgmr.msra.gmra.mxu3 %vm1417_vm0, %v1946_v28  ;;  %v1752_v23 = vmul.f32 %v5430_v10, %v7043_v29 }
 0x366   :  { %v1657_v15 = vpop.xlane.xlu0 %1656  ;;  %5171 = vmatmul.msk.bf16.vlgmr.msrb.gmra.mxu2 %vm1417_vm0, %v1974_v48  ;;  %5437 = vrcp.f32 %v1663_v26  ;;  %2075 = vmatpush.bf16.msra.mxu3 %v2063_v45  ;;  %v7243_v29 = vpop.f32.mrf.mxu0 }
 0x367   :  { %v7227_v61 = vpop.eup %5431  ;;  %5439 = vrcp.f32 %v1657_v15  ;;  %2103 = vmatpush.bf16.msrb.mxu2 %v2091_v9  ;;  %v1784_v52 = vpack.c.bf16 %v1752_v23, %v1752_v23  ;;  %v2146_v9 = vunpack.c.l.b16 %v994_v18  ;;  %v2794_v48 = vsel %vm1417_vm0, %v7243_v29, -inf  ;;  %v7249_v51 = vpop.f32.mrf.mxu1 }
 0x368   :  { %v1697_v22 = vsel %vm1417_vm0, %v7227_v61, 0.0  ;;  %v2803_v8 = vsel %vm1417_vm0, %v7249_v51, -inf  ;;  %v804_v23 = vadd.f32 %v7139_v54, %v8982_v62 }
 0x369   :  { %v7231_v42 = vpop.eup %5433  ;;  %1698 = vadd.xlane.f32.xlu1 %v1697_v22  ;;  %v2147_v15 = vpack.c.b16 %v2146_v9, %v2145_v19 }
 0x36a   :  { %v1694_v35 = vsel %vm1417_vm0, %v7231_v42, 0.0 }
 0x36b   :  { %1695 = vadd.xlane.f32.xlu0 %v1694_v35  ;;  %v5436_v11 = vpop.eup %5435  ;;  %v802_v35 = vadd.f32 %v7121_v55, %v8982_v62  ;;  %v996_v55 = vpack.c.bf16 %v804_v23, %v804_v23  ;;  %v812_v23 = vadd.f32 %v7208_v40, %v8982_v62 }
 0x36c   :  { %v5438_v21 = vpop.eup %5437  ;;  %v1754_v0 = vmul.f32 %v5436_v11, %v7058_v50  ;;  %v1513_v20 = vpop.xlane.xlu1 %1512 }
 0x36d   :  { %v5440_v5 = vpop.eup %5439  ;;  %v1755_v36 = vmul.f32 %v5438_v21, %v7063_v37  ;;  %v1666_v56 = vpop.xlane.xlu2 %1665  ;;  %v1545_v34 = vsub.f32 %v7076_v31, %v1513_v20  ;;  %v2000_v31 = vunpack.c.l.b16 %v1784_v52  ;;  %v2174_v19 = vunpack.c.l.b16 %v996_v55 }
 0x36e   :  { %v1510_v58 = vpop.xlane.xlu0 %1509  ;;  %v1753_v28 = vmul.f32 %v5440_v5, %v7060_v57  ;;  %v1786_v7 = vpack.c.bf16 %v1754_v0, %v1754_v0  ;;  %5441 = vrcp.f32 %v1666_v56  ;;  %v2119_v57 = vpack.c.b16 %v2118_v49, %v2117_v17  ;;  %v7269_v56 = vpop.f32.mrf.mxu0 }
 0x36f   :  { %v1544_v45 = vsub.f32 %v7056_v6, %v1510_v58  ;;  %v1787_v50 = vpack.c.bf16 %v1755_v36, %v1755_v36  ;;  %v1608_v41 = vmul.f32 1.442695, %v1545_v34  ;;  %v995_v0 = vpack.c.bf16 %v802_v35, %v802_v35 }
 0x370   :  { %v1785_v44 = vpack.c.bf16 %v1753_v28, %v1753_v28  ;;  %v2028_v37 = vunpack.c.l.b16 %v1786_v7  ;;  %v2797_v52 = vsel %vm1417_vm0, %v7269_v56, -inf  ;;  %v999_v55 = vpack.c.bf16 %v812_v23, %v812_v23  ;;  %v8993_v23 = vld [vmem:[#allocation53_spill] sm:$0xff] }
 0x371   :  { %v1606_v30 = vmul.f32 1.442695, %v1544_v45  ;;  %v2029_v16 = vunpack.c.l.b16 %v1787_v50  ;;  %5443 = vpow2.f32 %v1608_v41  ;;  %2795 = vmax.xlane.f32.xlu1 %v2794_v48  ;;  %v2173_v49 = vunpack.c.l.b16 %v995_v0 }
 0x372   :  { %v2001_v26 = vunpack.c.l.b16 %v1785_v44  ;;  %v807_v50 = vadd.f32 %v7160_v47, %v8982_v62  ;;  %v809_v41 = vadd.f32 %v7185_v27, %v8982_v62 }
 0x373   :  { %5445 = vpow2.f32 %v1606_v30  ;;  %v2030_v10 = vpack.c.b16 %v2029_v16, %v2028_v37  ;;  %v2175_v28 = vpack.c.b16 %v2174_v19, %v2173_v49 }
 0x374   :  { %v2002_v6 = vpack.c.b16 %v2001_v26, %v2000_v31  ;;  %v5442_v22 = vpop.eup %5441  ;;  %v997_v44 = vpack.c.bf16 %v807_v50, %v807_v50  ;;  %v998_v37 = vpack.c.bf16 %v809_v41, %v809_v41 }
 0x375   :  { %v1756_v21 = vmul.f32 %v5442_v22, %v7078_v32  ;;  %v2800_v32 = vsel %vm1417_vm0, %v7238_v13, -inf }
 0x376   :  { %v1669_v3 = vpop.xlane.xlu0 %1668  ;;  %5172 = vmatmul.msk.bf16.vlgmr.msrb.gmra.mxu3 %vm1417_vm0, %v2002_v6  ;;  %5173 = vmatmul.msk.bf16.vlgmr.msra.gmra.mxu2 %vm1417_vm0, %v2030_v10  ;;  %v2202_v10 = vunpack.c.l.b16 %v998_v37 }
 0x377   :  { %5447 = vrcp.f32 %v1669_v3  ;;  %v7255_v25 = vpop.eup %5443  ;;  %2159 = vmatpush.bf16.msra.mxu2 %v2147_v15  ;;  %2131 = vmatpush.bf16.msrb.mxu3 %v2119_v57  ;;  %v1788_v5 = vpack.c.bf16 %v1756_v21, %v1756_v21  ;;  %v2201_v15 = vunpack.c.l.b16 %v997_v44 }
 0x378   :  { %v1703_v18 = vsel %vm1417_vm0, %v7255_v25, 0.0 }
 0x379   :  { %v7261_v11 = vpop.eup %5445  ;;  %1704 = vadd.xlane.f32.xlu0 %v1703_v18  ;;  %2804 = vmax.xlane.f32.xlu1 %v2803_v8  ;;  %v2056_v58 = vunpack.c.l.b16 %v1788_v5  ;;  %v2203_v22 = vpack.c.b16 %v2202_v10, %v2201_v15 }
 0x37a   :  { %v1700_v17 = vsel %vm1417_vm0, %v7261_v11, 0.0 }
 0x37b   :  { %1701 = vadd.xlane.f32.xlu2 %v1700_v17 }
 0x37d   :  { %v5448_v20 = vpop.eup %5447 }
 0x37e   :  { %v1757_v54 = vmul.f32 %v5448_v20, %v7090_v33  ;;  %v1672_v33 = vpop.xlane.xlu1 %1671 }
 0x37f   :  { %5449 = vrcp.f32 %v1672_v33 }
 0x380   :  { %v1789_v36 = vpack.c.bf16 %v1757_v54, %v1757_v54 }
 0x381   :  { %2801 = vmax.xlane.f32.xlu0 %v2800_v32 }
 0x382   :  { %v2057_v34 = vunpack.c.l.b16 %v1789_v36 }
 0x383   :  { %2798 = vmax.xlane.f32.xlu2 %v2797_v52 }
 0x384   :  { %v2058_v7 = vpack.c.b16 %v2057_v34, %v2056_v58 }
 0x385   :  { %v5450_v9 = vpop.eup %5449 }
 0x386   :  { %5174 = vmatmul.msk.bf16.vlgmr.msra.gmra.mxu3 %vm1417_vm0, %v2058_v7  ;;  %v1758_v48 = vmul.f32 %v5450_v9, %v7086_v53 }
 0x387   :  { %2187 = vmatpush.bf16.msra.mxu3 %v2175_v28 }
 0x388   :  { %v1790_v31 = vpack.c.bf16 %v1758_v48, %v1758_v48  ;;  %v8991_v48 = vld [vmem:[#allocation46_spill] sm:$0xff] }
 0x38a   :  { %v2084_v47 = vunpack.c.l.b16 %v1790_v31 }
 0x3ab   :  { %v1678_v16 = vpop.xlane.xlu0 %1677 }
 0x3ac   :  { %v1675_v45 = vpop.xlane.xlu2 %1674 }
 0x3ad   :  { %5451 = vrcp.f32 %v1675_v45 }
 0x3ae   :  { %5453 = vrcp.f32 %v1678_v16 }
 0x3b3   :  { %v5452_v30 = vpop.eup %5451 }
 0x3b4   :  { %v1759_v26 = vmul.f32 %v5452_v30, %v7129_v1  ;;  %v1684_v57 = vpop.xlane.xlu2 %1683  ;;  %v5454_v35 = vpop.eup %5453  ;;  %v814_v1 = vadd.f32 %v7219_v38, %v8982_v62  ;;  %v2229_v38 = vunpack.c.l.b16 %v999_v55 }
 0x3b5   :  { %5455 = vrcp.f32 %v1684_v57  ;;  %v1760_v0 = vmul.f32 %v5454_v35, %v7127_v39 }
 0x3b6   :  { %v1791_v6 = vpack.c.bf16 %v1759_v26, %v1759_v26  ;;  %v7282_v3 = vpop.f32.mrf.mxu2  ;;  %v1000_v20 = vpack.c.bf16 %v814_v1, %v814_v1  ;;  %v8994_v1 = vld [vmem:[#allocation52_spill] sm:$0xff] }
 0x3b7   :  { %v1792_v49 = vpack.c.bf16 %v1760_v0, %v1760_v0 }
 0x3b8   :  { %v2085_v27 = vunpack.c.l.b16 %v1791_v6  ;;  %v2230_v19 = vunpack.c.l.b16 %v1000_v20 }
 0x3b9   :  { %v2112_v28 = vunpack.c.l.b16 %v1792_v49 }
 0x3ba   :  { %v2086_v8 = vpack.c.b16 %v2085_v27, %v2084_v47  ;;  %v2231_v33 = vpack.c.b16 %v2230_v19, %v2229_v38 }
 0x3bb   :  { %v1681_v53 = vpop.xlane.xlu1 %1680  ;;  %v5456_v21 = vpop.eup %5455 }
 0x3bc   :  { %v1687_v18 = vpop.xlane.xlu0 %1686  ;;  %5175 = vmatmul.msk.bf16.vlgmr.msrb.gmra.mxu2 %vm1417_vm0, %v2086_v8  ;;  %5457 = vrcp.f32 %v1681_v53  ;;  %v1762_v5 = vmul.f32 %v5456_v21, %v7145_v63 }
 0x3bd   :  { %5459 = vrcp.f32 %v1687_v18  ;;  %2215 = vmatpush.bf16.msrb.mxu2 %v2203_v22 }
 0x3be   :  { %v7289_v17 = vpop.f32.mrf.mxu2  ;;  %v1794_v36 = vpack.c.bf16 %v1762_v5, %v1762_v5 }
 0x3c0   :  { %v2140_v63 = vunpack.c.l.b16 %v1794_v36 }
 0x3c2   :  { %v5458_v54 = vpop.eup %5457 }
 0x3c3   :  { %v5460_v40 = vpop.eup %5459  ;;  %v1761_v62 = vmul.f32 %v5458_v54, %v7165_v14 }
 0x3c4   :  { %v1763_v32 = vmul.f32 %v5460_v40, %v7171_v43  ;;  %v8990_v43 = vld [vmem:[#allocation47_spill] sm:$0xff] }
 0x3c5   :  { %v1793_v58 = vpack.c.bf16 %v1761_v62, %v1761_v62  ;;  %v8992_v44 = vpack.c.b16 %v8990_v43, %v8991_v48 }
 0x3c6   :  { %v1795_v34 = vpack.c.bf16 %v1763_v32, %v1763_v32  ;;  %v7295_v52 = vpop.f32.mrf.mxu2 }
 0x3c7   :  { %v2113_v39 = vunpack.c.l.b16 %v1793_v58  ;;  %v7297_v7 = vpop.f32.mrf.mxu3  ;;  %v8996_v58 = vld [vmem:[#allocation63_spill] sm:$0xff] }
 0x3c8   :  { %v2141_v45 = vunpack.c.l.b16 %v1795_v34  ;;  %v8997_v34 = vld [vmem:[#allocation62_spill] sm:$0xff] }
 0x3c9   :  { %v2114_v9 = vpack.c.b16 %v2113_v39, %v2112_v28 }
 0x3ca   :  { %v2142_v50 = vpack.c.b16 %v2141_v45, %v2140_v63 }
 0x3cb   :  { %5176 = vmatmul.msk.bf16.vlgmr.msrb.gmra.mxu3 %vm1417_vm0, %v2114_v9 }
 0x3cc   :  { %v1690_v14 = vpop.xlane.xlu1 %1689  ;;  %5177 = vmatmul.msk.bf16.vlgmr.msra.gmra.mxu2 %vm1417_vm0, %v2142_v50  ;;  %2243 = vmatpush.bf16.msrb.mxu3 %v2231_v33 }
 0x3cd   :  { %v1693_v41 = vpop.xlane.xlu2 %1692  ;;  %5461 = vrcp.f32 %v1690_v14  ;;  %2449 = vmatpush.bf16.xpose.msra.mxu2 %v8992_v44 }
 0x3ce   :  { %5463 = vrcp.f32 %v1693_v41  ;;  %v7304_v37 = vpop.f32.mrf.mxu2 }
 0x3cf   :  { %v7306_v30 = vpop.f32.mrf.mxu3 }
 0x3d3   :  { %v5462_v16 = vpop.eup %5461 }
 0x3d4   :  { %v5464_v31 = vpop.eup %5463  ;;  %v1764_v26 = vmul.f32 %v5462_v16, %v7195_v60  ;;  %v8995_v60 = vpack.c.b16 %v8993_v23, %v8994_v1  ;;  %v8999_v16 = vld [vmem:[#allocation3_spill] sm:$0xff] }
 0x3d5   :  { %v1765_v57 = vmul.f32 %v5464_v31, %v7202_v2  ;;  %v9000_v31 = vld [vmem:[#allocation2_spill] sm:$0xff]  ;;  %v9008_v1 = vld [vmem:[#allocation67_spill] sm:$0xff] }
 0x3d6   :  { %v1796_v15 = vpack.c.bf16 %v1764_v26, %v1764_v26  ;;  %v9001_v26 = vpack.c.b16 %v8999_v16, %v9000_v31  ;;  %v9017_v16 = vld [vmem:[#allocation16_spill] sm:$0xff] }
 0x3d7   :  { %v1797_v10 = vpack.c.bf16 %v1765_v57, %v1765_v57  ;;  %v7310_v47 = vpop.f32.mrf.mxu2  ;;  %v9002_v57 = vpack.c.b16 %v6687_v4, %v6685_v24  ;;  %v9009_v24 = vld [vmem:[#allocation10_spill] sm:$0xff] }
 0x3d8   :  { %v2168_v6 = vunpack.c.l.b16 %v1796_v15  ;;  %v7312_v22 = vpop.f32.mrf.mxu3  ;;  %v9005_v15 = vld [vmem:[#allocation35_spill] sm:$0xff] }
 0x3d9   :  { %v2169_v27 = vunpack.c.l.b16 %v1797_v10  ;;  %v9006_v10 = vld [vmem:[#allocation68_spill] sm:$0xff]  ;;  %v718_v4 = vadd.f32 %v9009_v24, %v9005_v15  ;;  %v723_v31 = vadd.f32 %v9017_v16, %v9005_v15  ;;  %v9021_v24 = vld [vmem:[#allocation6_spill] sm:$0xff] }
 0x3da   :  { %v9039_v16 = vld [vmem:[#allocation4_spill] sm:$0xff] }
 0x3db   :  { %v2170_v8 = vpack.c.b16 %v2169_v27, %v2168_v6  ;;  %v705_v6 = vadd.f32 %v9006_v10, %v9005_v15  ;;  %v9007_v27 = vld [vmem:[#allocation37_spill] sm:$0xff]  ;;  %v2344_v10 = vpack.c.bf16 %v723_v31, %v723_v31 }
 0x3dc   :  { %v1699_v53 = vpop.xlane.xlu1 %1698 }
 0x3dd   :  { %5178 = vmatmul.msk.bf16.vlgmr.msra.gmra.mxu3 %vm1417_vm0, %v2170_v8  ;;  %5465 = vrcp.f32 %v1699_v53  ;;  %v720_v8 = vadd.f32 %v9007_v27, %v9005_v15 }
 0x3de   :  { %v1696_v35 = vpop.xlane.xlu0 %1695  ;;  %2475 = vmatpush.bf16.xpose.msra.mxu3 %v8995_v60  ;;  %v703_v60 = vadd.f32 %v9008_v1, %v9005_v15  ;;  %v9019_v1 = vld [vmem:[#allocation27_spill] sm:$0xff] }
 0x3df   :  { %5467 = vrcp.f32 %v1696_v35  ;;  %v7318_v2 = vpop.f32.mrf.mxu2 }
 0x3e0   :  { %v7320_v18 = vpop.f32.mrf.mxu3 }
 0x3e3   :  { %v5466_v21 = vpop.eup %5465 }
 0x3e4   :  { %v1767_v55 = vmul.f32 %v5466_v21, %v7227_v61  ;;  %v8998_v61 = vpack.c.b16 %v8996_v58, %v8997_v34 }
 0x3e5   :  { %v5468_v0 = vpop.eup %5467 }
 0x3e6   :  { %v1766_v20 = vmul.f32 %v5468_v0, %v7231_v42  ;;  %v1799_v5 = vpack.c.bf16 %v1767_v55, %v1767_v55  ;;  %v2337_v0 = vpack.c.bf16 %v705_v6, %v705_v6 }
 0x3e8   :  { %v1798_v54 = vpack.c.bf16 %v1766_v20, %v1766_v20  ;;  %v2197_v40 = vunpack.c.l.b16 %v1799_v5  ;;  %v7324_v62 = vpop.f32.mrf.mxu3  ;;  %v2336_v5 = vpack.c.bf16 %v703_v60, %v703_v60 }
 0x3e9   :  { %v7326_v38 = vpop.f32.mrf.mxu2 }
 0x3ea   :  { %v2196_v49 = vunpack.c.l.b16 %v1798_v54  ;;  %v2342_v54 = vpack.c.bf16 %v718_v4, %v718_v4  ;;  %v9022_v4 = vld [vmem:[#allocation5_spill] sm:$0xff] }
 0x3ec   :  { %v2198_v19 = vpack.c.b16 %v2197_v40, %v2196_v49  ;;  %v1705_v36 = vpop.xlane.xlu0 %1704  ;;  %v2673_v49 = vunpack.c.l.b16 %v2337_v0  ;;  %v2750_v58 = vunpack.c.l.b16 %v2342_v54  ;;  %v9025_v0 = vld [vmem:[#allocation43_spill] sm:$0xff]  ;;  %v9028_v54 = vld [vmem:[#allocation64_spill] sm:$0xff] }
 0x3ed   :  { %5469 = vrcp.f32 %v1705_v36 }
 0x3ee   :  { %v1702_v32 = vpop.xlane.xlu2 %1701  ;;  %5179 = vmatmul.msk.bf16.vlgmr.msrb.gmra.mxu2 %vm1417_vm0, %v2198_v19 }
 0x3ef   :  { %5471 = vrcp.f32 %v1702_v32  ;;  %2553 = vmatpush.bf16.xpose.msrb.mxu2 %v8998_v61  ;;  %v2672_v32 = vunpack.c.l.b16 %v2336_v5  ;;  %v9027_v5 = vld [vmem:[#allocation30_spill] sm:$0xff] }
 0x3f0   :  { %v7332_v42 = vpop.f32.mrf.mxu3  ;;  %v861_v31 = vadd.f32 %v9039_v16, %v9027_v5 }
 0x3f1   :  { %v7334_v28 = vpop.f32.mrf.mxu2  ;;  %v2674_v34 = vpack.c.b16 %v2673_v49, %v2672_v32  ;;  %v856_v49 = vadd.f32 %v9028_v54, %v9027_v5 }
 0x3f3   :  { %v5470_v39 = vpop.eup %5469  ;;  %v2358_v32 = vpack.c.bf16 %v856_v49, %v856_v49 }
 0x3f4   :  { %v1769_v63 = vmul.f32 %v5470_v39, %v7255_v25  ;;  %v9003_v25 = vld [vmem:[#allocation66_spill] sm:$0xff]  ;;  %v9010_v39 = vld [vmem:[#allocation8_spill] sm:$0xff] }
 0x3f5   :  { %v5472_v33 = vpop.eup %5471 }
 0x3f6   :  { %v1768_v45 = vmul.f32 %v5472_v33, %v7261_v11  ;;  %v1801_v9 = vpack.c.bf16 %v1769_v63, %v1769_v63  ;;  %v9004_v11 = vpack.c.b16 %v6746_v46, %v9003_v25  ;;  %v2343_v46 = vpack.c.bf16 %v720_v8, %v720_v8  ;;  %v9011_v33 = vld [vmem:[#allocation7_spill] sm:$0xff] }
 0x3f7   :  { %v9012_v63 = vpack.c.b16 %v9010_v39, %v9011_v33  ;;  %v2776_v8 = vunpack.c.l.b16 %v2344_v10  ;;  %v9030_v33 = vld [vmem:[#allocation12_spill] sm:$0xff]  ;;  %v2360_v10 = vpack.c.bf16 %v861_v31, %v861_v31 }
 0x3f8   :  { %v1800_v50 = vpack.c.bf16 %v1768_v45, %v1768_v45  ;;  %v2225_v14 = vunpack.c.l.b16 %v1801_v9  ;;  %v2751_v19 = vunpack.c.l.b16 %v2343_v46  ;;  %v9013_v45 = vld [vmem:[#allocation22_spill] sm:$0xff]  ;;  %v9014_v9 = vld [vmem:[#allocation21_spill] sm:$0xff] }
 0x3f9   :  { %v7338_v43 = vpop.f32.mrf.mxu3  ;;  %v2049_v48 = vpop.f32.mrf.mxu2 }
 0x3fa   :  { %v2224_v41 = vunpack.c.l.b16 %v1800_v50  ;;  %v2266_v53 = vpack.c.bf16 %v2049_v48, %v2049_v48  ;;  %v2752_v61 = vpack.c.b16 %v2751_v19, %v2750_v58  ;;  %v9015_v50 = vpack.c.b16 %v9013_v45, %v9014_v9  ;;  %v9029_v19 = vld [vmem:[#allocation65_spill] sm:$0xff]  ;;  %v9033_v9 = vld [vmem:[#allocation26_spill] sm:$0xff] }
 0x3fc   :  { %v2226_v44 = vpack.c.b16 %v2225_v14, %v2224_v41  ;;  %v7360_v55 = vunpack.c.l.b16 %v2266_v53  ;;  %v9016_v14 = vld [vmem:[#allocation15_spill] sm:$0xff] }
 0x3fd   :  { %v725_v41 = vadd.f32 %v9016_v14, %v9005_v15  ;;  %v9023_v15 = vpack.c.b16 %v9021_v24, %v9022_v4 }
 0x3fe   :  { %5180 = vmatmul.msk.bf16.vlgmr.msrb.gmra.mxu3 %vm1417_vm0, %v2226_v44  ;;  %2450 = vmatmul.bf16.vlgmr.msra.gmra.mxu2 %v9001_v26 }
 0x3ff   :  { %2579 = vmatpush.bf16.xpose.msrb.mxu3 %v9002_v57  ;;  %2657 = vmatpush.bf16.xpose.msra.mxu2 %v9004_v11  ;;  %v2345_v57 = vpack.c.bf16 %v725_v41, %v725_v41  ;;  %v9036_v41 = vld [vmem:[#allocation51_spill] sm:$0xff] }
 0x401   :  { %v7354_v35 = vpop.f32.mrf.mxu3  ;;  %v2051_v23 = vpop.f32.mrf.mxu2  ;;  %v2777_v27 = vunpack.c.l.b16 %v2345_v57 }
 0x402   :  { %v2267_v21 = vpack.c.bf16 %v2051_v23, %v2051_v23  ;;  %v9018_v23 = vld [vmem:[#allocation28_spill] sm:$0xff] }
 0x403   :  { %v2778_v53 = vpack.c.b16 %v2777_v27, %v2776_v8  ;;  %v9020_v60 = vpack.c.b16 %v9018_v23, %v9019_v1  ;;  %v3381_v8 = vunpack.c.l.b16 %v2360_v10  ;;  %v9041_v1 = vld [vmem:[#allocation34_spill] sm:$0xff] }
 0x404   :  { %v7362_v20 = vunpack.c.l.b16 %v2267_v21  ;;  %v9024_v21 = vld [vmem:[#allocation45_spill] sm:$0xff] }
 0x405   :  { %v9026_v46 = vpack.c.b16 %v9024_v21, %v9025_v0 }
 0x409   :  { %v2077_v36 = vpop.f32.mrf.mxu3 }
 0x40a   :  { %v2268_v48 = vpack.c.bf16 %v2077_v36, %v2077_v36  ;;  %v858_v36 = vadd.f32 %v9029_v19, %v9027_v5 }
 0x40c   :  { %v7376_v25 = vunpack.c.l.b16 %v2268_v48  ;;  %v2359_v58 = vpack.c.bf16 %v858_v36, %v858_v36  ;;  %v9037_v48 = vld [vmem:[#allocation49_spill] sm:$0xff] }
 0x40e   :  { %2476 = vmatmul.bf16.vlgmr.msra.gmra.mxu3 %v9012_v63  ;;  %2554 = vmatmul.bf16.vlgmr.msrb.gmra.mxu2 %v9015_v50  ;;  %v9031_v63 = vld [vmem:[#allocation11_spill] sm:$0xff]  ;;  %v9034_v50 = vld [vmem:[#allocation25_spill] sm:$0xff] }
 0x40f   :  { %2683 = vmatpush.bf16.xpose.msra.mxu3 %v2674_v34  ;;  %2761 = vmatpush.bf16.xpose.msrb.mxu2 %v2752_v61  ;;  %v3353_v34 = vunpack.c.l.b16 %v2358_v32  ;;  %v3354_v61 = vunpack.c.l.b16 %v2359_v58  ;;  %v9032_v45 = vpack.c.b16 %v9030_v33, %v9031_v63  ;;  %v9035_v14 = vpack.c.b16 %v9033_v9, %v9034_v50 }
 0x411   :  { %v2079_v44 = vpop.f32.mrf.mxu3  ;;  %v3355_v39 = vpack.c.b16 %v3354_v61, %v3353_v34 }
 0x412   :  { %v2269_v26 = vpack.c.bf16 %v2079_v44, %v2079_v44  ;;  %v9038_v44 = vpack.c.b16 %v9036_v41, %v9037_v48 }
 0x414   :  { %v7378_v11 = vunpack.c.l.b16 %v2269_v26  ;;  %v9040_v26 = vld [vmem:[#allocation9_spill] sm:$0xff] }
 0x415   :  { %v863_v57 = vadd.f32 %v9040_v26, %v9027_v5 }
 0x417   :  { %v2361_v27 = vpack.c.bf16 %v863_v57, %v863_v57 }
 0x41e   :  { %2580 = vmatmul.bf16.vlgmr.msrb.gmra.mxu3 %v9020_v60  ;;  %2658 = vmatmul.bf16.vlgmr.msra.gmra.mxu2 %v9023_v15  ;;  %v9042_v60 = vld [vmem:[#allocation33_spill] sm:$0xff] }
 0x41f   :  { %2787 = vmatpush.bf16.xpose.msrb.mxu3 %v2778_v53  ;;  %3255 = vmatpush.bf16.msra.mxu2 %v9026_v46  ;;  %v3382_v53 = vunpack.c.l.b16 %v2361_v27  ;;  %v9043_v24 = vpack.c.b16 %v9041_v1, %v9042_v60 }
 0x421   :  { %v3383_v23 = vpack.c.b16 %v3382_v53, %v3381_v8 }
 0x42e   :  { %2684 = vmatmul.bf16.vlgmr.msra.gmra.mxu3 %v9032_v45  ;;  %2762 = vmatmul.bf16.vlgmr.msrb.gmra.mxu2 %v9035_v14 }
 0x42f   :  { %3283 = vmatpush.bf16.msra.mxu3 %v9038_v44  ;;  %3367 = vmatpush.bf16.msrb.mxu2 %v3355_v39 }
 0x43e   :  { %2788 = vmatmul.bf16.vlgmr.msrb.gmra.mxu3 %v9043_v24  ;;  %v2796_v24 = vpop.xlane.xlu1 %2795 }
 0x43f   :  { %3395 = vmatpush.bf16.msrb.mxu3 %v3383_v23  ;;  %v2105_v4 = vpop.f32.mrf.mxu2 }
 0x440   :  { %v2270_v15 = vpack.c.bf16 %v2105_v4, %v2105_v4 }
 0x442   :  { %v7411_v46 = vunpack.c.l.b16 %v2270_v15  ;;  %v2890_v15 = vsub.f32 %v7243_v29, %v2796_v24 }
 0x444   :  { %9044 = vst [vmem:[#allocation42_spill] sm:$0xff] %v7411_v46 }
 0x447   :  { %v2107_v21 = vpop.f32.mrf.mxu2 }
 0x448   :  { %v2271_v0 = vpack.c.bf16 %v2107_v21, %v2107_v21 }
 0x44a   :  { %v7413_v54 = vunpack.c.l.b16 %v2271_v0 }
 0x44c   :  { %9045 = vst [vmem:[#allocation41_spill] sm:$0xff] %v7413_v54 }
 0x44e   :  { %v2133_v19 = vpop.f32.mrf.mxu3 }
 0x44f   :  { %v2161_v36 = vpop.f32.mrf.mxu2  ;;  %v2272_v32 = vpack.c.bf16 %v2133_v19, %v2133_v19 }
 0x450   :  { %v2274_v58 = vpack.c.bf16 %v2161_v36, %v2161_v36  ;;  %v2922_v36 = vmul.f32 1.442695, %v2890_v15 }
 0x451   :  { %v7417_v63 = vunpack.c.l.b16 %v2272_v32  ;;  %v2799_v32 = vpop.xlane.xlu2 %2798 }
 0x452   :  { %v7421_v9 = vunpack.c.l.b16 %v2274_v58  ;;  %5473 = vpow2.f32 %v2922_v36 }
 0x453   :  { %9046 = vst [vmem:[#allocation39_spill] sm:$0xff] %v7417_v63 }
 0x454   :  { %9048 = vst [vmem:[#allocation31_spill] sm:$0xff] %v7421_v9 }
 0x456   :  { %v2135_v34 = vpop.f32.mrf.mxu3 }
 0x457   :  { %v2273_v61 = vpack.c.bf16 %v2135_v34, %v2135_v34  ;;  %v2163_v39 = vpop.f32.mrf.mxu2  ;;  %v2891_v34 = vsub.f32 %v7269_v56, %v2799_v32 }
 0x458   :  { %v2275_v33 = vpack.c.bf16 %v2163_v39, %v2163_v39 }
 0x459   :  { %v7419_v45 = vunpack.c.l.b16 %v2273_v61 }
 0x45a   :  { %v7423_v50 = vunpack.c.l.b16 %v2275_v33 }
 0x45b   :  { %9047 = vst [vmem:[#allocation32_spill] sm:$0xff] %v7419_v45 }
 0x45c   :  { %9049 = vst [vmem:[#allocation50_spill] sm:$0xff] %v7423_v50 }
 0x460   :  { %v2189_v48 = vpop.f32.mrf.mxu3 }
 0x461   :  { %v2276_v44 = vpack.c.bf16 %v2189_v48, %v2189_v48 }
 0x463   :  { %v7429_v26 = vunpack.c.l.b16 %v2276_v44 }
 0x465   :  { %9050 = vst [vmem:[#allocation48_spill] sm:$0xff] %v7429_v26 }
 0x468   :  { %v2191_v16 = vpop.f32.mrf.mxu3 }
 0x469   :  { %v2277_v31 = vpack.c.bf16 %v2191_v16, %v2191_v16  ;;  %v2924_v16 = vmul.f32 1.442695, %v2891_v34 }
 0x46b   :  { %v7431_v57 = vunpack.c.l.b16 %v2277_v31  ;;  %v2802_v31 = vpop.xlane.xlu0 %2801  ;;  %5475 = vpow2.f32 %v2924_v16 }
 0x46c   :  { %v2892_v56 = vsub.f32 %v7238_v13, %v2802_v31 }
 0x46d   :  { %9051 = vst [vmem:[#allocation55_spill] sm:$0xff] %v7431_v57 }
 0x471   :  { %v2217_v27 = vpop.f32.mrf.mxu2 }
 0x472   :  { %v2278_v8 = vpack.c.bf16 %v2217_v27, %v2217_v27 }
 0x474   :  { %v7435_v1 = vunpack.c.l.b16 %v2278_v8  ;;  %v7454_v8 = vpop.eup %5473 }
 0x475   :  { %v2986_v15 = vsel %vm1417_vm0, %v7454_v8, 0.0  ;;  %v7462_v36 = vpop.eup %5475 }
 0x476   :  { %9052 = vst [vmem:[#allocation54_spill] sm:$0xff] %v7435_v1  ;;  %v2989_v13 = vsel %vm1417_vm0, %v7462_v36, 0.0 }
 0x479   :  { %v2219_v53 = vpop.f32.mrf.mxu2 }
 0x47a   :  { %v2279_v23 = vpack.c.bf16 %v2219_v53, %v2219_v53  ;;  %v7456_v53 = vpop.f32.mrf.mxu0 }
 0x47b   :  { %v2818_v31 = vsel %vm1417_vm0, %v7456_v53, -inf }
 0x47c   :  { %v7437_v60 = vunpack.c.l.b16 %v2279_v23 }
 0x47e   :  { %9053 = vst [vmem:[#allocation29_spill] sm:$0xff] %v7437_v60 }
 0x481   :  { %v2245_v21 = vpop.f32.mrf.mxu3  ;;  %v7442_v0 = vpop.f32.mrf.mxu2 }
 0x482   :  { %v2806_v19 = vsel %vm1417_vm0, %v7442_v0, -inf  ;;  %v2280_v58 = vpack.c.bf16 %v2245_v21, %v2245_v21  ;;  %v2926_v21 = vmul.f32 1.442695, %v2892_v56  ;;  %v7467_v34 = vpop.f32.mrf.mxu0 }
 0x483   :  { %2807 = vmax.xlane.f32.xlu2 %v2806_v19  ;;  %v2805_v19 = vpop.xlane.xlu1 %2804 }
 0x484   :  { %v7448_v29 = vunpack.c.l.b16 %v2280_v58  ;;  %5477 = vpow2.f32 %v2926_v21  ;;  %v2893_v32 = vsub.f32 %v7249_v51, %v2805_v19  ;;  %v7487_v21 = vpop.f32.mrf.mxu1 }
 0x485   :  { %v2824_v19 = vsel %vm1417_vm0, %v7487_v21, -inf }
 0x486   :  { %9054 = vst [vmem:[#allocation61_spill] sm:$0xff] %v7448_v29 }
 0x489   :  { %v2247_v61 = vpop.f32.mrf.mxu3  ;;  %v2453_v39 = vpop.f32.mrf.mxu2 }
 0x48a   :  { %v2281_v33 = vpack.c.bf16 %v2247_v61, %v2247_v61  ;;  %v2809_v48 = vsel %vm1417_vm0, %v2453_v39, -inf  ;;  %v7475_v16 = vpop.eup %5477 }
 0x48b   :  { %2810 = vmax.xlane.f32.xlu0 %v2809_v48  ;;  %v2928_v48 = vmul.f32 1.442695, %v2893_v32  ;;  %v2992_v51 = vsel %vm1417_vm0, %v7475_v16, 0.0 }
 0x48c   :  { %v7450_v44 = vunpack.c.l.b16 %v2281_v33  ;;  %v2821_v33 = vsel %vm1417_vm0, %v7467_v34, -inf }
 0x48d   :  { %5479 = vpow2.f32 %v2928_v48 }
 0x48e   :  { %9055 = vst [vmem:[#allocation60_spill] sm:$0xff] %v7450_v44 }
 0x491   :  { %v2477_v23 = vpop.f32.mrf.mxu3 }
 0x492   :  { %v2812_v24 = vsel %vm1417_vm0, %v2477_v23, -inf }
 0x493   :  { %2813 = vmax.xlane.f32.xlu1 %v2812_v24  ;;  %2987 = vadd.xlane.f32.xlu0 %v2986_v15  ;;  %v7481_v56 = vpop.eup %5479  ;;  %v7485_v15 = vpop.f32.mrf.mxu2 }
 0x494   :  { %v2995_v24 = vsel %vm1417_vm0, %v7481_v56, 0.0 }
 0x499   :  { %v7465_v58 = vpop.f32.mrf.mxu3 }
 0x49a   :  { %v2815_v61 = vsel %vm1417_vm0, %v7465_v58, -inf }
 0x49b   :  { %2990 = vadd.xlane.f32.xlu1 %v2989_v13  ;;  %2816 = vmax.xlane.f32.xlu2 %v2815_v61  ;;  %v7491_v32 = vpop.f32.mrf.mxu2  ;;  %v7495_v61 = vpop.f32.mrf.mxu0 }
 0x49c   :  { %2822 = vmax.xlane.f32.xlu0 %v2821_v33  ;;  %v2833_v13 = vsel %vm1417_vm0, %v7491_v32, -inf }
 0x4a1   :  { %v7497_v33 = vpop.f32.mrf.mxu3 }
 0x4a2   :  { %v2836_v48 = vsel %vm1417_vm0, %v7497_v33, -inf }
 0x4a3   :  { %2993 = vadd.xlane.f32.xlu1 %v2992_v51  ;;  %2819 = vmax.xlane.f32.xlu2 %v2818_v31  ;;  %v7501_v51 = vpop.f32.mrf.mxu0 }
 0x4a4   :  { %v2845_v31 = vsel %vm1417_vm0, %v7501_v51, -inf }
 0x4ab   :  { %2996 = vadd.xlane.f32.xlu2 %v2995_v24 }
 0x4b3   :  { %2825 = vmax.xlane.f32.xlu2 %v2824_v19 }
 0x4bb   :  { %2834 = vmax.xlane.f32.xlu2 %v2833_v13 }
 0x4c3   :  { %2837 = vmax.xlane.f32.xlu2 %v2836_v48 }
 0x4cb   :  { %2846 = vmax.xlane.f32.xlu2 %v2845_v31  ;;  %v7512_v31 = vpop.f32.mrf.mxu1 }
 0x4f6   :  { %v2808_v24 = vpop.xlane.xlu2 %2807 }
 0x4f7   :  { %v2894_v19 = vsub.f32 %v7442_v0, %v2808_v24 }
 0x4f9   :  { %v2930_v27 = vmul.f32 1.442695, %v2894_v19 }
 0x4fb   :  { %5481 = vpow2.f32 %v2930_v27 }
 0x4fe   :  { %v2811_v13 = vpop.xlane.xlu0 %2810 }
 0x4ff   :  { %v2895_v4 = vsub.f32 %v2453_v39, %v2811_v13 }
 0x501   :  { %v7506_v10 = vpop.eup %5481  ;;  %v2932_v41 = vmul.f32 1.442695, %v2895_v4  ;;  %v2827_v4 = vsel %vm1417_vm0, %v7512_v31, -inf }
 0x502   :  { %v2998_v14 = vsel %vm1417_vm0, %v7506_v10, 0.0 }
 0x503   :  { %5483 = vpow2.f32 %v2932_v41  ;;  %2999 = vadd.xlane.f32.xlu0 %v2998_v14 }
 0x506   :  { %v2988_v48 = vpop.xlane.xlu0 %2987  ;;  %v2814_v49 = vpop.xlane.xlu1 %2813 }
 0x507   :  { %v2896_v6 = vsub.f32 %v2477_v23, %v2814_v49  ;;  %5485 = vrcp.f32 %v2988_v48  ;;  %v9056_v23 = vld [vmem:[#allocation14_spill] sm:$0xff] }
 0x508   :  { %v866_v24 = vadd.f32 %v9056_v23, %v9027_v5 }
 0x509   :  { %v7510_v40 = vpop.eup %5483  ;;  %v2934_v0 = vmul.f32 1.442695, %v2896_v6  ;;  %v9057_v6 = vld [vmem:[#allocation13_spill] sm:$0xff] }
 0x50a   :  { %v3001_v39 = vsel %vm1417_vm0, %v7510_v40, 0.0  ;;  %v868_v13 = vadd.f32 %v9057_v6, %v9027_v5 }
 0x50b   :  { %5487 = vpow2.f32 %v2934_v0  ;;  %3002 = vadd.xlane.f32.xlu1 %v3001_v39  ;;  %2828 = vmax.xlane.f32.xlu0 %v2827_v4  ;;  %v2830_v0 = vsel %vm1417_vm0, %v7485_v15, -inf }
 0x50d   :  { %v5486_v27 = vpop.eup %5485 }
 0x50e   :  { %v2817_v41 = vpop.xlane.xlu2 %2816  ;;  %v2991_v14 = vpop.xlane.xlu1 %2990  ;;  %v3114_v29 = vmul.f32 %v5486_v27, %v7454_v8 }
 0x50f   :  { %v2897_v49 = vsub.f32 %v7465_v58, %v2817_v41  ;;  %5489 = vrcp.f32 %v2991_v14  ;;  %v2362_v58 = vpack.c.bf16 %v866_v24, %v866_v24  ;;  %v2363_v41 = vpack.c.bf16 %v868_v13, %v868_v13  ;;  %v7530_v14 = vpop.f32.mrf.mxu3  ;;  %v2823_v8 = vpop.xlane.xlu0 %2822 }
 0x510   :  { %v3146_v23 = vpack.c.bf16 %v3114_v29, %v3114_v29  ;;  %v2839_v24 = vsel %vm1417_vm0, %v7530_v14, -inf  ;;  %v2899_v29 = vsub.f32 %v7467_v34, %v2823_v8  ;;  %v9058_v34 = vld [vmem:[#allocation40_spill] sm:$0xff]  ;;  %v9059_v8 = vld [vmem:[#allocation18_spill] sm:$0xff] }
 0x511   :  { %v7521_v19 = vpop.eup %5487  ;;  %v2936_v48 = vmul.f32 1.442695, %v2897_v49  ;;  %v3409_v1 = vunpack.c.l.b16 %v2362_v58 }
 0x512   :  { %v3004_v39 = vsel %vm1417_vm0, %v7521_v19, 0.0  ;;  %v3180_v13 = vunpack.c.l.b16 %v3146_v23 }
 0x513   :  { %5491 = vpow2.f32 %v2936_v48  ;;  %2831 = vmax.xlane.f32.xlu1 %v2830_v0  ;;  %3005 = vadd.xlane.f32.xlu0 %v3004_v39  ;;  %v3410_v48 = vunpack.c.l.b16 %v2363_v41  ;;  %v7543_v41 = vpop.f32.mrf.mxu0 }
 0x515   :  { %v5490_v4 = vpop.eup %5489  ;;  %v3411_v58 = vpack.c.b16 %v3410_v48, %v3409_v1  ;;  %v2842_v48 = vsel %vm1417_vm0, %v7495_v61, -inf }
 0x516   :  { %v3115_v6 = vmul.f32 %v5490_v4, %v7462_v36  ;;  %v2820_v49 = vpop.xlane.xlu2 %2819  ;;  %v2994_v44 = vpop.xlane.xlu1 %2993 }
 0x517   :  { %v2898_v27 = vsub.f32 %v7456_v53, %v2820_v49  ;;  %5493 = vrcp.f32 %v2994_v44  ;;  %v7541_v4 = vpop.f32.mrf.mxu1  ;;  %v2940_v44 = vmul.f32 1.442695, %v2899_v29  ;;  %v871_v49 = vadd.f32 %v9058_v34, %v9027_v5 }
 0x518   :  { %v3147_v60 = vpack.c.bf16 %v3115_v6, %v3115_v6 }
 0x519   :  { %v7534_v26 = vpop.eup %5491  ;;  %v2938_v0 = vmul.f32 1.442695, %v2898_v27  ;;  %v873_v27 = vadd.f32 %v9059_v8, %v9027_v5  ;;  %v2364_v29 = vpack.c.bf16 %v871_v49, %v871_v49 }
 0x51a   :  { %v3181_v39 = vunpack.c.l.b16 %v3147_v60  ;;  %v3007_v36 = vsel %vm1417_vm0, %v7534_v26, 0.0 }
 0x51b   :  { %5495 = vpow2.f32 %v2938_v0  ;;  %3008 = vadd.xlane.f32.xlu1 %v3007_v36  ;;  %2840 = vmax.xlane.f32.xlu0 %v2839_v24  ;;  %v2848_v24 = vsel %vm1417_vm0, %v7541_v4, -inf  ;;  %v3437_v8 = vunpack.c.l.b16 %v2364_v29 }
 0x51c   :  { %v3182_v53 = vpack.c.b16 %v3181_v39, %v3180_v13  ;;  %v2365_v39 = vpack.c.bf16 %v873_v27, %v873_v27 }
 0x51d   :  { %v5494_v23 = vpop.eup %5493 }
 0x51e   :  { %v2997_v6 = vpop.xlane.xlu2 %2996  ;;  %5181 = vmatmul.msk.bf16.vlgmr.msra.gmra.mxu0 %vm1417_vm0, %v3182_v53  ;;  %v3116_v1 = vmul.f32 %v5494_v23, %v7475_v16 }
 0x51f   :  { %5497 = vrcp.f32 %v2997_v6  ;;  %3423 = vmatpush.bf16.msra.mxu0 %v3411_v58  ;;  %v7559_v36 = vpop.f32.mrf.mxu1 }
 0x520   :  { %5499 = vpow2.f32 %v2940_v44  ;;  %v3148_v53 = vpack.c.bf16 %v3116_v1, %v3116_v1  ;;  %v7562_v44 = vpop.f32.mrf.mxu0  ;;  %v2851_v49 = vsel %vm1417_vm0, %v7559_v36, -inf }
 0x521   :  { %v7546_v60 = vpop.eup %5495  ;;  %v2869_v27 = vsel %vm1417_vm0, %v7562_v44, -inf }
 0x522   :  { %v3010_v0 = vsel %vm1417_vm0, %v7546_v60, 0.0 }
 0x523   :  { %2843 = vmax.xlane.f32.xlu1 %v2842_v48  ;;  %3011 = vadd.xlane.f32.xlu2 %v3010_v0  ;;  %v3438_v48 = vunpack.c.l.b16 %v2365_v39 }
 0x524   :  { %2849 = vmax.xlane.f32.xlu0 %v2848_v24  ;;  %v3208_v24 = vunpack.c.l.b16 %v3148_v53 }
 0x525   :  { %v5498_v13 = vpop.eup %5497  ;;  %v3439_v1 = vpack.c.b16 %v3438_v48, %v3437_v8 }
 0x526   :  { %v3117_v16 = vmul.f32 %v5498_v13, %v7481_v56  ;;  %v2826_v58 = vpop.xlane.xlu2 %2825  ;;  %v7565_v23 = vpop.eup %5499 }
 0x527   :  { %v2900_v6 = vsub.f32 %v7487_v21, %v2826_v58  ;;  %v3013_v56 = vsel %vm1417_vm0, %v7565_v23, 0.0  ;;  %v7573_v13 = vpop.f32.mrf.mxu1  ;;  %v2866_v58 = vsel %vm1417_vm0, %v7543_v41, -inf }
 0x528   :  { %v3149_v34 = vpack.c.bf16 %v3117_v16, %v3117_v16 }
 0x529   :  { %v2942_v0 = vmul.f32 1.442695, %v2900_v6 }
 0x52a   :  { %v3209_v57 = vunpack.c.l.b16 %v3149_v34 }
 0x52b   :  { %5501 = vpow2.f32 %v2942_v0  ;;  %2852 = vmax.xlane.f32.xlu1 %v2851_v49  ;;  %2870 = vmax.xlane.f32.xlu2 %v2869_v27 }
 0x52c   :  { %v3210_v21 = vpack.c.b16 %v3209_v57, %v3208_v24  ;;  %3014 = vadd.xlane.f32.xlu0 %v3013_v56  ;;  %v2872_v57 = vsel %vm1417_vm0, %v7573_v13, -inf }
 0x52e   :  { %v2835_v29 = vpop.xlane.xlu2 %2834  ;;  %5182 = vmatmul.msk.bf16.vlgmr.msra.gmra.mxu1 %vm1417_vm0, %v3210_v21 }
 0x52f   :  { %v2903_v39 = vsub.f32 %v7491_v32, %v2835_v29  ;;  %3451 = vmatpush.bf16.msra.mxu1 %v3439_v1  ;;  %v7585_v8 = vpop.f32.mrf.mxu1 }
 0x530   :  { %v2875_v48 = vsel %vm1417_vm0, %v7585_v8, -inf }
 0x531   :  { %v7577_v53 = vpop.eup %5501  ;;  %v2948_v16 = vmul.f32 1.442695, %v2903_v39 }
 0x532   :  { %v3016_v6 = vsel %vm1417_vm0, %v7577_v53, 0.0 }
 0x533   :  { %5503 = vpow2.f32 %v2948_v16  ;;  %2867 = vmax.xlane.f32.xlu1 %v2866_v58  ;;  %3017 = vadd.xlane.f32.xlu2 %v3016_v6  ;;  %v7603_v58 = vpop.f32.mrf.mxu3 }
 0x534   :  { %2873 = vmax.xlane.f32.xlu0 %v2872_v57 }
 0x536   :  { %v2838_v34 = vpop.xlane.xlu2 %2837 }
 0x537   :  { %v2904_v27 = vsub.f32 %v7497_v33, %v2838_v34  ;;  %v2860_v33 = vsel %vm1417_vm0, %v7603_v58, -inf }
 0x539   :  { %v7587_v32 = vpop.eup %5503  ;;  %v2950_v21 = vmul.f32 1.442695, %v2904_v27 }
 0x53a   :  { %v3025_v0 = vsel %vm1417_vm0, %v7587_v32, 0.0 }
 0x53b   :  { %2876 = vmax.xlane.f32.xlu1 %v2875_v48  ;;  %3026 = vadd.xlane.f32.xlu2 %v3025_v0  ;;  %v9060_v0 = vld [vmem:[#allocation17_spill] sm:$0xff] }
 0x53e   :  { %v2847_v24 = vpop.xlane.xlu2 %2846 }
 0x53f   :  { %v2907_v49 = vsub.f32 %v7501_v51, %v2847_v24  ;;  %v876_v24 = vadd.f32 %v9060_v0, %v9027_v5 }
 0x541   :  { %v2956_v56 = vmul.f32 1.442695, %v2907_v49  ;;  %v9061_v49 = vld [vmem:[#allocation20_spill] sm:$0xff] }
 0x542   :  { %v878_v27 = vadd.f32 %v9061_v49, %v9027_v5 }
 0x543   :  { %5505 = vpow2.f32 %v2956_v56 }
 0x544   :  { %5507 = vpow2.f32 %v2950_v21 }
 0x549   :  { %v7595_v1 = vpop.eup %5505 }
 0x54a   :  { %v3037_v29 = vsel %vm1417_vm0, %v7595_v1, 0.0  ;;  %v7599_v39 = vpop.eup %5507 }
 0x54b   :  { %3038 = vadd.xlane.f32.xlu2 %v3037_v29  ;;  %v3028_v16 = vsel %vm1417_vm0, %v7599_v39, 0.0 }
 0x553   :  { %3029 = vadd.xlane.f32.xlu2 %v3028_v16  ;;  %v2366_v16 = vpack.c.bf16 %v876_v24, %v876_v24  ;;  %v7619_v24 = vpop.f32.mrf.mxu2 }
 0x555   :  { %v3465_v0 = vunpack.c.l.b16 %v2366_v16  ;;  %v9063_v16 = vld [vmem:[#allocation59_spill] sm:$0xff] }
 0x55b   :  { %2861 = vmax.xlane.f32.xlu2 %v2860_v33  ;;  %v2367_v33 = vpack.c.bf16 %v878_v27, %v878_v27 }
 0x55d   :  { %v3466_v49 = vunpack.c.l.b16 %v2367_v33  ;;  %v883_v33 = vadd.f32 %v9063_v16, %v9027_v5 }
 0x55f   :  { %v3467_v27 = vpack.c.b16 %v3466_v49, %v3465_v0  ;;  %v2369_v49 = vpack.c.bf16 %v883_v33, %v883_v33 }
 0x561   :  { %v3494_v16 = vunpack.c.l.b16 %v2369_v49 }
 0x576   :  { %v3000_v51 = vpop.xlane.xlu0 %2999 }
 0x577   :  { %5509 = vrcp.f32 %v3000_v51 }
 0x57d   :  { %v5510_v34 = vpop.eup %5509 }
 0x57e   :  { %v2829_v6 = vpop.xlane.xlu0 %2828  ;;  %v3003_v57 = vpop.xlane.xlu1 %3002  ;;  %v3118_v21 = vmul.f32 %v5510_v34, %v7506_v10 }
 0x57f   :  { %v2901_v48 = vsub.f32 %v7512_v31, %v2829_v6  ;;  %5511 = vrcp.f32 %v3003_v57 }
 0x580   :  { %v3150_v51 = vpack.c.bf16 %v3118_v21, %v3118_v21 }
 0x581   :  { %v2944_v56 = vmul.f32 1.442695, %v2901_v48 }
 0x582   :  { %v3236_v45 = vunpack.c.l.b16 %v3150_v51 }
 0x583   :  { %5513 = vpow2.f32 %v2944_v56 }
 0x585   :  { %v5512_v29 = vpop.eup %5511 }
 0x586   :  { %v3119_v9 = vmul.f32 %v5512_v29, %v7510_v40  ;;  %v3006_v50 = vpop.xlane.xlu0 %3005  ;;  %v2832_v63 = vpop.xlane.xlu1 %2831 }
 0x587   :  { %v2902_v31 = vsub.f32 %v7485_v15, %v2832_v63  ;;  %5515 = vrcp.f32 %v3006_v50  ;;  %v9062_v15 = vld [vmem:[#allocation19_spill] sm:$0xff] }
 0x588   :  { %v3151_v6 = vpack.c.bf16 %v3119_v9, %v3119_v9  ;;  %v881_v21 = vadd.f32 %v9062_v15, %v9027_v5 }
 0x589   :  { %v7615_v57 = vpop.eup %5513  ;;  %v2946_v48 = vmul.f32 1.442695, %v2902_v31  ;;  %v2854_v31 = vsel %vm1417_vm0, %v7619_v24, -inf }
 0x58a   :  { %v3237_v10 = vunpack.c.l.b16 %v3151_v6  ;;  %v3019_v34 = vsel %vm1417_vm0, %v7615_v57, 0.0 }
 0x58b   :  { %5517 = vpow2.f32 %v2946_v48  ;;  %3020 = vadd.xlane.f32.xlu0 %v3019_v34  ;;  %v7634_v48 = vpop.f32.mrf.mxu2 }
 0x58c   :  { %v3238_v40 = vpack.c.b16 %v3237_v10, %v3236_v45  ;;  %v2857_v33 = vsel %vm1417_vm0, %v7634_v48, -inf }
 0x58d   :  { %v5516_v56 = vpop.eup %5515 }
 0x58e   :  { %v2841_v63 = vpop.xlane.xlu0 %2840  ;;  %5183 = vmatmul.msk.bf16.vlgmr.msra.gmra.mxu2 %vm1417_vm0, %v3238_v40  ;;  %v3009_v9 = vpop.xlane.xlu1 %3008  ;;  %v3120_v45 = vmul.f32 %v5516_v56, %v7521_v19 }
 0x58f   :  { %v2905_v50 = vsub.f32 %v7530_v14, %v2841_v63  ;;  %3479 = vmatpush.bf16.msra.mxu2 %v3467_v27  ;;  %5519 = vrcp.f32 %v3009_v9  ;;  %v2368_v14 = vpack.c.bf16 %v881_v21, %v881_v21 }
 0x590   :  { %v3152_v10 = vpack.c.bf16 %v3120_v45, %v3120_v45 }
 0x591   :  { %v7625_v29 = vpop.eup %5517  ;;  %v2952_v51 = vmul.f32 1.442695, %v2905_v50  ;;  %v3493_v63 = vunpack.c.l.b16 %v2368_v14 }
 0x592   :  { %v3022_v6 = vsel %vm1417_vm0, %v7625_v29, 0.0  ;;  %v3264_v21 = vunpack.c.l.b16 %v3152_v10 }
 0x593   :  { %5521 = vpow2.f32 %v2952_v51  ;;  %2855 = vmax.xlane.f32.xlu0 %v2854_v31  ;;  %3023 = vadd.xlane.f32.xlu1 %v3022_v6 }
 0x595   :  { %v5520_v0 = vpop.eup %5519 }
 0x596   :  { %v3121_v34 = vmul.f32 %v5520_v0, %v7534_v26  ;;  %v3012_v40 = vpop.xlane.xlu2 %3011  ;;  %v2844_v19 = vpop.xlane.xlu1 %2843 }
 0x597   :  { %v2850_v27 = vpop.xlane.xlu0 %2849  ;;  %v2906_v56 = vsub.f32 %v7495_v61, %v2844_v19  ;;  %5523 = vrcp.f32 %v3012_v40  ;;  %v9064_v19 = vld [vmem:[#allocation57_spill] sm:$0xff] }
 0x598   :  { %v3153_v9 = vpack.c.bf16 %v3121_v34, %v3121_v34  ;;  %v2908_v50 = vsub.f32 %v7541_v4, %v2850_v27  ;;  %v3495_v4 = vpack.c.b16 %v3494_v16, %v3493_v63  ;;  %v886_v27 = vadd.f32 %v9064_v19, %v9027_v5 }
 0x599   :  { %v7639_v15 = vpop.eup %5521  ;;  %v2954_v51 = vmul.f32 1.442695, %v2906_v56 }
 0x59a   :  { %v3265_v45 = vunpack.c.l.b16 %v3153_v9  ;;  %v2958_v26 = vmul.f32 1.442695, %v2908_v50  ;;  %v3031_v31 = vsel %vm1417_vm0, %v7639_v15, 0.0  ;;  %v9065_v50 = vld [vmem:[#allocation38_spill] sm:$0xff] }
 0x59b   :  { %5525 = vpow2.f32 %v2954_v51  ;;  %3032 = vadd.xlane.f32.xlu0 %v3031_v31  ;;  %2858 = vmax.xlane.f32.xlu1 %v2857_v33  ;;  %v888_v16 = vadd.f32 %v9065_v50, %v9027_v5  ;;  %v2370_v51 = vpack.c.bf16 %v886_v27, %v886_v27  ;;  %v7661_v31 = vpop.f32.mrf.mxu3 }
 0x59c   :  { %v3266_v61 = vpack.c.b16 %v3265_v45, %v3264_v21  ;;  %5527 = vpow2.f32 %v2958_v26 }
 0x59d   :  { %v5524_v34 = vpop.eup %5523  ;;  %v2371_v45 = vpack.c.bf16 %v888_v16, %v888_v16 }
 0x59e   :  { %v2871_v6 = vpop.xlane.xlu2 %2870  ;;  %5184 = vmatmul.msk.bf16.vlgmr.msra.gmra.mxu3 %vm1417_vm0, %v3266_v61  ;;  %v2853_v14 = vpop.xlane.xlu1 %2852  ;;  %v3122_v21 = vmul.f32 %v5524_v34, %v7546_v60 }
 0x59f   :  { %v2915_v0 = vsub.f32 %v7562_v44, %v2871_v6  ;;  %v3015_v49 = vpop.xlane.xlu0 %3014  ;;  %3507 = vmatpush.bf16.msra.mxu3 %v3495_v4  ;;  %v2909_v10 = vsub.f32 %v7559_v36, %v2853_v14  ;;  %v3522_v27 = vunpack.c.l.b16 %v2371_v45 }
 0x5a0   :  { %5529 = vrcp.f32 %v3015_v49  ;;  %v3154_v61 = vpack.c.bf16 %v3122_v21, %v3122_v21  ;;  %v3521_v49 = vunpack.c.l.b16 %v2370_v51 }
 0x5a1   :  { %v7648_v40 = vpop.eup %5525  ;;  %v2972_v56 = vmul.f32 1.442695, %v2915_v0  ;;  %v2960_v9 = vmul.f32 1.442695, %v2909_v10 }
 0x5a2   :  { %v7652_v63 = vpop.eup %5527  ;;  %v3034_v44 = vsel %vm1417_vm0, %v7648_v40, 0.0  ;;  %v3292_v50 = vunpack.c.l.b16 %v3154_v61 }
 0x5a3   :  { %5531 = vpow2.f32 %v2972_v56  ;;  %v3040_v36 = vsel %vm1417_vm0, %v7652_v63, 0.0  ;;  %3035 = vadd.xlane.f32.xlu1 %v3034_v44  ;;  %v3523_v44 = vpack.c.b16 %v3522_v27, %v3521_v49 }
 0x5a4   :  { %5533 = vpow2.f32 %v2960_v9  ;;  %3041 = vadd.xlane.f32.xlu0 %v3040_v36 }
 0x5a6   :  { %v5530_v33 = vpop.eup %5529  ;;  %v2868_v26 = vpop.xlane.xlu1 %2867 }
 0x5a7   :  { %v3123_v4 = vmul.f32 %v5530_v33, %v7565_v23  ;;  %v2874_v6 = vpop.xlane.xlu0 %2873  ;;  %v2914_v14 = vsub.f32 %v7543_v41, %v2868_v26  ;;  %v2863_v23 = vsel %vm1417_vm0, %v7661_v31, -inf }
 0x5a8   :  { %v2916_v60 = vsub.f32 %v7573_v13, %v2874_v6  ;;  %v7690_v6 = vpop.f32.mrf.mxu2 }
 0x5a9   :  { %v7666_v0 = vpop.eup %5531  ;;  %v3155_v10 = vpack.c.bf16 %v3123_v4, %v3123_v4  ;;  %v2970_v34 = vmul.f32 1.442695, %v2914_v14  ;;  %v2878_v14 = vsel %vm1417_vm0, %v7690_v6, -inf }
 0x5aa   :  { %v7668_v19 = vpop.eup %5533  ;;  %v2974_v56 = vmul.f32 1.442695, %v2916_v60  ;;  %v3061_v9 = vsel %vm1417_vm0, %v7666_v0, 0.0  ;;  %v3018_v60 = vpop.xlane.xlu2 %3017 }
 0x5ab   :  { %v3293_v16 = vunpack.c.l.b16 %v3155_v10  ;;  %5535 = vpow2.f32 %v2970_v34  ;;  %3062 = vadd.xlane.f32.xlu2 %v3061_v9  ;;  %v3043_v41 = vsel %vm1417_vm0, %v7668_v19, 0.0 }
 0x5ac   :  { %5537 = vpow2.f32 %v2974_v56  ;;  %2864 = vmax.xlane.f32.xlu0 %v2863_v23  ;;  %3044 = vadd.xlane.f32.xlu1 %v3043_v41  ;;  %v9066_v56 = vld [vmem:[#allocation36_spill] sm:$0xff] }
 0x5ad   :  { %v3294_v13 = vpack.c.b16 %v3293_v16, %v3292_v50  ;;  %v891_v9 = vadd.f32 %v9066_v56, %v9027_v5  ;;  %v9067_v23 = vld [vmem:[#allocation24_spill] sm:$0xff] }
 0x5ae   :  { %v2877_v21 = vpop.xlane.xlu1 %2876  ;;  %v893_v50 = vadd.f32 %v9067_v23, %v9027_v5 }
 0x5af   :  { %5185 = vmatmul.msk.bf16.vlgmr.msrb.gmra.mxu0 %vm1417_vm0, %v3294_v13  ;;  %v2917_v36 = vsub.f32 %v7585_v8, %v2877_v21  ;;  %v2372_v13 = vpack.c.bf16 %v891_v9, %v891_v9 }
 0x5b0   :  { %3535 = vmatpush.bf16.msrb.mxu0 %v3523_v44  ;;  %v2373_v21 = vpack.c.bf16 %v893_v50, %v893_v50 }
 0x5b1   :  { %v7678_v51 = vpop.eup %5535  ;;  %v2976_v33 = vmul.f32 1.442695, %v2917_v36 }
 0x5b2   :  { %v7680_v45 = vpop.eup %5537  ;;  %v3058_v26 = vsel %vm1417_vm0, %v7678_v51, 0.0  ;;  %v3027_v49 = vpop.xlane.xlu2 %3026  ;;  %v3550_v23 = vunpack.c.l.b16 %v2373_v21 }
 0x5b3   :  { %5539 = vpow2.f32 %v2976_v33  ;;  %v3064_v61 = vsel %vm1417_vm0, %v7680_v45, 0.0 }
 0x5b4   :  { %3065 = vadd.xlane.f32.xlu0 %v3064_v61  ;;  %3059 = vadd.xlane.f32.xlu1 %v3058_v26  ;;  %5541 = vrcp.f32 %v3018_v60  ;;  %v3549_v60 = vunpack.c.l.b16 %v2372_v13 }
 0x5b9   :  { %v7686_v4 = vpop.eup %5539 }
 0x5ba   :  { %v3067_v8 = vsel %vm1417_vm0, %v7686_v4, 0.0  ;;  %v5542_v27 = vpop.eup %5541 }
 0x5bb   :  { %v3124_v16 = vmul.f32 %v5542_v27, %v7577_v53  ;;  %v9069_v53 = vld [vmem:[#allocation44_spill] sm:$0xff] }
 0x5bc   :  { %3068 = vadd.xlane.f32.xlu1 %v3067_v8  ;;  %v898_v27 = vadd.f32 %v9069_v53, %v9027_v5 }
 0x5bd   :  { %v3156_v36 = vpack.c.bf16 %v3124_v16, %v3124_v16 }
 0x5be   :  { %v3039_v10 = vpop.xlane.xlu2 %3038  ;;  %v2375_v13 = vpack.c.bf16 %v898_v27, %v898_v27 }
 0x5bf   :  { %v3320_v50 = vunpack.c.l.b16 %v3156_v36 }
 0x5c4   :  { %2879 = vmax.xlane.f32.xlu1 %v2878_v14 }
 0x5c6   :  { %v3030_v41 = vpop.xlane.xlu2 %3029 }
 0x5fe   :  { %v3021_v34 = vpop.xlane.xlu0 %3020 }
 0x5ff   :  { %5543 = vrcp.f32 %v3021_v34  ;;  %v9068_v34 = vld [vmem:[#allocation23_spill] sm:$0xff] }
 0x600   :  { %5545 = vrcp.f32 %v3027_v49  ;;  %v896_v56 = vadd.f32 %v9068_v34, %v9027_v5 }
 0x605   :  { %v5544_v44 = vpop.eup %5543 }
 0x606   :  { %v3125_v33 = vmul.f32 %v5544_v44, %v7615_v57  ;;  %v2856_v26 = vpop.xlane.xlu0 %2855  ;;  %v3024_v61 = vpop.xlane.xlu1 %3023  ;;  %v2374_v44 = vpack.c.bf16 %v896_v56, %v896_v56  ;;  %v3578_v56 = vunpack.c.l.b16 %v2375_v13 }
 0x607   :  { %v5546_v8 = vpop.eup %5545  ;;  %v2910_v14 = vsub.f32 %v7619_v24, %v2856_v26  ;;  %5547 = vrcp.f32 %v3024_v61  ;;  %v3551_v26 = vpack.c.b16 %v3550_v23, %v3549_v60  ;;  %v2862_v61 = vpop.xlane.xlu2 %2861 }
 0x608   :  { %v3157_v49 = vpack.c.bf16 %v3125_v33, %v3125_v33  ;;  %5549 = vrcp.f32 %v3030_v41  ;;  %v3127_v57 = vmul.f32 %v5546_v8, %v7587_v32  ;;  %v3577_v36 = vunpack.c.l.b16 %v2374_v44 }
 0x609   :  { %v2962_v9 = vmul.f32 1.442695, %v2910_v14  ;;  %v901_v8 = vadd.f32 %v7199_v59, %v9027_v5 }
 0x60a   :  { %v3321_v16 = vunpack.c.l.b16 %v3157_v49  ;;  %v3159_v54 = vpack.c.bf16 %v3127_v57, %v3127_v57 }
 0x60b   :  { %5551 = vpow2.f32 %v2962_v9  ;;  %v2376_v59 = vpack.c.bf16 %v901_v8, %v901_v8 }
 0x60c   :  { %v3322_v46 = vpack.c.b16 %v3321_v16, %v3320_v50  ;;  %v3349_v23 = vunpack.c.l.b16 %v3159_v54  ;;  %v3579_v50 = vpack.c.b16 %v3578_v56, %v3577_v36 }
 0x60d   :  { %v5548_v24 = vpop.eup %5547 }
 0x60e   :  { %v3126_v33 = vmul.f32 %v5548_v24, %v7625_v29  ;;  %v3033_v21 = vpop.xlane.xlu0 %3032  ;;  %5186 = vmatmul.msk.bf16.vlgmr.msrb.gmra.mxu1 %vm1417_vm0, %v3322_v46  ;;  %v2859_v34 = vpop.xlane.xlu1 %2858  ;;  %v903_v29 = vadd.f32 %v7215_v12, %v9027_v5  ;;  %v2912_v46 = vsub.f32 %v7603_v58, %v2862_v61  ;;  %v3605_v24 = vunpack.c.l.b16 %v2376_v59 }
 0x60f   :  { %v5550_v41 = vpop.eup %5549  ;;  %5553 = vrcp.f32 %v3033_v21  ;;  %3563 = vmatpush.bf16.msrb.mxu1 %v3551_v26  ;;  %v2911_v32 = vsub.f32 %v7634_v48, %v2859_v34  ;;  %v7719_v12 = vpop.f32.mrf.mxu2 }
 0x610   :  { %5555 = vrcp.f32 %v3039_v10  ;;  %v3158_v14 = vpack.c.bf16 %v3126_v33, %v3126_v33  ;;  %v3128_v53 = vmul.f32 %v5550_v41, %v7599_v39  ;;  %v2377_v57 = vpack.c.bf16 %v903_v29, %v903_v29 }
 0x611   :  { %v7711_v60 = vpop.eup %5551  ;;  %v2964_v49 = vmul.f32 1.442695, %v2911_v32  ;;  %v2966_v16 = vmul.f32 1.442695, %v2912_v46  ;;  %v2881_v21 = vsel %vm1417_vm0, %v7719_v12, -inf  ;;  %v7730_v32 = vpop.f32.mrf.mxu3 }
 0x612   :  { %v3348_v27 = vunpack.c.l.b16 %v3158_v14  ;;  %v3046_v48 = vsel %vm1417_vm0, %v7711_v60, 0.0  ;;  %v3160_v5 = vpack.c.bf16 %v3128_v53, %v3128_v53  ;;  %v3606_v61 = vunpack.c.l.b16 %v2377_v57 }
 0x613   :  { %5557 = vpow2.f32 %v2964_v49  ;;  %3047 = vadd.xlane.f32.xlu2 %v3046_v48  ;;  %v2884_v59 = vsel %vm1417_vm0, %v7730_v32, -inf }
 0x614   :  { %v3350_v10 = vpack.c.b16 %v3349_v23, %v3348_v27  ;;  %v3376_v34 = vunpack.c.l.b16 %v3160_v5  ;;  %v3607_v14 = vpack.c.b16 %v3606_v61, %v3605_v24 }
 0x615   :  { %v5554_v9 = vpop.eup %5553 }
 0x616   :  { %v5556_v44 = vpop.eup %5555  ;;  %v3129_v54 = vmul.f32 %v5554_v9, %v7639_v15  ;;  %5187 = vmatmul.msk.bf16.vlgmr.msrb.gmra.mxu2 %vm1417_vm0, %v3350_v10  ;;  %v3036_v39 = vpop.xlane.xlu1 %3035 }
 0x617   :  { %v3042_v58 = vpop.xlane.xlu0 %3041  ;;  %3591 = vmatpush.bf16.msrb.mxu2 %v3579_v50  ;;  %5559 = vrcp.f32 %v3036_v39  ;;  %v3131_v33 = vmul.f32 %v5556_v44, %v7595_v1 }
 0x618   :  { %v3161_v26 = vpack.c.bf16 %v3129_v54, %v3129_v54  ;;  %5561 = vpow2.f32 %v2966_v16  ;;  %v5316_v16 = vld [vmem:[%s8753_s3 + $0x38] sm:$0xff] }
 0x619   :  { %v7723_v13 = vpop.eup %5557  ;;  %5563 = vrcp.f32 %v3042_v58  ;;  %v3163_v56 = vpack.c.bf16 %v3131_v33, %v3131_v33  ;;  %v7745_v5 = vpop.f32.mrf.mxu3 }
 0x61a   :  { %v3377_v41 = vunpack.c.l.b16 %v3161_v26  ;;  %v3049_v15 = vsel %vm1417_vm0, %v7723_v13, 0.0 }
 0x61b   :  { %2882 = vmax.xlane.f32.xlu2 %v2881_v21  ;;  %3050 = vadd.xlane.f32.xlu0 %v3049_v15  ;;  %v3405_v10 = vunpack.c.l.b16 %v3163_v56  ;;  %v2887_v21 = vsel %vm1417_vm0, %v7745_v5, -inf  ;;  %v5314_v15 = vld [vmem:[%s8753_s3 + $0x28] sm:$0xff] }
 0x61c   :  { %v3378_v36 = vpack.c.b16 %v3377_v41, %v3376_v34 }
 0x61d   :  { %v5560_v8 = vpop.eup %5559 }
 0x61e   :  { %v3130_v1 = vmul.f32 %v5560_v8, %v7648_v40  ;;  %5188 = vmatmul.msk.bf16.vlgmr.msrb.gmra.mxu3 %vm1417_vm0, %v3378_v36  ;;  %v7734_v29 = vpop.eup %5561  ;;  %v3063_v27 = vpop.xlane.xlu2 %3062  ;;  %v5324_v8 = vld [vmem:[%s8753_s3 + $0x78] sm:$0xff] }
 0x61f   :  { %v2865_v46 = vpop.xlane.xlu0 %2864  ;;  %3619 = vmatpush.bf16.msrb.mxu3 %v3607_v14  ;;  %v3045_v49 = vpop.xlane.xlu1 %3044  ;;  %v3052_v40 = vsel %vm1417_vm0, %v7734_v29, 0.0 }
 0x620   :  { %v5564_v23 = vpop.eup %5563  ;;  %v3162_v53 = vpack.c.bf16 %v3130_v1, %v3130_v1  ;;  %v2913_v48 = vsub.f32 %v7661_v31, %v2865_v46  ;;  %5565 = vrcp.f32 %v3045_v49  ;;  %v5313_v46 = vld [vmem:[%s8753_s3 + $0x20] sm:$0xff] }
 0x621   :  { %v3132_v57 = vmul.f32 %v5564_v23, %v7652_v63  ;;  %5567 = vrcp.f32 %v3063_v27  ;;  %v5315_v63 = vld [vmem:[%s8753_s3 + $0x30] sm:$0xff] }
 0x622   :  { %v3404_v9 = vunpack.c.l.b16 %v3162_v53  ;;  %v2968_v50 = vmul.f32 1.442695, %v2913_v48 }
 0x623   :  { %2885 = vmax.xlane.f32.xlu2 %v2884_v59  ;;  %3053 = vadd.xlane.f32.xlu0 %v3052_v40  ;;  %v3164_v54 = vpack.c.bf16 %v3132_v57, %v3132_v57  ;;  %v5312_v59 = vld [vmem:[%s8753_s3 + $0x18] sm:$0xff] }
 0x624   :  { %v3406_v31 = vpack.c.b16 %v3405_v10, %v3404_v9  ;;  %5569 = vpow2.f32 %v2968_v50 }
 0x625   :  { %v3432_v34 = vunpack.c.l.b16 %v3164_v54 }
 0x626   :  { %v5566_v44 = vpop.eup %5565  ;;  %5189 = vmatmul.msk.bf16.vlgmr.msra.gmra.mxu0 %vm1417_vm0, %v3406_v31 }
 0x627   :  { %v3133_v39 = vmul.f32 %v5566_v44, %v7668_v19  ;;  %v3066_v58 = vpop.xlane.xlu0 %3065  ;;  %v3060_v24 = vpop.xlane.xlu1 %3059  ;;  %3980 = vmatpush.bf16.msra.mxu0 %v5316_v16 }
 0x628   :  { %v5568_v26 = vpop.eup %5567  ;;  %5571 = vrcp.f32 %v3060_v24  ;;  %v3201_v44 = vpop.f32.mrf.mxu0 }
 0x629   :  { %v3165_v61 = vpack.c.bf16 %v3133_v39, %v3133_v39  ;;  %5573 = vrcp.f32 %v3066_v58  ;;  %v3139_v36 = vmul.f32 %v5568_v26, %v7666_v0  ;;  %v5323_v0 = vld [vmem:[%s8753_s3 + $0x70] sm:$0xff]  ;;  %v5321_v39 = vld [vmem:[%s8753_s3 + $0x60] sm:$0xff]  ;;  %v5310_v26 = vld [vmem:[%s8753_s3 + $0x8] sm:$0xff] }
 0x62a   :  { %v7752_v33 = vpop.eup %5569 }
 0x62b   :  { %v3433_v41 = vunpack.c.l.b16 %v3165_v61  ;;  %v3055_v19 = vsel %vm1417_vm0, %v7752_v33, 0.0  ;;  %2888 = vmax.xlane.f32.xlu0 %v2887_v21  ;;  %3981 = vmatpush.bf16.msra.mxu0 %v5315_v63  ;;  %v3171_v23 = vpack.c.bf16 %v3139_v36, %v3139_v36  ;;  %v2251_v21 = vpack.c.bf16 %v7289_v17, %v7289_v17 }
 0x62c   :  { %3056 = vadd.xlane.f32.xlu1 %v3055_v19  ;;  %v5319_v19 = vld [vmem:[%s8753_s3 + $0x50] sm:$0xff] }
 0x62d   :  { %v3434_v14 = vpack.c.b16 %v3433_v41, %v3432_v34  ;;  %v3517_v10 = vunpack.c.l.b16 %v3171_v23  ;;  %v5309_v34 = vld [vmem:[%s8753_s3] sm:$0xff]  ;;  %v2250_v41 = vpack.c.bf16 %v7282_v3, %v7282_v3  ;;  %v3691_v36 = vunpack.c.l.b16 %v2251_v21 }
 0x62e   :  { %v5572_v56 = vpop.eup %5571  ;;  %v5317_v23 = vld [vmem:[%s8753_s3 + $0x40] sm:$0xff] }
 0x62f   :  { %5190 = vmatmul.msk.bf16.vlgmr.msra.gmra.mxu1 %vm1417_vm0, %v3434_v14  ;;  %v3069_v1 = vpop.xlane.xlu1 %3068  ;;  %3982 = vmatpush.bf16.msra.mxu0 %v5314_v15  ;;  %v5574_v49 = vpop.eup %5573  ;;  %v3138_v53 = vmul.f32 %v5572_v56, %v7678_v51  ;;  %v5322_v51 = vld [vmem:[%s8753_s3 + $0x68] sm:$0xff]  ;;  %v3690_v56 = vunpack.c.l.b16 %v2250_v41 }
 0x630   :  { %5575 = vrcp.f32 %v3069_v1  ;;  %4069 = vmatpush.bf16.msra.mxu1 %v5324_v8  ;;  %v3140_v48 = vmul.f32 %v5574_v49, %v7680_v45  ;;  %v5311_v45 = vld [vmem:[%s8753_s3 + $0x10] sm:$0xff]  ;;  %v3203_v8 = vpop.f32.mrf.mxu0  ;;  %v5318_v14 = vld [vmem:[%s8753_s3 + $0x48] sm:$0xff]  ;;  %v3229_v49 = vpop.f32.mrf.mxu1 }
 0x631   :  { %v3170_v27 = vpack.c.bf16 %v3138_v53, %v3138_v53  ;;  %v3627_v3 = vpack.c.bf16 %v3203_v8, %v3203_v8  ;;  %v3722_v1 = vpack.c.b16 %v3691_v36, %v3690_v56 }
 0x632   :  { %v3172_v57 = vpack.c.bf16 %v3140_v48, %v3140_v48  ;;  %v2253_v48 = vpack.c.bf16 %v7306_v30, %v7306_v30  ;;  %v2254_v30 = vpack.c.bf16 %v7295_v52, %v7295_v52 }
 0x633   :  { %3983 = vmatpush.bf16.msra.mxu0 %v5313_v46  ;;  %v3516_v9 = vunpack.c.l.b16 %v3170_v27  ;;  %v3626_v46 = vpack.c.bf16 %v3201_v44, %v3201_v44  ;;  %v3787_v53 = vunpack.c.l.b16 %v3627_v3 }
 0x634   :  { %4070 = vmatpush.bf16.msra.mxu1 %v5323_v0  ;;  %v3544_v63 = vunpack.c.l.b16 %v3172_v57  ;;  %v3628_v57 = vpack.c.bf16 %v3229_v49, %v3229_v49 }
 0x635   :  { %v3518_v40 = vpack.c.b16 %v3517_v10, %v3516_v9  ;;  %v3786_v0 = vunpack.c.l.b16 %v3626_v46  ;;  %v3693_v10 = vunpack.c.l.b16 %v2253_v48  ;;  %v2259_v46 = vpack.c.bf16 %v7318_v2, %v7318_v2 }
 0x636   :  { %v5576_v50 = vpop.eup %5575  ;;  %v2261_v2 = vpack.c.bf16 %v7332_v42, %v7332_v42 }
 0x637   :  { %v3141_v16 = vmul.f32 %v5576_v50, %v7686_v4  ;;  %v2880_v31 = vpop.xlane.xlu1 %2879  ;;  %3984 = vmatpush.bf16.msra.mxu0 %v5312_v59  ;;  %v3818_v27 = vpack.c.b16 %v3787_v53, %v3786_v0  ;;  %v2252_v59 = vpack.c.bf16 %v7297_v7, %v7297_v7  ;;  %v3699_v49 = vunpack.c.l.b16 %v2259_v46 }
 0x638   :  { %5193 = vmatmul.msk.bf16.vlgmr.msrb.gmra.mxu0 %vm1417_vm0, %v3518_v40  ;;  %v2918_v54 = vsub.f32 %v7690_v6, %v2880_v31  ;;  %4071 = vmatpush.bf16.msra.mxu1 %v5322_v51  ;;  %v5320_v6 = vld [vmem:[%s8753_s3 + $0x58] sm:$0xff]  ;;  %v3231_v9 = vpop.f32.mrf.mxu1 }
 0x639   :  { %v3173_v58 = vpack.c.bf16 %v3141_v16, %v3141_v16  ;;  %v3692_v51 = vunpack.c.l.b16 %v2252_v59  ;;  %v3629_v50 = vpack.c.bf16 %v3231_v9, %v3231_v9  ;;  %v3257_v16 = vpop.f32.mrf.mxu2 }
 0x63a   :  { %v2978_v24 = vmul.f32 1.442695, %v2918_v54  ;;  %v2255_v54 = vpack.c.bf16 %v7304_v37, %v7304_v37  ;;  %v2256_v37 = vpack.c.bf16 %v7312_v22, %v7312_v22 }
 0x63b   :  { %v3545_v4 = vunpack.c.l.b16 %v3173_v58  ;;  %3985 = vmatpush.bf16.msra.mxu0 %v5311_v45  ;;  %v3723_v40 = vpack.c.b16 %v3693_v10, %v3692_v51  ;;  %v3789_v31 = vunpack.c.l.b16 %v3629_v50  ;;  %v3788_v45 = vunpack.c.l.b16 %v3628_v57 }
 0x63c   :  { %5577 = vpow2.f32 %v2978_v24  ;;  %4072 = vmatpush.bf16.msra.mxu1 %v5321_v39  ;;  %v3695_v39 = vunpack.c.l.b16 %v2255_v54  ;;  %v3694_v58 = vunpack.c.l.b16 %v2254_v30 }
 0x63d   :  { %v3546_v61 = vpack.c.b16 %v3545_v4, %v3544_v63  ;;  %v3819_v44 = vpack.c.b16 %v3789_v31, %v3788_v45  ;;  %v3630_v4 = vpack.c.bf16 %v3257_v16, %v3257_v16  ;;  %v2260_v16 = vpack.c.bf16 %v7324_v62, %v7324_v62 }
 0x63e   :  { %v3724_v63 = vpack.c.b16 %v3695_v39, %v3694_v58  ;;  %v3701_v45 = vunpack.c.l.b16 %v2261_v2 }
 0x63f   :  { %5194 = vmatmul.msk.bf16.vlgmr.msrb.gmra.mxu1 %vm1417_vm0, %v3546_v61  ;;  %3986 = vmatpush.bf16.msra.mxu0 %v5310_v26  ;;  %v3285_v26 = vpop.f32.mrf.mxu3  ;;  %v3790_v61 = vunpack.c.l.b16 %v3630_v4  ;;  %v3700_v30 = vunpack.c.l.b16 %v2260_v16 }
 0x640   :  { %4073 = vmatpush.bf16.msra.mxu1 %v5320_v6 }
 0x641   :  { %v3259_v7 = vpop.f32.mrf.mxu2 }
 0x642   :  { %v7806_v15 = vpop.eup %5577  ;;  %v3631_v24 = vpack.c.bf16 %v3259_v7, %v3259_v7 }
 0x643   :  { %3987 = vmatpush.bf16.msra.mxu0 %v5309_v34  ;;  %v3070_v17 = vsel %vm1417_vm0, %v7806_v15, 0.0  ;;  %v2257_v34 = vpack.c.bf16 %v7320_v18, %v7320_v18  ;;  %v2258_v18 = vpack.c.bf16 %v7310_v47, %v7310_v47 }
 0x644   :  { %4074 = vmatpush.bf16.msra.mxu1 %v5319_v19  ;;  %3071 = vadd.xlane.f32.xlu1 %v3070_v17  ;;  %v3791_v6 = vunpack.c.l.b16 %v3631_v24  ;;  %v3696_v19 = vunpack.c.l.b16 %v2256_v37  ;;  %v3632_v17 = vpack.c.bf16 %v3285_v26, %v3285_v26 }
 0x645   :  { %v3697_v41 = vunpack.c.l.b16 %v2257_v34 }
 0x646   :  { %v3820_v21 = vpack.c.b16 %v3791_v6, %v3790_v61  ;;  %v3792_v3 = vunpack.c.l.b16 %v3632_v17 }
 0x647   :  { %v3287_v52 = vpop.f32.mrf.mxu3  ;;  %v3725_v8 = vpack.c.b16 %v3697_v41, %v3696_v19 }
 0x648   :  { %3988 = vmatmul.bf16.vlgmr.msra.gmra.mxu0 %v3722_v1  ;;  %4075 = vmatpush.bf16.msra.mxu1 %v5318_v14  ;;  %v3633_v36 = vpack.c.bf16 %v3287_v52, %v3287_v52  ;;  %v3313_v14 = vpop.f32.mrf.mxu0 }
 0x649   :  { %v3634_v48 = vpack.c.bf16 %v3313_v14, %v3313_v14 }
 0x64a   :  { %v3793_v56 = vunpack.c.l.b16 %v3633_v36 }
 0x64b   :  { %v3794_v10 = vunpack.c.l.b16 %v3634_v48 }
 0x64c   :  { %4076 = vmatpush.bf16.msra.mxu1 %v5317_v23  ;;  %v3821_v1 = vpack.c.b16 %v3793_v56, %v3792_v3  ;;  %v3698_v23 = vunpack.c.l.b16 %v2258_v18  ;;  %v2262_v56 = vpack.c.bf16 %v7326_v38, %v7326_v38 }
 0x64f   :  { %4077 = vmatmul.bf16.vlgmr.msra.gmra.mxu1 %v3818_v27  ;;  %v3726_v27 = vpack.c.b16 %v3699_v49, %v3698_v23 }
 0x650   :  { %v3315_v22 = vpop.f32.mrf.mxu0 }
 0x651   :  { %v3635_v53 = vpack.c.bf16 %v3315_v22, %v3315_v22  ;;  %v3702_v22 = vunpack.c.l.b16 %v2262_v56 }
 0x653   :  { %v3795_v59 = vunpack.c.l.b16 %v3635_v53 }
 0x655   :  { %v3822_v51 = vpack.c.b16 %v3795_v59, %v3794_v10 }
 0x658   :  { %3993 = vmatmul.bf16.gmra.mxu0 %v3723_v40 }
 0x65f   :  { %4082 = vmatmul.bf16.gmra.mxu1 %v3819_v44 }
 0x668   :  { %3998 = vmatmul.bf16.gmra.mxu0 %v3724_v63 }
 0x66f   :  { %4087 = vmatmul.bf16.gmra.mxu1 %v3820_v21 }
 0x678   :  { %4003 = vmatmul.bf16.gmra.mxu0 %v3725_v8 }
 0x67f   :  { %4092 = vmatmul.bf16.gmra.mxu1 %v3821_v1 }
 0x686   :  { %v3048_v0 = vpop.xlane.xlu2 %3047 }
 0x687   :  { %5579 = vrcp.f32 %v3048_v0 }
 0x688   :  { %4008 = vmatmul.bf16.gmra.mxu0 %v3726_v27 }
 0x68b   :  { %v3341_v9 = vpop.f32.mrf.mxu1 }
 0x68c   :  { %v3636_v4 = vpack.c.bf16 %v3341_v9, %v3341_v9 }
 0x68d   :  { %v5580_v57 = vpop.eup %5579 }
 0x68e   :  { %v2883_v50 = vpop.xlane.xlu2 %2882  ;;  %v3051_v40 = vpop.xlane.xlu0 %3050  ;;  %v3134_v44 = vmul.f32 %v5580_v57, %v7711_v60 }
 0x68f   :  { %v2919_v47 = vsub.f32 %v7719_v12, %v2883_v50  ;;  %5581 = vrcp.f32 %v3051_v40  ;;  %4097 = vmatmul.bf16.gmra.mxu1 %v3822_v51  ;;  %v3727_v12 = vpack.c.b16 %v3701_v45, %v3700_v30  ;;  %v2264_v45 = vpack.c.bf16 %v7338_v43, %v7338_v43 }
 0x690   :  { %v3166_v42 = vpack.c.bf16 %v3134_v44, %v3134_v44 }
 0x691   :  { %v2980_v31 = vmul.f32 1.442695, %v2919_v47  ;;  %v3704_v30 = vunpack.c.l.b16 %v2264_v45  ;;  %v9072_v45 = vld [vmem:[#allocation41_spill] sm:$0xff] }
 0x692   :  { %v3460_v34 = vunpack.c.l.b16 %v3166_v42 }
 0x693   :  { %5583 = vpow2.f32 %v2980_v31  ;;  %v3343_v54 = vpop.f32.mrf.mxu1 }
 0x694   :  { %v3637_v7 = vpack.c.bf16 %v3343_v54, %v3343_v54 }
 0x695   :  { %v5582_v39 = vpop.eup %5581 }
 0x696   :  { %v3135_v58 = vmul.f32 %v5582_v39, %v7723_v13  ;;  %v2886_v24 = vpop.xlane.xlu2 %2885  ;;  %v3054_v63 = vpop.xlane.xlu0 %3053  ;;  %v3797_v61 = vunpack.c.l.b16 %v3637_v7  ;;  %v3796_v13 = vunpack.c.l.b16 %v3636_v4 }
 0x697   :  { %v2920_v26 = vsub.f32 %v7730_v32, %v2886_v24  ;;  %5585 = vrcp.f32 %v3054_v63  ;;  %v2263_v32 = vpack.c.bf16 %v7334_v28, %v7334_v28 }
 0x698   :  { %v3167_v6 = vpack.c.bf16 %v3135_v58, %v3135_v58  ;;  %4013 = vmatmul.bf16.gmra.mxu0 %v3727_v12  ;;  %v3823_v19 = vpack.c.b16 %v3797_v61, %v3796_v13 }
 0x699   :  { %v7840_v62 = vpop.eup %5583  ;;  %v2982_v60 = vmul.f32 1.442695, %v2920_v26  ;;  %v3369_v21 = vpop.f32.mrf.mxu2  ;;  %v3703_v46 = vunpack.c.l.b16 %v2263_v32 }
 0x69a   :  { %v3461_v37 = vunpack.c.l.b16 %v3167_v6  ;;  %v3073_v41 = vsel %vm1417_vm0, %v7840_v62, 0.0  ;;  %v3638_v38 = vpack.c.bf16 %v3369_v21, %v3369_v21 }
 0x69b   :  { %5587 = vpow2.f32 %v2982_v60  ;;  %3074 = vadd.xlane.f32.xlu2 %v3073_v41  ;;  %v3728_v0 = vpack.c.b16 %v3703_v46, %v3702_v22 }
 0x69c   :  { %v3462_v52 = vpack.c.b16 %v3461_v37, %v3460_v34  ;;  %v3798_v50 = vunpack.c.l.b16 %v3638_v38  ;;  %v5668_v38 = vld [vmem:[%s8751_s0 + $0x8] sm:$0xff] }
 0x69d   :  { %v5586_v14 = vpop.eup %5585 }
 0x69e   :  { %5191 = vmatmul.msk.bf16.vlgmr.msra.gmra.mxu2 %vm1417_vm0, %v3462_v52  ;;  %v2889_v36 = vpop.xlane.xlu0 %2888  ;;  %v3136_v49 = vmul.f32 %v5586_v14, %v7734_v29  ;;  %v7878_v52 = vld [vmem:[%s8754_s4] ss:$0 sm:$0xff] }
 0x69f   :  { %v2921_v8 = vsub.f32 %v7745_v5, %v2889_v36  ;;  %4102 = vmatmul.bf16.gmra.mxu1 %v3823_v19  ;;  %v3057_v17 = vpop.xlane.xlu1 %3056  ;;  %v9070_v19 = vpack.c.b16 %v7362_v20, %v7360_v55 }
 0x6a0   :  { %5589 = vrcp.f32 %v3057_v17  ;;  %v3168_v27 = vpack.c.bf16 %v3136_v49, %v3136_v49 }
 0x6a1   :  { %v7850_v3 = vpop.eup %5587  ;;  %v2984_v1 = vmul.f32 1.442695, %v2921_v8  ;;  %v3371_v18 = vpop.f32.mrf.mxu2 }
 0x6a2   :  { %v3076_v28 = vsel %vm1417_vm0, %v7850_v3, 0.0  ;;  %v3639_v23 = vpack.c.bf16 %v3371_v18, %v3371_v18  ;;  %v3397_v59 = vpop.f32.mrf.mxu3  ;;  %v3488_v2 = vunpack.c.l.b16 %v3168_v27  ;;  %v5667_v18 = vld [vmem:[%s8751_s0] sm:$0xff] }
 0x6a3   :  { %5591 = vpow2.f32 %v2984_v1  ;;  %3077 = vadd.xlane.f32.xlu0 %v3076_v28  ;;  %v3425_v5 = vpop.f32.mrf.mxu0  ;;  %v3640_v24 = vpack.c.bf16 %v3397_v59, %v3397_v59 }
 0x6a4   :  { %v3799_v51 = vunpack.c.l.b16 %v3639_v23  ;;  %v3642_v13 = vpack.c.bf16 %v3425_v5, %v3425_v5 }
 0x6a5   :  { %v3800_v12 = vunpack.c.l.b16 %v3640_v24 }
 0x6a6   :  { %v5590_v53 = vpop.eup %5589  ;;  %v3824_v31 = vpack.c.b16 %v3799_v51, %v3798_v50  ;;  %v3802_v36 = vunpack.c.l.b16 %v3642_v13 }
 0x6a7   :  { %v3137_v48 = vmul.f32 %v5590_v53, %v7752_v33  ;;  %v2265_v33 = vpack.c.bf16 %v7354_v35, %v7354_v35 }
 0x6a8   :  { %4018 = vmatmul.bf16.gmra.mxu0 %v3728_v0  ;;  %v9071_v0 = vpack.c.b16 %v7378_v11, %v7376_v25  ;;  %v5669_v25 = vld [vmem:[%s8751_s0 + $0x10] sm:$0xff] }
 0x6a9   :  { %v7856_v10 = vpop.eup %5591  ;;  %v3169_v9 = vpack.c.bf16 %v3137_v48, %v3137_v48  ;;  %v3705_v44 = vunpack.c.l.b16 %v2265_v33 }
 0x6aa   :  { %v3079_v29 = vsel %vm1417_vm0, %v7856_v10, 0.0  ;;  %v3399_v54 = vpop.f32.mrf.mxu3 }
 0x6ab   :  { %v3489_v40 = vunpack.c.l.b16 %v3169_v9  ;;  %v3427_v57 = vpop.f32.mrf.mxu0  ;;  %3080 = vadd.xlane.f32.xlu1 %v3079_v29  ;;  %v3641_v7 = vpack.c.bf16 %v3399_v54, %v3399_v54  ;;  %v3729_v58 = vpack.c.b16 %v3705_v44, %v3704_v30  ;;  %v9073_v44 = vld [vmem:[#allocation42_spill] sm:$0xff]  ;;  %v5670_v30 = vld [vmem:[%s8751_s0 + $0x18] sm:$0xff] }
 0x6ac   :  { %v3453_v47 = vpop.f32.mrf.mxu1  ;;  %v3643_v37 = vpack.c.bf16 %v3427_v57, %v3427_v57  ;;  %v9074_v54 = vpack.c.b16 %v9072_v45, %v9073_v44 }
 0x6ad   :  { %v3490_v16 = vpack.c.b16 %v3489_v40, %v3488_v2  ;;  %v3801_v63 = vunpack.c.l.b16 %v3641_v7  ;;  %v3644_v23 = vpack.c.bf16 %v3453_v47, %v3453_v47 }
 0x6ae   :  { %v3803_v32 = vunpack.c.l.b16 %v3643_v37 }
 0x6af   :  { %5192 = vmatmul.msk.bf16.vlgmr.msra.gmra.mxu3 %vm1417_vm0, %v3490_v16  ;;  %4107 = vmatmul.bf16.gmra.mxu1 %v3824_v31  ;;  %v3825_v35 = vpack.c.b16 %v3801_v63, %v3800_v12  ;;  %v3804_v59 = vunpack.c.l.b16 %v3644_v23 }
 0x6b0   :  { %v3826_v1 = vpack.c.b16 %v3803_v32, %v3802_v36 }
 0x6b4   :  { %v3455_v39 = vpop.f32.mrf.mxu1 }
 0x6b5   :  { %v3537_v42 = vpop.f32.mrf.mxu0  ;;  %v3645_v20 = vpack.c.bf16 %v3455_v39, %v3455_v39 }
 0x6b6   :  { %v3650_v4 = vpack.c.bf16 %v3537_v42, %v3537_v42 }
 0x6b7   :  { %v3805_v27 = vunpack.c.l.b16 %v3645_v20  ;;  %v3072_v32 = vpop.xlane.xlu1 %3071 }
 0x6b8   :  { %4023 = vmatmul.bf16.gmra.mxu0 %v3729_v58  ;;  %v7867_v60 = vunpack.c.l.b16 %v3650_v4  ;;  %v9075_v4 = vld [vmem:[#allocation32_spill] sm:$0xff]  ;;  %5593 = vrcp.f32 %v3072_v32 }
 0x6b9   :  { %v3827_v50 = vpack.c.b16 %v3805_v27, %v3804_v59  ;;  %v9082_v59 = vld [vmem:[#allocation48_spill] sm:$0xff] }
 0x6bc   :  { %v7865_v26 = vpop.f32.mrf.mxu1 }
 0x6bd   :  { %v3539_v6 = vpop.f32.mrf.mxu0 }
 0x6be   :  { %v3651_v61 = vpack.c.bf16 %v3539_v6, %v3539_v6 }
 0x6bf   :  { %4112 = vmatmul.bf16.gmra.mxu1 %v3825_v35  ;;  %v9076_v35 = vld [vmem:[#allocation39_spill] sm:$0xff] }
 0x6c0   :  { %v7869_v43 = vunpack.c.l.b16 %v3651_v61  ;;  %v9077_v6 = vpack.c.b16 %v9075_v4, %v9076_v35 }
 0x6c2   :  { %v3830_v21 = vpack.c.b16 %v7869_v43, %v7867_v60 }
 0x6c4   :  { %v7873_v34 = vpop.f32.mrf.mxu1 }
 0x6c5   :  { %v3989_v41 = vpop.f32.mrf.mxu0 }
 0x6c6   :  { %v3990_v8 = vadd.f32 %v7878_v52, %v3989_v41 }
 0x6c8   :  { %4028 = vmatmul.bf16.gmra.mxu0 %v9070_v19 }
 0x6cc   :  { %v4078_v17 = vpop.f32.mrf.mxu1 }
 0x6cd   :  { %v3991_v14 = vpop.f32.mrf.mxu0  ;;  %v4079_v56 = vadd.f32 %v4078_v17, %v3990_v8  ;;  %v9078_v8 = vld [vmem:[#allocation50_spill] sm:$0xff]  ;;  %v9079_v17 = vld [vmem:[#allocation31_spill] sm:$0xff] }
 0x6ce   :  { %v3992_v49 = vadd.f32 %v7878_v52, %v3991_v14  ;;  %v9080_v14 = vpack.c.b16 %v9078_v8, %v9079_v17 }
 0x6cf   :  { %v4158_v46 = vmax.f32 %v4079_v56, 0.0  ;;  %4117 = vmatmul.bf16.gmra.mxu1 %v3826_v1 }
 0x6d1   :  { %v7887_v28 = vadd.f32 %v5667_v18, %v4158_v46 }
 0x6d3   :  { %4222 = vadd.xlane.f32.xlu2 %v7887_v28 }
 0x6d4   :  { %v4080_v55 = vpop.f32.mrf.mxu1 }
 0x6d5   :  { %v3994_v5 = vpop.f32.mrf.mxu0  ;;  %v4081_v22 = vadd.f32 %v4080_v55, %v3992_v49  ;;  %v5594_v49 = vpop.eup %5593 }
 0x6d6   :  { %v3995_v9 = vadd.f32 %v7878_v52, %v3994_v5  ;;  %v3142_v55 = vmul.f32 %v5594_v49, %v7806_v15 }
 0x6d7   :  { %v4159_v53 = vmax.f32 %v4081_v22, 0.0 }
 0x6d8   :  { %4033 = vmatmul.bf16.gmra.mxu0 %v9071_v0  ;;  %v3174_v22 = vpack.c.bf16 %v3142_v55, %v3142_v55 }
 0x6d9   :  { %v7897_v48 = vadd.f32 %v5668_v38, %v4159_v53  ;;  %v9081_v38 = vld [vmem:[#allocation55_spill] sm:$0xff] }
 0x6db   :  { %4224 = vadd.xlane.f32.xlu0 %v7897_v48 }
 0x6dc   :  { %v4083_v51 = vpop.f32.mrf.mxu1 }
 0x6dd   :  { %v3996_v29 = vpop.f32.mrf.mxu0  ;;  %v4084_v2 = vadd.f32 %v4083_v51, %v3995_v9  ;;  %v9083_v9 = vpack.c.b16 %v9081_v38, %v9082_v59  ;;  %v3572_v51 = vunpack.c.l.b16 %v3174_v22 }
 0x6de   :  { %v3997_v57 = vadd.f32 %v7878_v52, %v3996_v29 }
 0x6df   :  { %v4160_v40 = vmax.f32 %v4084_v2, 0.0  ;;  %4122 = vmatmul.bf16.gmra.mxu1 %v3827_v50 }
 0x6e1   :  { %v7904_v11 = vadd.f32 %v5669_v25, %v4160_v40 }
 0x6e3   :  { %4226 = vadd.xlane.f32.xlu1 %v7904_v11 }
 0x6e4   :  { %v4085_v47 = vpop.f32.mrf.mxu1 }
 0x6e5   :  { %v3999_v16 = vpop.f32.mrf.mxu0  ;;  %v4086_v31 = vadd.f32 %v4085_v47, %v3997_v57 }
 0x6e6   :  { %v4000_v7 = vadd.f32 %v7878_v52, %v3999_v16 }
 0x6e7   :  { %v4161_v33 = vmax.f32 %v4086_v31, 0.0 }
 0x6e8   :  { %4038 = vmatmul.bf16.gmra.mxu0 %v9074_v54  ;;  %v9084_v54 = vld [vmem:[#allocation29_spill] sm:$0xff] }
 0x6e9   :  { %v7914_v39 = vadd.f32 %v5670_v30, %v4161_v33  ;;  %v9085_v30 = vld [vmem:[#allocation54_spill] sm:$0xff] }
 0x6eb   :  { %4228 = vadd.xlane.f32.xlu2 %v7914_v39 }
 0x6ec   :  { %v4088_v42 = vpop.f32.mrf.mxu1 }
 0x6ed   :  { %v7918_v58 = vpop.f32.mrf.mxu0  ;;  %v7920_v24 = vadd.f32 %v4088_v42, %v4000_v7  ;;  %v9086_v7 = vpack.c.b16 %v9084_v54, %v9085_v30 }
 0x6f4   :  { %v7922_v63 = vpop.f32.mrf.mxu1 }
 0x6f5   :  { %v4004_v12 = vpop.f32.mrf.mxu0 }
 0x6f6   :  { %v4005_v61 = vadd.f32 %v7878_v52, %v4004_v12 }
 0x6f8   :  { %4043 = vmatmul.bf16.gmra.mxu0 %v9077_v6 }
 0x6fc   :  { %v4093_v37 = vpop.f32.mrf.mxu1 }
 0x6fd   :  { %v7928_v41 = vadd.f32 %v4093_v37, %v4005_v61  ;;  %v7930_v13 = vpop.f32.mrf.mxu0  ;;  %v5701_v61 = vmov 128.0  }
 0x704   :  { %v7932_v19 = vpop.f32.mrf.mxu1 }
 0x705   :  { %v4009_v36 = vpop.f32.mrf.mxu0 }
 0x706   :  { %v4010_v56 = vadd.f32 %v7878_v52, %v4009_v36 }
 0x708   :  { %4048 = vmatmul.bf16.gmra.mxu0 %v9080_v14 }
 0x70c   :  { %v4098_v1 = vpop.f32.mrf.mxu1 }
 0x70d   :  { %v7938_v46 = vadd.f32 %v4098_v1, %v4010_v56  ;;  %v7941_v20 = vpop.f32.mrf.mxu0  ;;  %v9087_v1 = vld [vmem:[#allocation60_spill] sm:$0xff] }
 0x70e   :  { %v3075_v18 = vpop.xlane.xlu2 %3074  ;;  %v4012_v60 = vadd.f32 %v7878_v52, %v7941_v20 }
 0x70f   :  { %5595 = vrcp.f32 %v3075_v18  ;;  %v9088_v18 = vld [vmem:[#allocation61_spill] sm:$0xff] }
 0x710   :  { %v9089_v49 = vpack.c.b16 %v9087_v1, %v9088_v18  ;;  %v4007_v1 = vadd.f32 %v7878_v52, %v7930_v13 }
 0x714   :  { %v7944_v53 = vpop.f32.mrf.mxu1 }
 0x715   :  { %v5596_v5 = vpop.eup %5595  ;;  %v7949_v50 = vpop.f32.mrf.mxu0 }
 0x716   :  { %v3143_v23 = vmul.f32 %v5596_v5, %v7840_v62  ;;  %v3078_v0 = vpop.xlane.xlu0 %3077 }
 0x717   :  { %5597 = vrcp.f32 %v3078_v0 }
 0x718   :  { %v3175_v27 = vpack.c.bf16 %v3143_v23, %v3143_v23  ;;  %4053 = vmatmul.bf16.gmra.mxu0 %v9083_v9 }
 0x71a   :  { %v3573_v29 = vunpack.c.l.b16 %v3175_v27 }
 0x71c   :  { %v3574_v2 = vpack.c.b16 %v3573_v29, %v3572_v51  ;;  %v7952_v62 = vpop.f32.mrf.mxu1 }
 0x71d   :  { %v5598_v40 = vpop.eup %5597  ;;  %v7956_v33 = vpop.f32.mrf.mxu0 }
 0x71e   :  { %5195 = vmatmul.msk.bf16.vlgmr.msrb.gmra.mxu2 %vm1417_vm0, %v3574_v2  ;;  %v3081_v15 = vpop.xlane.xlu1 %3080  ;;  %v3144_v57 = vmul.f32 %v5598_v40, %v7850_v3 }
 0x71f   :  { %5599 = vrcp.f32 %v3081_v15 }
 0x720   :  { %v3176_v16 = vpack.c.bf16 %v3144_v57, %v3144_v57  ;;  %5601 = vrcp.f32 %v5701_v61  ;;  %v4101_v61 = vadd.f32 %v7944_v53, %v4012_v60 }
 0x721   :  { %v3481_v25 = vpop.f32.mrf.mxu2 }
 0x722   :  { %v3646_v44 = vpack.c.bf16 %v3481_v25, %v3481_v25  ;;  %v3600_v12 = vunpack.c.l.b16 %v3176_v16 }
 0x724   :  { %v7961_v35 = vpop.f32.mrf.mxu1  ;;  %v3806_v37 = vunpack.c.l.b16 %v3646_v44 }
 0x725   :  { %v5600_v47 = vpop.eup %5599  ;;  %v4019_v8 = vpop.f32.mrf.mxu0 }
 0x726   :  { %v3145_v31 = vmul.f32 %v5600_v47, %v7856_v10  ;;  %v5602_v36 = vpop.eup %5601 }
 0x727   :  { %v4287_v56 = vmul.f32 128.0, %v5602_v36  ;;  %vm4291_vm1 = vweird.f32 %v5602_v36 }
 0x728   :  { %v3177_v45 = vpack.c.bf16 %v3145_v31, %v3145_v31  ;;  %4058 = vmatmul.bf16.gmra.mxu0 %v9086_v7 }
 0x729   :  { %v3483_v42 = vpop.f32.mrf.mxu2  ;;  %v4288_v55 = vsub.f32 1.0, %v4287_v56 }
 0x72a   :  { %v3601_v4 = vunpack.c.l.b16 %v3177_v45  ;;  %v3647_v6 = vpack.c.bf16 %v3483_v42, %v3483_v42  ;;  %v3653_v42 = vpack.c.bf16 %v7873_v34, %v7873_v34  ;;  %v5671_v34 = vld [vmem:[%s8751_s0 + $0x30] sm:$0xff] }
 0x72b   :  { %v4289_v27 = vmul.f32 %v5602_v36, %v4288_v55  ;;  %v5672_v55 = vld [vmem:[%s8751_s0 + $0x48] sm:$0xff] }
 0x72c   :  { %v3602_v3 = vpack.c.b16 %v3601_v4, %v3600_v12  ;;  %v3807_v32 = vunpack.c.l.b16 %v3647_v6  ;;  %v4108_v14 = vpop.f32.mrf.mxu1  ;;  %v4164_v12 = vmax.f32 %v7928_v41, 0.0  ;;  %v3813_v6 = vunpack.c.l.b16 %v3653_v42 }
 0x72d   :  { %v7967_v0 = vpop.f32.mrf.mxu0  ;;  %v4290_v29 = vadd.f32 %v5602_v36, %v4289_v27 }
 0x72e   :  { %v3828_v10 = vpack.c.b16 %v3807_v32, %v3806_v37  ;;  %5196 = vmatmul.msk.bf16.vlgmr.msrb.gmra.mxu3 %vm1417_vm0, %v3602_v3  ;;  %v8009_v41 = vadd.f32 %v5671_v34, %v4164_v12  ;;  %v4167_v37 = vmax.f32 %v4101_v61, 0.0  ;;  %v4022_v42 = vadd.f32 %v7878_v52, %v7967_v0  ;;  %v5679_v0 = vld [vmem:[%s8751_s0 + $0x50] sm:$0xff] }
 0x72f   :  { %v7971_v2 = vsel %vm4291_vm1, %v5602_v36, %v4290_v29  ;;  %v4002_v36 = vadd.f32 %v7878_v52, %v7918_v58  ;;  %v5675_v29 = vld [vmem:[%s8751_s0 + $0x28] sm:$0xff] }
 0x730   :  { %4127 = vmatmul.bf16.gmra.mxu1 %v3828_v10  ;;  %v4162_v10 = vmax.f32 %v7920_v24, 0.0  ;;  %v8030_v24 = vadd.f32 %v5672_v55, %v4167_v37  ;;  %v5680_v37 = vld [vmem:[%s8751_s0 + $0x90] sm:$0xff] }
 0x731   :  { %v4091_v18 = vadd.f32 %v7922_v63, %v4002_v36  ;;  %v5683_v55 = vld [vmem:[%s8751_s0 + $0x70] sm:$0xff] }
 0x732   :  { %v3509_v17 = vpop.f32.mrf.mxu3 }
 0x733   :  { %v3648_v5 = vpack.c.bf16 %v3509_v17, %v3509_v17  ;;  %v4020_v17 = vadd.f32 %v7878_v52, %v4019_v8  ;;  %v4096_v8 = vadd.f32 %v7932_v19, %v4007_v1  ;;  %v4015_v19 = vadd.f32 %v7878_v52, %v7949_v50 }
 0x734   :  { %v7969_v9 = vpop.f32.mrf.mxu1 }
 0x735   :  { %v3808_v38 = vunpack.c.l.b16 %v3648_v5  ;;  %v7973_v15 = vpop.f32.mrf.mxu0  ;;  %v5673_v5 = vld [vmem:[%s8751_s0 + $0x20] sm:$0xff] }
 0x736   :  { %v8038_v13 = vadd.f32 %v5673_v5, %v4162_v10  ;;  %v5684_v5 = vld [vmem:[%s8751_s0 + $0x80] sm:$0xff] }
 0x738   :  { %4063 = vmatmul.bf16.gmra.mxu0 %v9089_v49  ;;  %v4109_v49 = vadd.f32 %v4108_v14, %v4020_v17  ;;  %v4163_v14 = vmax.f32 %v4091_v18, 0.0 }
 0x73a   :  { %v3511_v22 = vpop.f32.mrf.mxu3 }
 0x73b   :  { %v3649_v23 = vpack.c.bf16 %v3511_v22, %v3511_v22  ;;  %v4170_v22 = vmax.f32 %v4109_v49, 0.0 }
 0x73c   :  { %v7976_v57 = vpop.f32.mrf.mxu1 }
 0x73d   :  { %v3809_v59 = vunpack.c.l.b16 %v3649_v23  ;;  %v4026_v44 = vpop.f32.mrf.mxu0  ;;  %v4165_v23 = vmax.f32 %v4096_v8, 0.0 }
 0x73e   :  { %v4027_v27 = vadd.f32 %v7878_v52, %v4026_v44 }
 0x73f   :  { %v3829_v51 = vpack.c.b16 %v3809_v59, %v3808_v38  ;;  %v5674_v59 = vld [vmem:[%s8751_s0 + $0x60] sm:$0xff] }
 0x741   :  { %4132 = vmatmul.bf16.gmra.mxu1 %v3829_v51  ;;  %v8048_v51 = vadd.f32 %v5674_v59, %v4170_v22 }
 0x744   :  { %v4115_v30 = vpop.f32.mrf.mxu1 }
 0x745   :  { %v4116_v38 = vadd.f32 %v4115_v30, %v4027_v27  ;;  %v5685_v27 = vld [vmem:[%s8751_s0 + $0x88] sm:$0xff] }
 0x746   :  { %v4223_v40 = vpop.xlane.xlu2 %4222 }
 0x747   :  { %v4293_v25 = vmul.f32 %v7971_v2, %v4223_v40  ;;  %v8053_v40 = vadd.f32 %v5675_v29, %v4163_v14  ;;  %v4173_v44 = vmax.f32 %v4116_v38, 0.0 }
 0x749   :  { %v7979_v47 = vsub.f32 %v7887_v28, %v4293_v25  ;;  %v4104_v25 = vadd.f32 %v7952_v62, %v4015_v19  ;;  %v4017_v62 = vadd.f32 %v7878_v52, %v7956_v33  ;;  %v4111_v33 = vadd.f32 %v7969_v9, %v4022_v42 }
 0x74b   :  { %v4357_v16 = vmul.f32 %v7979_v47, %v7979_v47  ;;  %v4168_v30 = vmax.f32 %v4104_v25, 0.0  ;;  %v4106_v12 = vadd.f32 %v7961_v35, %v4017_v62 }
 0x74c   :  { %v8013_v3 = vpop.f32.mrf.mxu1 }
 0x74d   :  { %4389 = vadd.xlane.f32.xlu1 %v4357_v16  ;;  %v5676_v16 = vld [vmem:[%s8751_s0 + $0x38] sm:$0xff]  ;;  %v8085_v35 = vadd.f32 %v5679_v0, %v4168_v30  ;;  %v4169_v61 = vmax.f32 %v4106_v12, 0.0 }
 0x74e   :  { %v4225_v31 = vpop.xlane.xlu0 %4224  ;;  %v8059_v50 = vadd.f32 %v5676_v16, %v4165_v23 }
 0x74f   :  { %v4294_v45 = vmul.f32 %v7971_v2, %v4225_v31 }
 0x751   :  { %v7985_v54 = vsub.f32 %v7897_v48, %v4294_v45  ;;  %4137 = vmatmul.bf16.gmra.mxu1 %v3830_v21  ;;  %v3652_v48 = vpack.c.bf16 %v7865_v26, %v7865_v26  ;;  %v8003_v21 = vpop.f32.mrf.mxu0  ;;  %v4166_v45 = vmax.f32 %v7938_v46, 0.0  ;;  %v5678_v46 = vld [vmem:[%s8751_s0 + $0x40] sm:$0xff] }
 0x752   :  { %v4030_v9 = vadd.f32 %v7878_v52, %v8003_v21 }
 0x753   :  { %v4358_v28 = vmul.f32 %v7985_v54, %v7985_v54  ;;  %v3812_v20 = vunpack.c.l.b16 %v3652_v48  ;;  %v5677_v48 = vld [vmem:[%s8751_s0 + $0x78] sm:$0xff] }
 0x754   :  { %v4120_v63 = vpop.f32.mrf.mxu1  ;;  %v8074_v60 = vadd.f32 %v5677_v48, %v4173_v44  ;;  %v4119_v36 = vadd.f32 %v8013_v3, %v4030_v9  ;;  %v5687_v48 = vld [vmem:[%s8751_s0 + $0xa0] sm:$0xff] }
 0x755   :  { %4391 = vadd.xlane.f32.xlu2 %v4358_v28  ;;  %v3831_v53 = vpack.c.b16 %v3813_v6, %v3812_v20  ;;  %v8079_v6 = vadd.f32 %v5678_v46, %v4166_v45  ;;  %v4025_v20 = vadd.f32 %v7878_v52, %v7973_v15  ;;  %v5682_v15 = vld [vmem:[%s8751_s0 + $0x68] sm:$0xff] }
 0x756   :  { %v4227_v7 = vpop.xlane.xlu1 %4226  ;;  %v4174_v1 = vmax.f32 %v4119_v36, 0.0 }
 0x757   :  { %v4295_v4 = vmul.f32 %v7971_v2, %v4227_v7 }
 0x758   :  { %v8124_v14 = vadd.f32 %v5684_v5, %v4174_v1 }
 0x759   :  { %v8001_v43 = vsub.f32 %v7904_v11, %v4295_v4 }
 0x75b   :  { %v4359_v26 = vmul.f32 %v8001_v43, %v8001_v43 }
 0x75c   :  { %v4123_v28 = vpop.f32.mrf.mxu1 }
 0x75d   :  { %4234 = vadd.xlane.f32.xlu2 %v8009_v41  ;;  %4393 = vadd.xlane.f32.xlu0 %v4359_v26  ;;  %v4171_v26 = vmax.f32 %v4111_v33, 0.0 }
 0x75e   :  { %v4229_v11 = vpop.xlane.xlu2 %4228 }
 0x75f   :  { %v4296_v32 = vmul.f32 %v7971_v2, %v4229_v11  ;;  %v4114_v11 = vadd.f32 %v7976_v57, %v4025_v20  ;;  %v8109_v21 = vadd.f32 %v5682_v15, %v4171_v26 }
 0x761   :  { %v8022_v56 = vsub.f32 %v7914_v39, %v4296_v32  ;;  %4142 = vmatmul.bf16.gmra.mxu1 %v3831_v53  ;;  %v4031_v39 = vpop.f32.mrf.mxu0  ;;  %v5681_v53 = vld [vmem:[%s8751_s0 + $0x58] sm:$0xff]  ;;  %v4172_v57 = vmax.f32 %v4114_v11, 0.0 }
 0x762   :  { %v8103_v10 = vadd.f32 %v5681_v53, %v4169_v61  ;;  %v4032_v18 = vadd.f32 %v7878_v52, %v4031_v39 }
 0x763   :  { %v4360_v58 = vmul.f32 %v8022_v56, %v8022_v56 }
 0x764   :  { %v4125_v49 = vpop.f32.mrf.mxu1  ;;  %v4121_v8 = vadd.f32 %v4120_v63, %v4032_v18  ;;  %v5686_v63 = vld [vmem:[%s8751_s0 + $0x98] sm:$0xff] }
 0x765   :  { %4240 = vadd.xlane.f32.xlu2 %v8030_v24  ;;  %4395 = vadd.xlane.f32.xlu1 %v4360_v58  ;;  %v8119_v58 = vadd.f32 %v5683_v55, %v4172_v57 }
 0x766   :  { %4230 = vadd.xlane.f32.xlu0 %v8038_v13  ;;  %v4175_v39 = vmax.f32 %v4121_v8, 0.0 }
 0x768   :  { %v8131_v19 = vadd.f32 %v5685_v27, %v4175_v39 }
 0x769   :  { %v4034_v31 = vpop.f32.mrf.mxu0 }
 0x76a   :  { %v4035_v7 = vadd.f32 %v7878_v52, %v4034_v31 }
 0x76c   :  { %v4124_v4 = vadd.f32 %v4123_v28, %v4035_v7 }
 0x76d   :  { %4246 = vadd.xlane.f32.xlu2 %v8048_v51  ;;  %4232 = vadd.xlane.f32.xlu1 %v8053_v40 }
 0x76e   :  { %4236 = vadd.xlane.f32.xlu0 %v8059_v50  ;;  %v4176_v34 = vmax.f32 %v4124_v4, 0.0 }
 0x770   :  { %v8098_v32 = vadd.f32 %v5680_v37, %v4176_v34 }
 0x771   :  { %v4036_v17 = vpop.f32.mrf.mxu0 }
 0x772   :  { %v4037_v3 = vadd.f32 %v7878_v52, %v4036_v17 }
 0x774   :  { %v4126_v22 = vadd.f32 %v4125_v49, %v4037_v3 }
 0x775   :  { %4252 = vadd.xlane.f32.xlu2 %v8074_v60  ;;  %4238 = vadd.xlane.f32.xlu1 %v8079_v6 }
 0x776   :  { %4242 = vadd.xlane.f32.xlu0 %v8085_v35  ;;  %v4177_v23 = vmax.f32 %v4126_v22, 0.0 }
 0x778   :  { %v8136_v38 = vadd.f32 %v5686_v63, %v4177_v23 }
 0x779   :  { %v4039_v29 = vpop.f32.mrf.mxu0 }
 0x77a   :  { %v4040_v45 = vadd.f32 %v7878_v52, %v4039_v29 }
 0x77d   :  { %4258 = vadd.xlane.f32.xlu2 %v8098_v32  ;;  %4244 = vadd.xlane.f32.xlu1 %v8103_v10 }
 0x77e   :  { %4248 = vadd.xlane.f32.xlu0 %v8109_v21 }
 0x781   :  { %v8141_v62 = vpop.f32.mrf.mxu0 }
 0x785   :  { %4250 = vadd.xlane.f32.xlu1 %v8119_v58 }
 0x786   :  { %4254 = vadd.xlane.f32.xlu0 %v8124_v14 }
 0x789   :  { %v8151_v0 = vpop.f32.mrf.mxu0 }
 0x78d   :  { %4256 = vadd.xlane.f32.xlu1 %v8131_v19 }
 0x78e   :  { %4260 = vadd.xlane.f32.xlu0 %v8136_v38 }
 0x791   :  { %v4046_v15 = vpop.f32.mrf.mxu0 }
 0x799   :  { %v8157_v55 = vpop.f32.mrf.mxu0 }
 0x7a1   :  { %v3593_v59 = vpop.f32.mrf.mxu2 }
 0x7a2   :  { %v3654_v25 = vpack.c.bf16 %v3593_v59, %v3593_v59 }
 0x7a4   :  { %v3814_v44 = vunpack.c.l.b16 %v3654_v25 }
 0x7a9   :  { %v3595_v16 = vpop.f32.mrf.mxu2 }
 0x7aa   :  { %v3655_v31 = vpack.c.bf16 %v3595_v16, %v3595_v16  ;;  %v4047_v16 = vadd.f32 %v7878_v52, %v4046_v15 }
 0x7ac   :  { %v3815_v30 = vunpack.c.l.b16 %v3655_v31 }
 0x7ad   :  { %v4128_v28 = vpop.f32.mrf.mxu1 }
 0x7ae   :  { %v3832_v7 = vpack.c.b16 %v3815_v30, %v3814_v44  ;;  %v4129_v42 = vadd.f32 %v4128_v28, %v4040_v45  ;;  %v8172_v28 = vld [vmem:[%s8754_s4 + $0x1] ss:$0 sm:$0xff] }
 0x7b0   :  { %v4178_v12 = vmax.f32 %v4129_v42, 0.0  ;;  %4147 = vmatmul.bf16.gmra.mxu1 %v3832_v7 }
 0x7b1   :  { %v3621_v4 = vpop.f32.mrf.mxu3 }
 0x7b2   :  { %v8146_v46 = vadd.f32 %v5687_v48, %v4178_v12  ;;  %v3656_v61 = vpack.c.bf16 %v3621_v4, %v3621_v4  ;;  %v8177_v12 = vpop.f32.mrf.mxu0  ;;  %v8182_v48 = vld [vmem:[%s8754_s4 + $0x2] ss:$0 sm:$0xff] }
 0x7b4   :  { %4262 = vadd.xlane.f32.xlu1 %v8146_v46  ;;  %v3816_v20 = vunpack.c.l.b16 %v3656_v61 }
 0x7b5   :  { %v8149_v33 = vpop.f32.mrf.mxu1 }
 0x7b9   :  { %v3623_v34 = vpop.f32.mrf.mxu3 }
 0x7ba   :  { %v3657_v26 = vpack.c.bf16 %v3623_v34, %v3623_v34 }
 0x7bc   :  { %v3817_v9 = vunpack.c.l.b16 %v3657_v26 }
 0x7be   :  { %v3833_v11 = vpack.c.b16 %v3817_v9, %v3816_v20  ;;  %v8153_v37 = vpop.f32.mrf.mxu1 }
 0x7c0   :  { %v4390_v53 = vpop.xlane.xlu1 %4389  ;;  %4152 = vmatmul.bf16.gmra.mxu1 %v3833_v11 }
 0x7c1   :  { %v4453_v36 = vmul.f32 %v4390_v53, %v7971_v2 }
 0x7c3   :  { %v4485_v57 = vadd.f32 1e-05, %v4453_v36 }
 0x7c5   :  { %5603 = vrsqrt.f32 %v4485_v57  ;;  %vm4523_vm3 = vweird.f32 %v4485_v57 }
 0x7c6   :  { %v4135_v17 = vpop.f32.mrf.mxu1 }
 0x7c7   :  { %v4136_v7 = vadd.f32 %v4135_v17, %v4047_v16  ;;  %v4054_v16 = vpop.f32.mrf.mxu0 }
 0x7c8   :  { %v4392_v1 = vpop.xlane.xlu2 %4391 }
 0x7c9   :  { %v4454_v18 = vmul.f32 %v4392_v1, %v7971_v2  ;;  %v4181_v11 = vmax.f32 %v4136_v7, 0.0 }
 0x7cb   :  { %v5604_v49 = vpop.eup %5603  ;;  %v4486_v3 = vadd.f32 1e-05, %v4454_v18 }
 0x7cc   :  { %v4518_v8 = vmul.f32 %v5604_v49, %v4485_v57  ;;  %vm4524_vm2 = vweird.f32 %v5604_v49 }
 0x7cd   :  { %5605 = vrsqrt.f32 %v4486_v3  ;;  %vm4525_vm4 = vmor %vm4523_vm3, %vm4524_vm2  ;;  %vm4533_vm6 = vweird.f32 %v4486_v3 }
 0x7ce   :  { %v4519_v5 = vmul.f32 %v5604_v49, %v4518_v8  ;;  %v8159_v22 = vpop.f32.mrf.mxu1 }
 0x7d0   :  { %v4520_v39 = vmul.f32 0.5, %v4519_v5  ;;  %v4235_v23 = vpop.xlane.xlu2 %4234  ;;  %v4394_v27 = vpop.xlane.xlu0 %4393 }
 0x7d1   :  { %v4299_v63 = vmul.f32 %v7971_v2, %v4235_v23  ;;  %v4455_v59 = vmul.f32 %v4394_v27, %v7971_v2  ;;  %v5688_v23 = vld [vmem:[%s8751_s0 + $0xb8] sm:$0xff] }
 0x7d2   :  { %v4521_v29 = vsub.f32 1.5, %v4520_v39 }
 0x7d3   :  { %v5606_v25 = vpop.eup %5605  ;;  %v8165_v31 = vsub.f32 %v8009_v41, %v4299_v63  ;;  %v8167_v45 = vadd.f32 1e-05, %v4455_v59 }
 0x7d4   :  { %v4522_v44 = vmul.f32 %v5604_v49, %v4521_v29  ;;  %v4528_v30 = vmul.f32 %v5606_v25, %v4486_v3  ;;  %vm4534_vm5 = vweird.f32 %v5606_v25 }
 0x7d5   :  { %5607 = vrsqrt.f32 %v8167_v45  ;;  %v4363_v42 = vmul.f32 %v8165_v31, %v8165_v31  ;;  %vm4535_vm7 = vmor %vm4533_vm6, %vm4534_vm5  ;;  %vm4543_vm9 = vweird.f32 %v8167_v45 }
 0x7d6   :  { %v4526_v41 = vsel %vm4525_vm4, %v5604_v49, %v4522_v44  ;;  %v4529_v4 = vmul.f32 %v5606_v25, %v4528_v30  ;;  %v8185_v26 = vpop.f32.mrf.mxu1 }
 0x7d7   :  { %v4837_v61 = vmul.f32 %v4526_v41, %v7979_v47  ;;  %4401 = vadd.xlane.f32.xlu1 %v4363_v42  ;;  %v4042_v47 = vadd.f32 %v7878_v52, %v8141_v62  ;;  %v8205_v62 = vadd.f32 %v5688_v23, %v4181_v11 }
 0x7d8   :  { %v4530_v34 = vmul.f32 0.5, %v4529_v4  ;;  %v4396_v20 = vpop.xlane.xlu1 %4395  ;;  %v4241_v57 = vpop.xlane.xlu2 %4240 }
 0x7d9   :  { %v4871_v9 = vmul.f32 %v8172_v28, %v4837_v61  ;;  %v4231_v53 = vpop.xlane.xlu0 %4230  ;;  %v4456_v36 = vmul.f32 %v4396_v20, %v7971_v2  ;;  %v4302_v27 = vmul.f32 %v7971_v2, %v4241_v57  ;;  %v4131_v3 = vadd.f32 %v8149_v33, %v4042_v47 }
 0x7da   :  { %v4531_v15 = vsub.f32 1.5, %v4530_v34  ;;  %v4297_v17 = vmul.f32 %v7971_v2, %v4231_v53  ;;  %v4055_v34 = vadd.f32 %v7878_v52, %v4054_v16  ;;  %v5690_v16 = vld [vmem:[%s8751_s0 + $0xb0] sm:$0xff] }
 0x7db   :  { %v5608_v1 = vpop.eup %5607  ;;  %v4905_v18 = vadd.f32 %v8182_v48, %v4871_v9  ;;  %v8193_v49 = vadd.f32 1e-05, %v4456_v36  ;;  %v8216_v42 = vsub.f32 %v8030_v24, %v4302_v27 }
 0x7dc   :  { %v4532_v8 = vmul.f32 %v5606_v25, %v4531_v15  ;;  %v4538_v5 = vmul.f32 %v5608_v1, %v8167_v45  ;;  %v8197_v39 = vsub.f32 %v8038_v13, %v4297_v17  ;;  %vm4544_vm8 = vweird.f32 %v5608_v1  ;;  %v5689_v45 = vld [vmem:[%s8751_s0 + $0xa8] sm:$0xff] }
 0x7dd   :  { %4937 = vst [vmem:[%s8755_s5] sm:$0xff] %v4905_v18  ;;  %5609 = vrsqrt.f32 %v8193_v49  ;;  %vm4545_vm10 = vmor %vm4543_vm9, %vm4544_vm8  ;;  %v4366_v15 = vmul.f32 %v8216_v42, %v8216_v42  ;;  %vm4553_vm12 = vweird.f32 %v8193_v49 }
 0x7de   :  { %v4536_v63 = vsel %vm4535_vm7, %v5606_v25, %v4532_v8  ;;  %v4539_v13 = vmul.f32 %v5608_v1, %v4538_v5  ;;  %v4361_v59 = vmul.f32 %v8197_v39, %v8197_v39  ;;  %v4179_v25 = vmax.f32 %v4131_v3, 0.0  ;;  %v4143_v4 = vpop.f32.mrf.mxu1 }
 0x7df   :  { %v4838_v29 = vmul.f32 %v4536_v63, %v7985_v54  ;;  %4268 = vadd.xlane.f32.xlu1 %v8205_v62  ;;  %v4045_v54 = vadd.f32 %v7878_v52, %v8151_v0  ;;  %v4144_v0 = vadd.f32 %v4143_v4, %v4055_v34 }
 0x7e0   :  { %v4540_v44 = vmul.f32 0.5, %v4539_v13  ;;  %4397 = vadd.xlane.f32.xlu2 %v4361_v59  ;;  %v4233_v30 = vpop.xlane.xlu1 %4232  ;;  %v8239_v57 = vadd.f32 %v5689_v45, %v4179_v25  ;;  %v4247_v63 = vpop.xlane.xlu2 %4246 }
 0x7e1   :  { %v4872_v7 = vmul.f32 %v8172_v28, %v4838_v29  ;;  %v4298_v33 = vmul.f32 %v7971_v2, %v4233_v30  ;;  %v4237_v9 = vpop.xlane.xlu0 %4236  ;;  %v4134_v36 = vadd.f32 %v8153_v37, %v4045_v54  ;;  %v4184_v27 = vmax.f32 %v4144_v0, 0.0 }
 0x7e2   :  { %v4541_v41 = vsub.f32 1.5, %v4540_v44  ;;  %v4300_v47 = vmul.f32 %v7971_v2, %v4237_v9 }
 0x7e3   :  { %v5610_v61 = vpop.eup %5609  ;;  %v4906_v20 = vadd.f32 %v8182_v48, %v4872_v7  ;;  %v8224_v11 = vsub.f32 %v8053_v40, %v4298_v33  ;;  %v4180_v5 = vmax.f32 %v4134_v36, 0.0 }
 0x7e4   :  { %v4542_v24 = vmul.f32 %v5608_v1, %v4541_v41  ;;  %v4548_v53 = vmul.f32 %v5610_v61, %v8193_v49  ;;  %vm4554_vm11 = vweird.f32 %v5610_v61  ;;  %v8246_v13 = vsub.f32 %v8059_v50, %v4300_v47  ;;  %v5691_v50 = vld [vmem:[%s8751_s0 + $0xd0] sm:$0xff] }
 0x7e5   :  { %4938 = vst [vmem:[%s8755_s5 + $0x8] sm:$0xff] %v4906_v20  ;;  %v4362_v40 = vmul.f32 %v8224_v11, %v8224_v11  ;;  %v8255_v44 = vadd.f32 %v5690_v16, %v4180_v5  ;;  %vm4555_vm13 = vmor %vm4553_vm12, %vm4554_vm11  ;;  %v8263_v30 = vadd.f32 %v5691_v50, %v4184_v27 }
 0x7e6   :  { %v4546_v17 = vsel %vm4545_vm10, %v5608_v1, %v4542_v24  ;;  %v4549_v37 = vmul.f32 %v5610_v61, %v4548_v53  ;;  %v4364_v25 = vmul.f32 %v8246_v13, %v8246_v13  ;;  %v5692_v24 = vld [vmem:[%s8751_s0 + $0xc0] sm:$0xff] }
 0x7e7   :  { %v4839_v18 = vmul.f32 %v4546_v17, %v8001_v43  ;;  %4407 = vadd.xlane.f32.xlu1 %v4366_v15  ;;  %4399 = vadd.xlane.f32.xlu0 %v4362_v40  ;;  %v4050_v43 = vadd.f32 %v7878_v52, %v8157_v55  ;;  %v4305_v55 = vmul.f32 %v7971_v2, %v4247_v63  ;;  %v4145_v40 = vpop.f32.mrf.mxu1  ;;  %v5693_v17 = vld [vmem:[%s8751_s0 + $0xc8] sm:$0xff] }
 0x7e8   :  { %v4550_v8 = vmul.f32 0.5, %v4549_v37  ;;  %4264 = vadd.xlane.f32.xlu2 %v8239_v57  ;;  %v4239_v1 = vpop.xlane.xlu1 %4238 }
 0x7e9   :  { %v4873_v23 = vmul.f32 %v8172_v28, %v4839_v18  ;;  %v4301_v49 = vmul.f32 %v7971_v2, %v4239_v1  ;;  %v4139_v7 = vadd.f32 %v8159_v22, %v4050_v43  ;;  %v8275_v54 = vsub.f32 %v8048_v51, %v4305_v55 }
 0x7ea   :  { %v4551_v3 = vsub.f32 1.5, %v4550_v8 }
 0x7eb   :  { %v4907_v59 = vadd.f32 %v8182_v48, %v4873_v23  ;;  %v8278_v34 = vsub.f32 %v8079_v6, %v4301_v49  ;;  %v4182_v22 = vmax.f32 %v4139_v7, 0.0  ;;  %v4369_v51 = vmul.f32 %v8275_v54, %v8275_v54 }
 0x7ec   :  { %v4552_v29 = vmul.f32 %v5610_v61, %v4551_v3  ;;  %v5694_v3 = vld [vmem:[%s8751_s0 + $0xd8] sm:$0xff] }
 0x7ed   :  { %4939 = vst [vmem:[%s8755_s5 + $0x10] sm:$0xff] %v4907_v59  ;;  %v4365_v6 = vmul.f32 %v8278_v34, %v8278_v34 }
 0x7ee   :  { %v4556_v33 = vsel %vm4555_vm13, %v5610_v61, %v4552_v29  ;;  %v4052_v61 = vadd.f32 %v7878_v52, %v8177_v12  ;;  %v8294_v12 = vadd.f32 %v5692_v24, %v4182_v22 }
 0x7ef   :  { %v4840_v41 = vmul.f32 %v4556_v33, %v8022_v56  ;;  %4274 = vadd.xlane.f32.xlu1 %v8263_v30  ;;  %4266 = vadd.xlane.f32.xlu0 %v8255_v44  ;;  %v4243_v56 = vpop.xlane.xlu0 %4242  ;;  %v5695_v33 = vld [vmem:[%s8751_s0 + $0xe0] sm:$0xff] }
 0x7f0   :  { %4403 = vadd.xlane.f32.xlu2 %v4364_v25  ;;  %v4141_v9 = vadd.f32 %v8185_v26, %v4052_v61  ;;  %v4303_v53 = vmul.f32 %v7971_v2, %v4243_v56  ;;  %v4056_v26 = vpop.f32.mrf.mxu0  ;;  %v4245_v15 = vpop.xlane.xlu1 %4244 }
 0x7f1   :  { %v4874_v4 = vmul.f32 %v8172_v28, %v4840_v41  ;;  %v4057_v45 = vadd.f32 %v7878_v52, %v4056_v26  ;;  %v4304_v47 = vmul.f32 %v7971_v2, %v4245_v15  ;;  %v4253_v41 = vpop.xlane.xlu2 %4252 }
 0x7f2   :  { %v4183_v36 = vmax.f32 %v4141_v9, 0.0  ;;  %v8299_v0 = vsub.f32 %v8085_v35, %v4303_v53  ;;  %v4308_v56 = vmul.f32 %v7971_v2, %v4253_v41 }
 0x7f3   :  { %v4908_v20 = vadd.f32 %v8182_v48, %v4874_v4  ;;  %v4146_v18 = vadd.f32 %v4145_v40, %v4057_v45  ;;  %v8312_v35 = vsub.f32 %v8103_v10, %v4304_v47 }
 0x7f4   :  { %v8305_v37 = vadd.f32 %v5693_v17, %v4183_v36  ;;  %v4367_v8 = vmul.f32 %v8299_v0, %v8299_v0  ;;  %v8345_v36 = vsub.f32 %v8074_v60, %v4308_v56 }
 0x7f5   :  { %4940 = vst [vmem:[%s8755_s5 + $0x18] sm:$0xff] %v4908_v20  ;;  %v4185_v5 = vmax.f32 %v4146_v18, 0.0  ;;  %v4368_v27 = vmul.f32 %v8312_v35, %v8312_v35 }
 0x7f7   :  { %4413 = vadd.xlane.f32.xlu1 %v4369_v51  ;;  %4405 = vadd.xlane.f32.xlu0 %v4365_v6  ;;  %v4249_v23 = vpop.xlane.xlu0 %4248  ;;  %v8319_v63 = vadd.f32 %v5694_v3, %v4185_v5  ;;  %v5696_v51 = vld [vmem:[%s8751_s0 + $0xe8] sm:$0xff]  ;;  %v5697_v5 = vld [vmem:[%s8751_s0 + $0xf0] sm:$0xff] }
 0x7f8   :  { %4270 = vadd.xlane.f32.xlu2 %v8294_v12  ;;  %v4306_v1 = vmul.f32 %v7971_v2, %v4249_v23  ;;  %v4059_v43 = vpop.f32.mrf.mxu0  ;;  %v4251_v49 = vpop.xlane.xlu1 %4250 }
 0x7f9   :  { %v4060_v29 = vadd.f32 %v7878_v52, %v4059_v43  ;;  %v4259_v40 = vpop.xlane.xlu2 %4258 }
 0x7fa   :  { %v8324_v59 = vsub.f32 %v8109_v21, %v4306_v1  ;;  %v4311_v47 = vmul.f32 %v7971_v2, %v4259_v40 }
 0x7fc   :  { %v4370_v10 = vmul.f32 %v8324_v59, %v8324_v59  ;;  %v8359_v1 = vsub.f32 %v8098_v32, %v4311_v47 }
 0x7ff   :  { %4272 = vadd.xlane.f32.xlu0 %v8305_v37  ;;  %v4255_v53 = vpop.xlane.xlu0 %4254 }
 0x800   :  { %4409 = vadd.xlane.f32.xlu2 %v4367_v8  ;;  %v4061_v16 = vpop.f32.mrf.mxu0  ;;  %v4257_v9 = vpop.xlane.xlu1 %4256  ;;  %v4309_v18 = vmul.f32 %v7971_v2, %v4255_v53 }
 0x801   :  { %v4062_v21 = vadd.f32 %v7878_v52, %v4061_v16 }
 0x807   :  { %4411 = vadd.xlane.f32.xlu0 %v4368_v27  ;;  %v4372_v27 = vmul.f32 %v8345_v36, %v8345_v36 }
 0x808   :  { %4276 = vadd.xlane.f32.xlu2 %v8319_v63  ;;  %v4064_v61 = vpop.f32.mrf.mxu0 }
 0x809   :  { %v4065_v24 = vadd.f32 %v7878_v52, %v4064_v61 }
 0x810   :  { %4415 = vadd.xlane.f32.xlu2 %v4370_v10  ;;  %v4066_v17 = vpop.f32.mrf.mxu0  ;;  %v8362_v10 = vsub.f32 %v8124_v14, %v4309_v18  ;;  %v4307_v14 = vmul.f32 %v7971_v2, %v4251_v49  ;;  %v4310_v49 = vmul.f32 %v7971_v2, %v4257_v9 }
 0x811   :  { %v4067_v60 = vadd.f32 %v7878_v52, %v4066_v17 }
 0x812   :  { %v4373_v32 = vmul.f32 %v8362_v10, %v8362_v10 }
 0x827   :  { %v4263_v8 = vpop.xlane.xlu1 %4262 }
 0x828   :  { %v4313_v9 = vmul.f32 %v7971_v2, %v4263_v8 }
 0x82d   :  { %v4148_v50 = vpop.f32.mrf.mxu1 }
 0x82e   :  { %v4149_v55 = vadd.f32 %v4148_v50, %v4060_v29  ;;  %v4261_v29 = vpop.xlane.xlu0 %4260 }
 0x82f   :  { %v4312_v50 = vmul.f32 %v7971_v2, %v4261_v29 }
 0x830   :  { %v4186_v7 = vmax.f32 %v4149_v55, 0.0  ;;  %v5698_v55 = vld [vmem:[%s8751_s0 + $0xf8] sm:$0xff] }
 0x832   :  { %v8332_v25 = vadd.f32 %v5695_v33, %v4186_v7  ;;  %v4375_v33 = vmul.f32 %v8359_v1, %v8359_v1 }
 0x834   :  { %4278 = vadd.xlane.f32.xlu0 %v8332_v25 }
 0x835   :  { %v4150_v4 = vpop.f32.mrf.mxu1 }
 0x836   :  { %v4151_v22 = vadd.f32 %v4150_v4, %v4062_v21  ;;  %v8378_v4 = vsub.f32 %v8136_v38, %v4312_v50  ;;  %v8406_v50 = vsub.f32 %v8146_v46, %v4313_v9 }
 0x838   :  { %v4187_v20 = vmax.f32 %v4151_v22, 0.0  ;;  %v8381_v22 = vsub.f32 %v8119_v58, %v4307_v14  ;;  %v8390_v58 = vsub.f32 %v8131_v19, %v4310_v49 }
 0x83a   :  { %v8340_v6 = vadd.f32 %v5696_v51, %v4187_v20  ;;  %v4376_v20 = vmul.f32 %v8378_v4, %v8378_v4  ;;  %v4371_v51 = vmul.f32 %v8381_v22, %v8381_v22 }
 0x83c   :  { %4280 = vadd.xlane.f32.xlu1 %v8340_v6 }
 0x83d   :  { %v4153_v26 = vpop.f32.mrf.mxu1 }
 0x83e   :  { %v4154_v15 = vadd.f32 %v4153_v26, %v4065_v24 }
 0x840   :  { %v4188_v45 = vmax.f32 %v4154_v15, 0.0 }
 0x842   :  { %v8352_v23 = vadd.f32 %v5697_v5, %v4188_v45 }
 0x844   :  { %4419 = vadd.xlane.f32.xlu1 %v4372_v27  ;;  %4282 = vadd.xlane.f32.xlu2 %v8352_v23  ;;  %v4374_v27 = vmul.f32 %v8390_v58, %v8390_v58 }
 0x845   :  { %v4155_v3 = vpop.f32.mrf.mxu1 }
 0x846   :  { %v4156_v43 = vadd.f32 %v4155_v3, %v4067_v60 }
 0x848   :  { %v4189_v16 = vmax.f32 %v4156_v43, 0.0 }
 0x84a   :  { %v8368_v52 = vadd.f32 %v5698_v55, %v4189_v16  ;;  %v4402_v7 = vpop.xlane.xlu1 %4401 }
 0x84b   :  { %v4459_v21 = vmul.f32 %v4402_v7, %v7971_v2 }
 0x84c   :  { %4425 = vadd.xlane.f32.xlu1 %v4375_v33  ;;  %4421 = vadd.xlane.f32.xlu2 %v4373_v32 }
 0x84d   :  { %v4491_v41 = vadd.f32 1e-05, %v4459_v21  ;;  %4284 = vadd.xlane.f32.xlu0 %v8368_v52 }
 0x84f   :  { %5611 = vrsqrt.f32 %v4491_v41  ;;  %vm4583_vm15 = vweird.f32 %v4491_v41 }
 0x852   :  { %v4269_v61 = vpop.xlane.xlu1 %4268 }
 0x853   :  { %v4398_v56 = vpop.xlane.xlu2 %4397  ;;  %v4316_v21 = vmul.f32 %v7971_v2, %v4269_v61 }
 0x854   :  { %v4457_v24 = vmul.f32 %v4398_v56, %v7971_v2  ;;  %4427 = vadd.xlane.f32.xlu2 %v4376_v20 }
 0x855   :  { %v5612_v53 = vpop.eup %5611  ;;  %4417 = vadd.xlane.f32.xlu0 %v4371_v51  ;;  %v4377_v51 = vmul.f32 %v8406_v50, %v8406_v50 }
 0x856   :  { %v4578_v38 = vmul.f32 %v5612_v53, %v4491_v41  ;;  %v4489_v26 = vadd.f32 1e-05, %v4457_v24  ;;  %vm4584_vm14 = vweird.f32 %v5612_v53 }
 0x857   :  { %vm4585_vm0 = vmor %vm4583_vm15, %vm4584_vm14 }
 0x858   :  { %v4579_v15 = vmul.f32 %v5612_v53, %v4578_v38  ;;  %5613 = vrsqrt.f32 %v4489_v26  ;;  %vm4563_vm2 = vweird.f32 %v4489_v26 }
 0x85a   :  { %v4580_v40 = vmul.f32 0.5, %v4579_v15  ;;  %v4400_v45 = vpop.xlane.xlu0 %4399  ;;  %v4408_v17 = vpop.xlane.xlu1 %4407 }
 0x85b   :  { %v4265_v47 = vpop.xlane.xlu2 %4264  ;;  %v4458_v18 = vmul.f32 %v4400_v45, %v7971_v2  ;;  %v4462_v5 = vmul.f32 %v4408_v17, %v7971_v2 }
 0x85c   :  { %v4581_v60 = vsub.f32 1.5, %v4580_v40  ;;  %v4314_v19 = vmul.f32 %v7971_v2, %v4265_v47  ;;  %v8424_v40 = vsub.f32 %v8205_v62, %v4316_v21 }
 0x85d   :  { %v8398_v3 = vadd.f32 1e-05, %v4458_v18  ;;  %v8400_v43 = vadd.f32 1e-05, %v4462_v5  ;;  %4423 = vadd.xlane.f32.xlu0 %v4374_v27 }
 0x85e   :  { %v5614_v29 = vpop.eup %5613  ;;  %v4582_v16 = vmul.f32 %v5612_v53, %v4581_v60  ;;  %v8403_v8 = vsub.f32 %v8239_v57, %v4314_v19 }
 0x85f   :  { %v4558_v55 = vmul.f32 %v5614_v29, %v4489_v26  ;;  %5615 = vrsqrt.f32 %v8398_v3  ;;  %vm4564_vm1 = vweird.f32 %v5614_v29  ;;  %vm4573_vm4 = vweird.f32 %v8398_v3 }
 0x860   :  { %v4586_v7 = vsel %vm4585_vm0, %v5612_v53, %v4582_v16  ;;  %5617 = vrsqrt.f32 %v8400_v43  ;;  %v4378_v33 = vmul.f32 %v8403_v8, %v8403_v8  ;;  %vm4565_vm3 = vmor %vm4563_vm2, %vm4564_vm1  ;;  %v4380_v26 = vmul.f32 %v8424_v40, %v8424_v40 }
 0x861   :  { %v4843_v32 = vmul.f32 %v4586_v7, %v8165_v31  ;;  %v4559_v14 = vmul.f32 %v5614_v29, %v4558_v55  ;;  %vm4613_vm7 = vweird.f32 %v8400_v43 }
 0x862   :  { %4431 = vadd.xlane.f32.xlu1 %v4378_v33  ;;  %v4267_v57 = vpop.xlane.xlu0 %4266  ;;  %v4275_v41 = vpop.xlane.xlu1 %4274 }
 0x863   :  { %v4877_v46 = vmul.f32 %v8172_v28, %v4843_v32  ;;  %v4560_v20 = vmul.f32 0.5, %v4559_v14  ;;  %v4404_v49 = vpop.xlane.xlu2 %4403  ;;  %v4315_v56 = vmul.f32 %v7971_v2, %v4267_v57  ;;  %v4319_v7 = vmul.f32 %v7971_v2, %v4275_v41 }
 0x864   :  { %v4460_v24 = vmul.f32 %v4404_v49, %v7971_v2 }
 0x865   :  { %v5616_v53 = vpop.eup %5615  ;;  %v4911_v31 = vadd.f32 %v8182_v48, %v4877_v46  ;;  %v4561_v38 = vsub.f32 1.5, %v4560_v20  ;;  %v8421_v61 = vsub.f32 %v8255_v44, %v4315_v56  ;;  %4429 = vadd.xlane.f32.xlu0 %v4377_v51 }
 0x866   :  { %v5618_v15 = vpop.eup %5617  ;;  %v4568_v45 = vmul.f32 %v5616_v53, %v8398_v3  ;;  %v8427_v17 = vadd.f32 1e-05, %v4460_v24  ;;  %vm4574_vm5 = vweird.f32 %v5616_v53 }
 0x867   :  { %4943 = vst [vmem:[%s8755_s5 + $0x30] sm:$0xff] %v4911_v31  ;;  %v4562_v9 = vmul.f32 %v5614_v29, %v4561_v38  ;;  %v4608_v47 = vmul.f32 %v5618_v15, %v8400_v43  ;;  %v4379_v44 = vmul.f32 %v8421_v61, %v8421_v61  ;;  %vm4614_vm6 = vweird.f32 %v5618_v15  ;;  %vm4575_vm8 = vmor %vm4573_vm4, %vm4574_vm5 }
 0x868   :  { %v4569_v18 = vmul.f32 %v5616_v53, %v4568_v45  ;;  %5619 = vrsqrt.f32 %v8427_v17  ;;  %v8458_v38 = vsub.f32 %v8263_v30, %v4319_v7  ;;  %vm4615_vm9 = vmor %vm4613_vm7, %vm4614_vm6  ;;  %vm4593_vm11 = vweird.f32 %v8427_v17 }
 0x869   :  { %v4566_v62 = vsel %vm4565_vm3, %v5614_v29, %v4562_v9  ;;  %v4609_v5 = vmul.f32 %v5618_v15, %v4608_v47  ;;  %4433 = vadd.xlane.f32.xlu2 %v4379_v44 }
 0x86a   :  { %v4841_v27 = vmul.f32 %v4566_v62, %v8197_v39  ;;  %v4570_v60 = vmul.f32 0.5, %v4569_v18  ;;  %v4406_v19 = vpop.xlane.xlu0 %4405  ;;  %v4414_v16 = vpop.xlane.xlu1 %4413 }
 0x86b   :  { %v4610_v55 = vmul.f32 0.5, %v4609_v5  ;;  %v4271_v33 = vpop.xlane.xlu2 %4270  ;;  %v4461_v32 = vmul.f32 %v4406_v19, %v7971_v2  ;;  %v4465_v29 = vmul.f32 %v4414_v16, %v7971_v2  ;;  %v4383_v5 = vmul.f32 %v8458_v38, %v8458_v38 }
 0x86c   :  { %v4875_v14 = vmul.f32 %v8172_v28, %v4841_v27  ;;  %v4571_v21 = vsub.f32 1.5, %v4570_v60  ;;  %v4317_v39 = vmul.f32 %v7971_v2, %v4271_v33 }
 0x86d   :  { %v4611_v57 = vsub.f32 1.5, %v4610_v55  ;;  %v8445_v46 = vadd.f32 1e-05, %v4461_v32  ;;  %v8447_v20 = vadd.f32 1e-05, %v4465_v29  ;;  %4435 = vadd.xlane.f32.xlu0 %v4380_v26 }
 0x86e   :  { %v5620_v49 = vpop.eup %5619  ;;  %v4909_v41 = vadd.f32 %v8182_v48, %v4875_v14  ;;  %v4572_v56 = vmul.f32 %v5616_v53, %v4571_v21  ;;  %v8452_v51 = vsub.f32 %v8294_v12, %v4317_v39 }
 0x86f   :  { %v4612_v24 = vmul.f32 %v5618_v15, %v4611_v57  ;;  %v4588_v31 = vmul.f32 %v5620_v49, %v8427_v17  ;;  %5621 = vrsqrt.f32 %v8445_v46  ;;  %vm4594_vm10 = vweird.f32 %v5620_v49 }
 0x870   :  { %4941 = vst [vmem:[%s8755_s5 + $0x20] sm:$0xff] %v4909_v41  ;;  %v4576_v45 = vsel %vm4575_vm8, %v5616_v53, %v4572_v56  ;;  %5623 = vrsqrt.f32 %v8447_v20  ;;  %v4381_v9 = vmul.f32 %v8452_v51, %v8452_v51  ;;  %vm4595_vm12 = vmor %vm4593_vm11, %vm4594_vm10  ;;  %vm4603_vm15 = vweird.f32 %v8445_v46 }
 0x871   :  { %v4842_v12 = vmul.f32 %v4576_v45, %v8224_v11  ;;  %v4616_v3 = vsel %vm4615_vm9, %v5618_v15, %v4612_v24  ;;  %v4589_v43 = vmul.f32 %v5620_v49, %v4588_v31  ;;  %vm4643_vm1 = vweird.f32 %v8447_v20 }
 0x872   :  { %v4846_v30 = vmul.f32 %v4616_v3, %v8216_v42  ;;  %v4273_v47 = vpop.xlane.xlu0 %4272  ;;  %4437 = vadd.xlane.f32.xlu1 %v4381_v9 }
 0x873   :  { %v4876_v44 = vmul.f32 %v8172_v28, %v4842_v12  ;;  %v4590_v18 = vmul.f32 0.5, %v4589_v43  ;;  %v4410_v62 = vpop.xlane.xlu2 %4409  ;;  %v4318_v53 = vmul.f32 %v7971_v2, %v4273_v47 }
 0x874   :  { %v4880_v11 = vmul.f32 %v8172_v28, %v4846_v30  ;;  %v4463_v15 = vmul.f32 %v4410_v62, %v7971_v2 }
 0x875   :  { %v5622_v27 = vpop.eup %5621  ;;  %v4910_v60 = vadd.f32 %v8182_v48, %v4876_v44  ;;  %v4591_v19 = vsub.f32 1.5, %v4590_v18  ;;  %v8478_v42 = vsub.f32 %v8305_v37, %v4318_v53  ;;  %4441 = vadd.xlane.f32.xlu0 %v4383_v5 }
 0x876   :  { %v5624_v16 = vpop.eup %5623  ;;  %v4914_v26 = vadd.f32 %v8182_v48, %v4880_v11  ;;  %v4598_v55 = vmul.f32 %v5622_v27, %v8445_v46  ;;  %v4495_v7 = vadd.f32 1e-05, %v4463_v15  ;;  %vm4604_vm13 = vweird.f32 %v5622_v27 }
 0x877   :  { %4942 = vst [vmem:[%s8755_s5 + $0x28] sm:$0xff] %v4910_v60  ;;  %v4592_v33 = vmul.f32 %v5620_v49, %v4591_v19  ;;  %v4638_v32 = vmul.f32 %v5624_v16, %v8447_v20  ;;  %v4382_v37 = vmul.f32 %v8478_v42, %v8478_v42  ;;  %vm4644_vm14 = vweird.f32 %v5624_v16  ;;  %vm4605_vm0 = vmor %vm4603_vm15, %vm4604_vm13 }
 0x878   :  { %4946 = vst [vmem:[%s8755_s5 + $0x48] sm:$0xff] %v4914_v26  ;;  %v4599_v29 = vmul.f32 %v5622_v27, %v4598_v55  ;;  %5625 = vrsqrt.f32 %v4495_v7  ;;  %vm4645_vm2 = vmor %vm4643_vm1, %vm4644_vm14  ;;  %vm4623_vm4 = vweird.f32 %v4495_v7 }
 0x879   :  { %v4596_v14 = vsel %vm4595_vm12, %v5620_v49, %v4592_v33  ;;  %v4639_v21 = vmul.f32 %v5624_v16, %v4638_v32  ;;  %4439 = vadd.xlane.f32.xlu2 %v4382_v37 }
 0x87a   :  { %v4844_v39 = vmul.f32 %v4596_v14, %v8246_v13  ;;  %v4600_v57 = vmul.f32 0.5, %v4599_v29  ;;  %v4412_v41 = vpop.xlane.xlu0 %4411 }
 0x87b   :  { %v4640_v17 = vmul.f32 0.5, %v4639_v21  ;;  %v4277_v56 = vpop.xlane.xlu2 %4276  ;;  %v4464_v24 = vmul.f32 %v4412_v41, %v7971_v2 }
 0x87c   :  { %v4878_v31 = vmul.f32 %v8172_v28, %v4844_v39  ;;  %v4601_v45 = vsub.f32 1.5, %v4600_v57  ;;  %v4320_v12 = vmul.f32 %v7971_v2, %v4277_v56 }
 0x87d   :  { %v4641_v3 = vsub.f32 1.5, %v4640_v17  ;;  %v4496_v43 = vadd.f32 1e-05, %v4464_v24 }
 0x87e   :  { %v5626_v49 = vpop.eup %5625  ;;  %v4912_v9 = vadd.f32 %v8182_v48, %v4878_v31  ;;  %v4602_v30 = vmul.f32 %v5622_v27, %v4601_v45  ;;  %v8499_v13 = vsub.f32 %v8319_v63, %v4320_v12 }
 0x87f   :  { %v4642_v47 = vmul.f32 %v5624_v16, %v4641_v3  ;;  %v4618_v44 = vmul.f32 %v5626_v49, %v4495_v7  ;;  %5627 = vrsqrt.f32 %v4496_v43  ;;  %vm4624_vm3 = vweird.f32 %v5626_v49 }
 0x880   :  { %4944 = vst [vmem:[%s8755_s5 + $0x38] sm:$0xff] %v4912_v9  ;;  %v4606_v18 = vsel %vm4605_vm0, %v5622_v27, %v4602_v30  ;;  %v4384_v62 = vmul.f32 %v8499_v13, %v8499_v13  ;;  %vm4625_vm5 = vmor %vm4623_vm4, %vm4624_vm3  ;;  %vm4633_vm7 = vweird.f32 %v4496_v43 }
 0x881   :  { %v4845_v46 = vmul.f32 %v4606_v18, %v8278_v34  ;;  %v4646_v53 = vsel %vm4645_vm2, %v5624_v16, %v4642_v47  ;;  %v4619_v63 = vmul.f32 %v5626_v49, %v4618_v44 }
 0x882   :  { %v4849_v5 = vmul.f32 %v4646_v53, %v8275_v54  ;;  %4443 = vadd.xlane.f32.xlu1 %v4384_v62 }
 0x883   :  { %v4879_v20 = vmul.f32 %v8172_v28, %v4845_v46  ;;  %v4620_v11 = vmul.f32 0.5, %v4619_v63  ;;  %v4416_v15 = vpop.xlane.xlu2 %4415 }
 0x884   :  { %v4883_v60 = vmul.f32 %v8172_v28, %v4849_v5  ;;  %v4466_v19 = vmul.f32 %v4416_v15, %v7971_v2 }
 0x885   :  { %v5628_v27 = vpop.eup %5627  ;;  %v4913_v26 = vadd.f32 %v8182_v48, %v4879_v20  ;;  %v4621_v55 = vsub.f32 1.5, %v4620_v11 }
 0x886   :  { %v4917_v34 = vadd.f32 %v8182_v48, %v4883_v60  ;;  %v4628_v16 = vmul.f32 %v5628_v27, %v4496_v43  ;;  %v4498_v33 = vadd.f32 1e-05, %v4466_v19  ;;  %vm4634_vm6 = vweird.f32 %v5628_v27 }
 0x887   :  { %4945 = vst [vmem:[%s8755_s5 + $0x40] sm:$0xff] %v4913_v26  ;;  %v4622_v54 = vmul.f32 %v5626_v49, %v4621_v55  ;;  %vm4635_vm8 = vmor %vm4633_vm7, %vm4634_vm6 }
 0x888   :  { %4949 = vst [vmem:[%s8755_s5 + $0x60] sm:$0xff] %v4917_v34  ;;  %v4629_v32 = vmul.f32 %v5628_v27, %v4628_v16  ;;  %5629 = vrsqrt.f32 %v4498_v33  ;;  %vm4653_vm10 = vweird.f32 %v4498_v33 }
 0x889   :  { %v4626_v37 = vsel %vm4625_vm5, %v5626_v49, %v4622_v54 }
 0x88a   :  { %v4847_v29 = vmul.f32 %v4626_v37, %v8299_v0  ;;  %v4630_v14 = vmul.f32 0.5, %v4629_v32 }
 0x88c   :  { %v4881_v21 = vmul.f32 %v8172_v28, %v4847_v29  ;;  %v4631_v39 = vsub.f32 1.5, %v4630_v14 }
 0x88e   :  { %v5630_v57 = vpop.eup %5629  ;;  %v4915_v41 = vadd.f32 %v8182_v48, %v4881_v21  ;;  %v4632_v17 = vmul.f32 %v5628_v27, %v4631_v39 }
 0x88f   :  { %v4648_v7 = vmul.f32 %v5630_v57, %v4498_v33  ;;  %vm4654_vm9 = vweird.f32 %v5630_v57 }
 0x890   :  { %4947 = vst [vmem:[%s8755_s5 + $0x50] sm:$0xff] %v4915_v41  ;;  %v4636_v56 = vsel %vm4635_vm8, %v5628_v27, %v4632_v17  ;;  %vm4655_vm11 = vmor %vm4653_vm10, %vm4654_vm9 }
 0x891   :  { %v4848_v24 = vmul.f32 %v4636_v56, %v8312_v35  ;;  %v4649_v0 = vmul.f32 %v5630_v57, %v4648_v7 }
 0x893   :  { %v4882_v31 = vmul.f32 %v8172_v28, %v4848_v24  ;;  %v4650_v45 = vmul.f32 0.5, %v4649_v0 }
 0x895   :  { %v4916_v12 = vadd.f32 %v8182_v48, %v4882_v31  ;;  %v4651_v3 = vsub.f32 1.5, %v4650_v45 }
 0x897   :  { %4948 = vst [vmem:[%s8755_s5 + $0x58] sm:$0xff] %v4916_v12  ;;  %v4652_v43 = vmul.f32 %v5630_v57, %v4651_v3 }
 0x899   :  { %v4656_v49 = vsel %vm4655_vm11, %v5630_v57, %v4652_v43 }
 0x89a   :  { %v4850_v9 = vmul.f32 %v4656_v49, %v8324_v59 }
 0x89c   :  { %v4884_v35 = vmul.f32 %v8172_v28, %v4850_v9 }
 0x89e   :  { %v4918_v30 = vadd.f32 %v8182_v48, %v4884_v35 }
 0x8a0   :  { %4950 = vst [vmem:[%s8755_s5 + $0x68] sm:$0xff] %v4918_v30 }
 0x8a7   :  { %v4279_v47 = vpop.xlane.xlu0 %4278 }
 0x8a8   :  { %v4321_v44 = vmul.f32 %v7971_v2, %v4279_v47 }
 0x8aa   :  { %v8540_v18 = vsub.f32 %v8332_v25, %v4321_v44 }
 0x8ac   :  { %v4385_v62 = vmul.f32 %v8540_v18, %v8540_v18 }
 0x8ae   :  { %4445 = vadd.xlane.f32.xlu2 %v4385_v62 }
 0x8af   :  { %v4281_v46 = vpop.xlane.xlu1 %4280 }
 0x8b0   :  { %v4322_v59 = vmul.f32 %v7971_v2, %v4281_v46 }
 0x8b2   :  { %v8546_v53 = vsub.f32 %v8340_v6, %v4322_v59 }
 0x8b4   :  { %v4386_v63 = vmul.f32 %v8546_v53, %v8546_v53 }
 0x8b6   :  { %4447 = vadd.xlane.f32.xlu0 %v4386_v63 }
 0x8b7   :  { %v4283_v5 = vpop.xlane.xlu2 %4282  ;;  %v4420_v20 = vpop.xlane.xlu1 %4419 }
 0x8b8   :  { %v4323_v11 = vmul.f32 %v7971_v2, %v4283_v5  ;;  %v4468_v25 = vmul.f32 %v4420_v20, %v7971_v2 }
 0x8ba   :  { %v8553_v15 = vsub.f32 %v8352_v23, %v4323_v11  ;;  %v4500_v60 = vadd.f32 1e-05, %v4468_v25 }
 0x8bc   :  { %5631 = vrsqrt.f32 %v4500_v60  ;;  %v4387_v19 = vmul.f32 %v8553_v15, %v8553_v15  ;;  %vm4673_vm13 = vweird.f32 %v4500_v60 }
 0x8be   :  { %4449 = vadd.xlane.f32.xlu1 %v4387_v19 }
 0x8bf   :  { %v4422_v6 = vpop.xlane.xlu2 %4421  ;;  %v4426_v27 = vpop.xlane.xlu1 %4425 }
 0x8c0   :  { %v4469_v26 = vmul.f32 %v4422_v6, %v7971_v2  ;;  %v4285_v55 = vpop.xlane.xlu0 %4284  ;;  %v4471_v34 = vmul.f32 %v4426_v27, %v7971_v2 }
 0x8c1   :  { %v4324_v16 = vmul.f32 %v7971_v2, %v4285_v55 }
 0x8c2   :  { %v5632_v33 = vpop.eup %5631  ;;  %v4501_v54 = vadd.f32 1e-05, %v4469_v26  ;;  %v4503_v32 = vadd.f32 1e-05, %v4471_v34 }
 0x8c3   :  { %v4668_v23 = vmul.f32 %v5632_v33, %v4500_v60  ;;  %v8561_v37 = vsub.f32 %v8368_v52, %v4324_v16  ;;  %vm4674_vm12 = vweird.f32 %v5632_v33 }
 0x8c4   :  { %5633 = vrsqrt.f32 %v4501_v54  ;;  %vm4675_vm14 = vmor %vm4673_vm13, %vm4674_vm12  ;;  %vm4683_vm1 = vweird.f32 %v4501_v54  ;;  %vm4703_vm3 = vweird.f32 %v4503_v32 }
 0x8c5   :  { %v4669_v29 = vmul.f32 %v5632_v33, %v4668_v23  ;;  %5635 = vrsqrt.f32 %v4503_v32  ;;  %v4388_v14 = vmul.f32 %v8561_v37, %v8561_v37 }
 0x8c7   :  { %v4670_v21 = vmul.f32 0.5, %v4669_v29  ;;  %4451 = vadd.xlane.f32.xlu2 %v4388_v14  ;;  %v4428_v39 = vpop.xlane.xlu2 %4427 }
 0x8c8   :  { %v4472_v57 = vmul.f32 %v4428_v39, %v7971_v2  ;;  %v4418_v41 = vpop.xlane.xlu0 %4417  ;;  %v8594_v39 = vld [vmem:[%s8754_s4 + $0x1] ss:$0 sm:$0xff] }
 0x8c9   :  { %v4671_v17 = vsub.f32 1.5, %v4670_v21  ;;  %v4467_v7 = vmul.f32 %v4418_v41, %v7971_v2 }
 0x8ca   :  { %v5634_v56 = vpop.eup %5633  ;;  %v8567_v24 = vadd.f32 1e-05, %v4472_v57 }
 0x8cb   :  { %v5636_v52 = vpop.eup %5635  ;;  %v4672_v0 = vmul.f32 %v5632_v33, %v4671_v17  ;;  %v4678_v31 = vmul.f32 %v5634_v56, %v4501_v54  ;;  %v8569_v45 = vadd.f32 1e-05, %v4467_v7  ;;  %vm4684_vm15 = vweird.f32 %v5634_v56  ;;  %v8603_v7 = vld [vmem:[%s8754_s4 + $0x2] ss:$0 sm:$0xff] }
 0x8cc   :  { %v4698_v12 = vmul.f32 %v5636_v52, %v4503_v32  ;;  %5637 = vrsqrt.f32 %v8567_v24  ;;  %vm4704_vm0 = vweird.f32 %v5636_v52  ;;  %vm4685_vm2 = vmor %vm4683_vm1, %vm4684_vm15  ;;  %vm4713_vm7 = vweird.f32 %v8567_v24 }
 0x8cd   :  { %v4676_v3 = vsel %vm4675_vm14, %v5632_v33, %v4672_v0  ;;  %v4679_v43 = vmul.f32 %v5634_v56, %v4678_v31  ;;  %5639 = vrsqrt.f32 %v8569_v45  ;;  %vm4705_vm4 = vmor %vm4703_vm3, %vm4704_vm0  ;;  %vm4663_vm9 = vweird.f32 %v8569_v45 }
 0x8ce   :  { %v4852_v49 = vmul.f32 %v4676_v3, %v8345_v36  ;;  %v4699_v9 = vmul.f32 %v5636_v52, %v4698_v12 }
 0x8cf   :  { %v4680_v35 = vmul.f32 0.5, %v4679_v43 }
 0x8d0   :  { %v4886_v30 = vmul.f32 %v8172_v28, %v4852_v49  ;;  %v4700_v47 = vmul.f32 0.5, %v4699_v9  ;;  %v4424_v44 = vpop.xlane.xlu0 %4423 }
 0x8d1   :  { %v4681_v62 = vsub.f32 1.5, %v4680_v35  ;;  %v4470_v46 = vmul.f32 %v4424_v44, %v7971_v2 }
 0x8d2   :  { %v5638_v59 = vpop.eup %5637  ;;  %v4920_v63 = vadd.f32 %v8182_v48, %v4886_v30  ;;  %v4701_v5 = vsub.f32 1.5, %v4700_v47 }
 0x8d3   :  { %v5640_v20 = vpop.eup %5639  ;;  %v4682_v11 = vmul.f32 %v5634_v56, %v4681_v62  ;;  %v4708_v36 = vmul.f32 %v5638_v59, %v8567_v24  ;;  %v8578_v25 = vadd.f32 1e-05, %v4470_v46  ;;  %vm4714_vm5 = vweird.f32 %v5638_v59 }
 0x8d4   :  { %4952 = vst [vmem:[%s8755_s5 + $0x78] sm:$0xff] %v4920_v63  ;;  %v4702_v60 = vmul.f32 %v5636_v52, %v4701_v5  ;;  %v4658_v19 = vmul.f32 %v5640_v20, %v8569_v45  ;;  %vm4664_vm6 = vweird.f32 %v5640_v20  ;;  %vm4715_vm8 = vmor %vm4713_vm7, %vm4714_vm5 }
 0x8d5   :  { %v4686_v6 = vsel %vm4685_vm2, %v5634_v56, %v4682_v11  ;;  %v4709_v27 = vmul.f32 %v5638_v59, %v4708_v36  ;;  %5641 = vrsqrt.f32 %v8578_v25  ;;  %v4432_v26 = vpop.xlane.xlu1 %4431  ;;  %vm4665_vm10 = vmor %vm4663_vm9, %vm4664_vm6  ;;  %vm4693_vm12 = vweird.f32 %v8578_v25 }
 0x8d6   :  { %v4853_v55 = vmul.f32 %v4686_v6, %v8362_v10  ;;  %v4706_v34 = vsel %vm4705_vm4, %v5636_v52, %v4702_v60  ;;  %v4659_v16 = vmul.f32 %v5640_v20, %v4658_v19  ;;  %v4474_v33 = vmul.f32 %v4432_v26, %v7971_v2 }
 0x8d7   :  { %v4855_v54 = vmul.f32 %v4706_v34, %v8359_v1  ;;  %v4710_v23 = vmul.f32 0.5, %v4709_v27 }
 0x8d8   :  { %v4887_v29 = vmul.f32 %v8172_v28, %v4853_v55  ;;  %v4660_v32 = vmul.f32 0.5, %v4659_v16  ;;  %v8589_v14 = vadd.f32 1e-05, %v4474_v33  ;;  %v4430_v21 = vpop.xlane.xlu0 %4429 }
 0x8d9   :  { %v4889_v10 = vmul.f32 %v8594_v39, %v4855_v54  ;;  %v4711_v57 = vsub.f32 1.5, %v4710_v23  ;;  %v4473_v41 = vmul.f32 %v4430_v21, %v7971_v2 }
 0x8da   :  { %v4921_v1 = vadd.f32 %v8182_v48, %v4887_v29  ;;  %v4661_v17 = vsub.f32 1.5, %v4660_v32  ;;  %5643 = vrsqrt.f32 %v8589_v14  ;;  %vm4733_vm15 = vweird.f32 %v8589_v14 }
 0x8db   :  { %v5642_v28 = vpop.eup %5641  ;;  %v4923_v56 = vadd.f32 %v8603_v7, %v4889_v10  ;;  %v4712_v52 = vmul.f32 %v5638_v59, %v4711_v57  ;;  %v8607_v0 = vadd.f32 1e-05, %v4473_v41 }
 0x8dc   :  { %4953 = vst [vmem:[%s8755_s5 + $0x80] sm:$0xff] %v4921_v1  ;;  %v4662_v48 = vmul.f32 %v5640_v20, %v4661_v17  ;;  %v4688_v31 = vmul.f32 %v5642_v28, %v8578_v25  ;;  %v4434_v12 = vpop.xlane.xlu2 %4433  ;;  %vm4694_vm11 = vweird.f32 %v5642_v28 }
 0x8dd   :  { %4955 = vst [vmem:[%s8755_s5 + $0x90] sm:$0xff] %v4923_v56  ;;  %v4716_v3 = vsel %vm4715_vm8, %v5638_v59, %v4712_v52  ;;  %5645 = vrsqrt.f32 %v8607_v0  ;;  %v4475_v24 = vmul.f32 %v4434_v12, %v7971_v2  ;;  %vm4695_vm13 = vmor %vm4693_vm12, %vm4694_vm11  ;;  %vm4723_vm2 = vweird.f32 %v8607_v0 }
 0x8de   :  { %v4856_v43 = vmul.f32 %v4716_v3, %v8378_v4  ;;  %v4666_v49 = vsel %vm4665_vm10, %v5640_v20, %v4662_v48  ;;  %v4689_v9 = vmul.f32 %v5642_v28, %v4688_v31 }
 0x8df   :  { %v4851_v45 = vmul.f32 %v4666_v49, %v8381_v22  ;;  %v8622_v35 = vadd.f32 1e-05, %v4475_v24 }
 0x8e0   :  { %v5644_v30 = vpop.eup %5643  ;;  %v4890_v47 = vmul.f32 %v8594_v39, %v4856_v43  ;;  %v4690_v44 = vmul.f32 0.5, %v4689_v9  ;;  %v4436_v62 = vpop.xlane.xlu0 %4435 }
 0x8e1   :  { %v4885_v46 = vmul.f32 %v8594_v39, %v4851_v45  ;;  %v4728_v59 = vmul.f32 %v5644_v30, %v8589_v14  ;;  %5647 = vrsqrt.f32 %v8622_v35  ;;  %v4476_v5 = vmul.f32 %v4436_v62, %v7971_v2 }
 0x8e2   :  { %v4924_v63 = vadd.f32 %v8603_v7, %v4890_v47  ;;  %v4691_v4 = vsub.f32 1.5, %v4690_v44  ;;  %vm4734_vm14 = vweird.f32 %v5644_v30  ;;  %vm4743_vm5 = vweird.f32 %v8622_v35 }
 0x8e3   :  { %v5646_v22 = vpop.eup %5645  ;;  %v4919_v20 = vadd.f32 %v8603_v7, %v4885_v46  ;;  %v4729_v11 = vmul.f32 %v5644_v30, %v4728_v59  ;;  %v8636_v19 = vadd.f32 1e-05, %v4476_v5  ;;  %vm4735_vm0 = vmor %vm4733_vm15, %vm4734_vm14 }
 0x8e4   :  { %4956 = vst [vmem:[%s8755_s5 + $0x98] sm:$0xff] %v4924_v63  ;;  %v4692_v36 = vmul.f32 %v5642_v28, %v4691_v4  ;;  %v4718_v60 = vmul.f32 %v5646_v22, %v8607_v0  ;;  %vm4724_vm1 = vweird.f32 %v5646_v22 }
 0x8e5   :  { %4951 = vst [vmem:[%s8755_s5 + $0x70] sm:$0xff] %v4919_v20  ;;  %v4730_v6 = vmul.f32 0.5, %v4729_v11  ;;  %5649 = vrsqrt.f32 %v8636_v19  ;;  %v4438_v55 = vpop.xlane.xlu1 %4437  ;;  %vm4725_vm3 = vmor %vm4723_vm2, %vm4724_vm1  ;;  %vm4753_vm8 = vweird.f32 %v8636_v19 }
 0x8e6   :  { %v4696_v27 = vsel %vm4695_vm13, %v5642_v28, %v4692_v36  ;;  %v4719_v26 = vmul.f32 %v5646_v22, %v4718_v60  ;;  %v4477_v25 = vmul.f32 %v4438_v55, %v7971_v2 }
 0x8e7   :  { %v5648_v34 = vpop.eup %5647  ;;  %v4854_v16 = vmul.f32 %v4696_v27, %v8390_v58  ;;  %v4731_v33 = vsub.f32 1.5, %v4730_v6 }
 0x8e8   :  { %v4720_v54 = vmul.f32 0.5, %v4719_v26  ;;  %v4738_v23 = vmul.f32 %v5648_v34, %v8622_v35  ;;  %v4442_v29 = vpop.xlane.xlu0 %4441  ;;  %v8647_v10 = vadd.f32 1e-05, %v4477_v25  ;;  %vm4744_vm4 = vweird.f32 %v5648_v34 }
 0x8e9   :  { %v4888_v32 = vmul.f32 %v8594_v39, %v4854_v16  ;;  %v4732_v21 = vmul.f32 %v5644_v30, %v4731_v33  ;;  %v4479_v57 = vmul.f32 %v4442_v29, %v7971_v2  ;;  %vm4745_vm6 = vmor %vm4743_vm5, %vm4744_vm4 }
 0x8ea   :  { %v4721_v41 = vsub.f32 1.5, %v4720_v54  ;;  %v4739_v58 = vmul.f32 %v5648_v34, %v4738_v23  ;;  %5651 = vrsqrt.f32 %v8647_v10  ;;  %vm4763_vm11 = vweird.f32 %v8647_v10 }
 0x8eb   :  { %v4922_v1 = vadd.f32 %v8603_v7, %v4888_v32  ;;  %v4736_v17 = vsel %vm4735_vm0, %v5644_v30, %v4732_v21  ;;  %v5650_v14 = vpop.eup %5649  ;;  %v8654_v48 = vadd.f32 1e-05, %v4479_v57 }
 0x8ec   :  { %v4858_v28 = vmul.f32 %v4736_v17, %v8403_v8  ;;  %v4722_v56 = vmul.f32 %v5646_v22, %v4721_v41  ;;  %v4740_v52 = vmul.f32 0.5, %v4739_v58  ;;  %v4440_v31 = vpop.xlane.xlu2 %4439  ;;  %v4748_v12 = vmul.f32 %v5650_v14, %v8636_v19 }
 0x8ed   :  { %4954 = vst [vmem:[%s8755_s5 + $0x88] sm:$0xff] %v4922_v1  ;;  %v4478_v0 = vmul.f32 %v4440_v31, %v7971_v2  ;;  %5653 = vrsqrt.f32 %v8654_v48  ;;  %vm4754_vm7 = vweird.f32 %v5650_v14  ;;  %vm4783_vm14 = vweird.f32 %v8654_v48 }
 0x8ee   :  { %v4892_v3 = vmul.f32 %v8594_v39, %v4858_v28  ;;  %v4726_v24 = vsel %vm4725_vm3, %v5646_v22, %v4722_v56  ;;  %v4741_v43 = vsub.f32 1.5, %v4740_v52  ;;  %v4749_v49 = vmul.f32 %v5650_v14, %v4748_v12  ;;  %vm4755_vm9 = vmor %vm4753_vm8, %vm4754_vm7 }
 0x8ef   :  { %v4857_v8 = vmul.f32 %v4726_v24, %v8406_v50  ;;  %v8664_v9 = vadd.f32 1e-05, %v4478_v0 }
 0x8f0   :  { %v4926_v45 = vadd.f32 %v8603_v7, %v4892_v3  ;;  %v4742_v30 = vmul.f32 %v5648_v34, %v4741_v43  ;;  %v5652_v47 = vpop.eup %5651  ;;  %v4750_v62 = vmul.f32 0.5, %v4749_v49 }
 0x8f1   :  { %v4891_v44 = vmul.f32 %v8594_v39, %v4857_v8  ;;  %5655 = vrsqrt.f32 %v8664_v9  ;;  %v4758_v46 = vmul.f32 %v5652_v47, %v8647_v10  ;;  %vm4764_vm10 = vweird.f32 %v5652_v47 }
 0x8f2   :  { %4958 = vst [vmem:[%s8755_s5 + $0xa8] sm:$0xff] %v4926_v45  ;;  %v4746_v50 = vsel %vm4745_vm6, %v5648_v34, %v4742_v30  ;;  %v4751_v35 = vsub.f32 1.5, %v4750_v62  ;;  %vm4765_vm12 = vmor %vm4763_vm11, %vm4764_vm10  ;;  %vm4773_vm1 = vweird.f32 %v8664_v9 }
 0x8f3   :  { %v4925_v59 = vadd.f32 %v8603_v7, %v4891_v44  ;;  %v4859_v63 = vmul.f32 %v4746_v50, %v8421_v61  ;;  %v5654_v4 = vpop.eup %5653  ;;  %v4759_v5 = vmul.f32 %v5652_v47, %v4758_v46 }
 0x8f4   :  { %v4752_v20 = vmul.f32 %v5650_v14, %v4751_v35  ;;  %v4778_v11 = vmul.f32 %v5654_v4, %v8654_v48  ;;  %vm4784_vm13 = vweird.f32 %v5654_v4 }
 0x8f5   :  { %4957 = vst [vmem:[%s8755_s5 + $0xa0] sm:$0xff] %v4925_v59  ;;  %v4893_v22 = vmul.f32 %v8594_v39, %v4859_v63  ;;  %v4444_v36 = vpop.xlane.xlu1 %4443  ;;  %v4760_v60 = vmul.f32 0.5, %v4759_v5  ;;  %vm4785_vm15 = vmor %vm4783_vm14, %vm4784_vm13 }
 0x8f6   :  { %v4480_v61 = vmul.f32 %v4444_v36, %v7971_v2  ;;  %v4756_v26 = vsel %vm4755_vm9, %v5650_v14, %v4752_v20  ;;  %v4779_v55 = vmul.f32 %v5654_v4, %v4778_v11 }
 0x8f7   :  { %v5656_v6 = vpop.eup %5655  ;;  %v4927_v27 = vadd.f32 %v8603_v7, %v4893_v22  ;;  %v4860_v34 = vmul.f32 %v4756_v26, %v8424_v40  ;;  %v4761_v16 = vsub.f32 1.5, %v4760_v60 }
 0x8f8   :  { %v4768_v33 = vmul.f32 %v5656_v6, %v8664_v9  ;;  %v4780_v19 = vmul.f32 0.5, %v4779_v55  ;;  %v4512_v25 = vadd.f32 1e-05, %v4480_v61  ;;  %vm4774_vm0 = vweird.f32 %v5656_v6 }
 0x8f9   :  { %4959 = vst [vmem:[%s8755_s5 + $0xb0] sm:$0xff] %v4927_v27  ;;  %v4894_v54 = vmul.f32 %v8594_v39, %v4860_v34  ;;  %v4762_v23 = vmul.f32 %v5652_v47, %v4761_v16  ;;  %vm4775_vm2 = vmor %vm4773_vm1, %vm4774_vm0 }
 0x8fa   :  { %v4769_v29 = vmul.f32 %v5656_v6, %v4768_v33  ;;  %v4781_v32 = vsub.f32 1.5, %v4780_v19  ;;  %5657 = vrsqrt.f32 %v4512_v25  ;;  %vm4793_vm4 = vweird.f32 %v4512_v25 }
 0x8fb   :  { %v4928_v40 = vadd.f32 %v8603_v7, %v4894_v54  ;;  %v4766_v21 = vsel %vm4765_vm12, %v5652_v47, %v4762_v23 }
 0x8fc   :  { %v4770_v57 = vmul.f32 0.5, %v4769_v29  ;;  %v4861_v41 = vmul.f32 %v4766_v21, %v8452_v51  ;;  %v4782_v58 = vmul.f32 %v5654_v4, %v4781_v32 }
 0x8fd   :  { %4960 = vst [vmem:[%s8755_s5 + $0xb8] sm:$0xff] %v4928_v40 }
 0x8fe   :  { %v4771_v10 = vsub.f32 1.5, %v4770_v57  ;;  %v4895_v1 = vmul.f32 %v8594_v39, %v4861_v41  ;;  %v4786_v17 = vsel %vm4785_vm15, %v5654_v4, %v4782_v58 }
 0x8ff   :  { %v4863_v14 = vmul.f32 %v4786_v17, %v8458_v38 }
 0x900   :  { %v4772_v28 = vmul.f32 %v5656_v6, %v4771_v10  ;;  %v5658_v56 = vpop.eup %5657  ;;  %v4929_v51 = vadd.f32 %v8603_v7, %v4895_v1 }
 0x901   :  { %v4897_v52 = vmul.f32 %v8594_v39, %v4863_v14  ;;  %v4788_v31 = vmul.f32 %v5658_v56, %v4512_v25  ;;  %vm4794_vm3 = vweird.f32 %v5658_v56 }
 0x902   :  { %v4776_v48 = vsel %vm4775_vm2, %v5656_v6, %v4772_v28  ;;  %4961 = vst [vmem:[%s8755_s5 + $0xc0] sm:$0xff] %v4929_v51  ;;  %vm4795_vm5 = vmor %vm4793_vm4, %vm4794_vm3 }
 0x903   :  { %v4862_v12 = vmul.f32 %v4776_v48, %v8478_v42  ;;  %v4931_v0 = vadd.f32 %v8603_v7, %v4897_v52  ;;  %v4789_v38 = vmul.f32 %v5658_v56, %v4788_v31 }
 0x905   :  { %v4896_v3 = vmul.f32 %v8594_v39, %v4862_v12  ;;  %4963 = vst [vmem:[%s8755_s5 + $0xd0] sm:$0xff] %v4931_v0  ;;  %v4790_v24 = vmul.f32 0.5, %v4789_v38 }
 0x907   :  { %v4930_v43 = vadd.f32 %v8603_v7, %v4896_v3  ;;  %v4791_v8 = vsub.f32 1.5, %v4790_v24 }
 0x909   :  { %4962 = vst [vmem:[%s8755_s5 + $0xc8] sm:$0xff] %v4930_v43  ;;  %v4792_v49 = vmul.f32 %v5658_v56, %v4791_v8 }
 0x90b   :  { %v4796_v42 = vsel %vm4795_vm5, %v5658_v56, %v4792_v49 }
 0x90c   :  { %v4864_v9 = vmul.f32 %v4796_v42, %v8499_v13 }
 0x90e   :  { %v4898_v45 = vmul.f32 %v8594_v39, %v4864_v9 }
 0x910   :  { %v4932_v30 = vadd.f32 %v8603_v7, %v4898_v45 }
 0x912   :  { %4964 = vst [vmem:[%s8755_s5 + $0xd8] sm:$0xff] %v4932_v30 }
 0x921   :  { %v4446_v47 = vpop.xlane.xlu2 %4445 }
 0x922   :  { %v4481_v44 = vmul.f32 %v4446_v47, %v7971_v2 }
 0x924   :  { %v4513_v62 = vadd.f32 1e-05, %v4481_v44 }
 0x926   :  { %5659 = vrsqrt.f32 %v4513_v62  ;;  %vm4803_vm7 = vweird.f32 %v4513_v62 }
 0x929   :  { %v4448_v50 = vpop.xlane.xlu0 %4447 }
 0x92a   :  { %v4482_v46 = vmul.f32 %v4448_v50, %v7971_v2 }
 0x92c   :  { %v5660_v59 = vpop.eup %5659  ;;  %v4514_v63 = vadd.f32 1e-05, %v4482_v46 }
 0x92d   :  { %v4798_v35 = vmul.f32 %v5660_v59, %v4513_v62  ;;  %vm4804_vm6 = vweird.f32 %v5660_v59 }
 0x92e   :  { %5661 = vrsqrt.f32 %v4514_v63  ;;  %vm4805_vm8 = vmor %vm4803_vm7, %vm4804_vm6  ;;  %vm4813_vm10 = vweird.f32 %v4514_v63 }
 0x92f   :  { %v4799_v13 = vmul.f32 %v5660_v59, %v4798_v35 }
 0x931   :  { %v4800_v4 = vmul.f32 0.5, %v4799_v13  ;;  %v4450_v5 = vpop.xlane.xlu1 %4449 }
 0x932   :  { %v4483_v22 = vmul.f32 %v4450_v5, %v7971_v2 }
 0x933   :  { %v4801_v20 = vsub.f32 1.5, %v4800_v4 }
 0x934   :  { %v5662_v11 = vpop.eup %5661  ;;  %v4515_v36 = vadd.f32 1e-05, %v4483_v22 }
 0x935   :  { %v4802_v60 = vmul.f32 %v5660_v59, %v4801_v20  ;;  %v4808_v61 = vmul.f32 %v5662_v11, %v4514_v63  ;;  %vm4814_vm9 = vweird.f32 %v5662_v11 }
 0x936   :  { %5663 = vrsqrt.f32 %v4515_v36  ;;  %vm4815_vm11 = vmor %vm4813_vm10, %vm4814_vm9  ;;  %vm4823_vm13 = vweird.f32 %v4515_v36 }
 0x937   :  { %v4806_v6 = vsel %vm4805_vm8, %v5660_v59, %v4802_v60  ;;  %v4809_v27 = vmul.f32 %v5662_v11, %v4808_v61 }
 0x938   :  { %v4865_v26 = vmul.f32 %v4806_v6, %v8540_v18 }
 0x939   :  { %v4810_v55 = vmul.f32 0.5, %v4809_v27 }
 0x93a   :  { %v4899_v34 = vmul.f32 %v8594_v39, %v4865_v26  ;;  %v4452_v16 = vpop.xlane.xlu2 %4451 }
 0x93b   :  { %v4811_v33 = vsub.f32 1.5, %v4810_v55  ;;  %v4484_v19 = vmul.f32 %v4452_v16, %v7971_v2 }
 0x93c   :  { %v5664_v25 = vpop.eup %5663  ;;  %v4933_v54 = vadd.f32 %v8603_v7, %v4899_v34 }
 0x93d   :  { %v4812_v23 = vmul.f32 %v5662_v11, %v4811_v33  ;;  %v4818_v29 = vmul.f32 %v5664_v25, %v4515_v36  ;;  %v4516_v32 = vadd.f32 1e-05, %v4484_v19  ;;  %vm4824_vm12 = vweird.f32 %v5664_v25 }
 0x93e   :  { %4965 = vst [vmem:[%s8755_s5 + $0xe0] sm:$0xff] %v4933_v54  ;;  %vm4825_vm14 = vmor %vm4823_vm13, %vm4824_vm12 }
 0x93f   :  { %v4816_v18 = vsel %vm4815_vm11, %v5662_v11, %v4812_v23  ;;  %v4819_v40 = vmul.f32 %v5664_v25, %v4818_v29  ;;  %5665 = vrsqrt.f32 %v4516_v32  ;;  %vm4833_vm0 = vweird.f32 %v4516_v32 }
 0x940   :  { %v4866_v21 = vmul.f32 %v4816_v18, %v8546_v53 }
 0x941   :  { %v4820_v57 = vmul.f32 0.5, %v4819_v40 }
 0x942   :  { %v4900_v2 = vmul.f32 %v8594_v39, %v4866_v21 }
 0x943   :  { %v4821_v41 = vsub.f32 1.5, %v4820_v57 }
 0x944   :  { %v4934_v58 = vadd.f32 %v8603_v7, %v4900_v2 }
 0x945   :  { %v5666_v10 = vpop.eup %5665  ;;  %v4822_v1 = vmul.f32 %v5664_v25, %v4821_v41 }
 0x946   :  { %4966 = vst [vmem:[%s8755_s5 + $0xe8] sm:$0xff] %v4934_v58  ;;  %v4828_v17 = vmul.f32 %v5666_v10, %v4516_v32  ;;  %vm4834_vm15 = vweird.f32 %v5666_v10 }
 0x947   :  { %v4826_v14 = vsel %vm4825_vm14, %v5664_v25, %v4822_v1  ;;  %vm4835_vm1 = vmor %vm4833_vm0, %vm4834_vm15 }
 0x948   :  { %v4867_v28 = vmul.f32 %v4826_v14, %v8553_v15  ;;  %v4829_v53 = vmul.f32 %v5666_v10, %v4828_v17 }
 0x94a   :  { %v4901_v56 = vmul.f32 %v8594_v39, %v4867_v28  ;;  %v4830_v51 = vmul.f32 0.5, %v4829_v53 }
 0x94c   :  { %v4935_v52 = vadd.f32 %v8603_v7, %v4901_v56  ;;  %v4831_v48 = vsub.f32 1.5, %v4830_v51 }
 0x94e   :  { %4967 = vst [vmem:[%s8755_s5 + $0xf0] sm:$0xff] %v4935_v52  ;;  %v4832_v31 = vmul.f32 %v5666_v10, %v4831_v48 }
 0x950   :  { %v4836_v12 = vsel %vm4835_vm1, %v5666_v10, %v4832_v31 }
 0x951   :  { %v4868_v0 = vmul.f32 %v4836_v12, %v8561_v37 }
 0x953   :  { %v4902_v15 = vmul.f32 %v8594_v39, %v4868_v0 }
 0x955   :  { %v4936_v38 = vadd.f32 %v8603_v7, %v4902_v15 }
 0x957   :  { %4968 = vst [vmem:[%s8755_s5 + $0xf8] sm:$0xff] %v4936_v38 }

</bundles_post_ra>
